<compile_context>
chip_gen: v7x
topology: tpu7x:2x2x1
jax: 0.10.0
libtpu: 0.0.40
codegen_flags: <defaults>
</compile_context>

<pallas_src>
from functools import partial

import numpy as np
import jax
import jax.numpy as jnp
from jax.experimental import pallas as pl
from jax.experimental.pallas import tpu as pltpu


KS = 2  # kernel_size = (2, 2) everywhere in this module

_VMEM = pl.BlockSpec(memory_space=pltpu.MemorySpace.VMEM)


def _round_up(x, m):
    return (x + m - 1) // m * m


def _conv_out(size, stride, padding):
    return (size + 2 * padding - KS) // stride + 1


# ----------------------------------------------------------------------------
# The single fused Pallas kernel
# ----------------------------------------------------------------------------
def _betavae_kernel(*refs, latent_dim, n_enc, n_dec):
    """Whole BetaVAE forward: encoder convs (tap-wise selection matmuls) ->
    fused mean||logvar heads -> reparameterize -> decoder (block-diagonal
    ConvTranspose matmuls).  All activations stay resident in VMEM/vregs."""
    f32, bf16 = jnp.float32, jnp.bfloat16
    it = iter(refs)
    x_ref, eps_ref = next(it), next(it)
    enc = [(next(it), next(it), next(it)) for _ in range(n_enc)]   # (G, W, b)
    wh_ref, bh_ref = next(it), next(it)
    dec = [(next(it), next(it)) for _ in range(n_dec)]             # (W, b)
    mlv_ref, recon_ref = next(it), next(it)

    # ---- encoder: Conv2d == sum over 4 taps of (row-gather on MXU) @ W_tap ----
    h = x_ref[...]                                     # (rows, cin) bf16
    for li, (g_ref, w_ref, b_ref) in enumerate(enc):
        acc = None
        for t in range(4):
            # exact gather: each selection row has at most a single 1
            sel = jnp.dot(g_ref[t], h, preferred_element_type=f32)
            par = jnp.dot(sel.astype(bf16), w_ref[t], preferred_element_type=f32)
            acc = par if acc is None else acc + par
        acc = acc + b_ref[...]
        if li < n_enc - 1:                             # ReLU after convs 0..3 only
            acc = jnp.maximum(acc, 0.0)
        h = acc.astype(bf16)                           # (rows_out, cout) bf16

    # ---- fused mean || logvar heads: one lane-dense 128-wide matmul ----
    # TODO(synk): F.flatten does not exist in torch.nn.functional; interpreted
    # as per-sample flatten (the encoder output is (N, 64, 1, 1) -> (N, 64)).
    mlv = jnp.dot(h, wh_ref[...], preferred_element_type=f32) + bh_ref[...]
    mlv_ref[...] = mlv                                 # (MZ, 128) unmasked store

    # ---- reparameterize: z = mean + exp(0.5*logvar) * eps  (exp -> EUP) ----
    mean = mlv[:, :latent_dim]
    logvar = mlv[:, latent_dim:2 * latent_dim]
    z = mean + jnp.exp(0.5 * logvar) * eps_ref[...]    # (MZ, latent) f32

    # ---- decoder: 5 chained matmuls in (spatial-position, channel) layout.
    #      ConvT(k=2,s=2,p=1) on 2x2 inputs is a zero-skipping block-diagonal
    #      matmul (no dilated zeros). ----
    a = z
    for di, (w_ref, b_ref) in enumerate(dec):
        a = jnp.dot(a.astype(bf16), w_ref[...], preferred_element_type=f32) + b_ref[...]
        if di < n_dec - 1:
            a = jnp.maximum(a, 0.0)
    recon_ref[...] = a                                 # (MZ, 128) unmasked store


# ----------------------------------------------------------------------------
# Parameters: PyTorch-layout init + kernel-ready preparation (outside jit)
# ----------------------------------------------------------------------------
def _uniform(key, shape, fan_in):
    bound = 1.0 / jnp.sqrt(jnp.float32(fan_in))
    return jax.random.uniform(key, shape, jnp.float32, -bound, bound)


def init_params(key, input_channels=3, latent_dim=64):
    """PyTorch layouts: Conv2d W=(cout,cin,kh,kw); ConvTranspose2d W=(cin,cout,kh,kw)."""
    enc_defs = [(input_channels, 16), (16, 32), (32, 32), (32, 64), (64, 64)]
    dec_defs = [(64, 64), (64, 32), (32, 32), (32, 16), (16, input_channels)]
    keys = jax.random.split(key, 2 * (len(enc_defs) + len(dec_defs)) + 4)
    ki = 0
    params = {"encoder": [], "decoder": []}
    for cin, cout in enc_defs:
        fan_in = cin * KS * KS
        w = _uniform(keys[ki], (cout, cin, KS, KS), fan_in); ki += 1
        b = _uniform(keys[ki], (cout,), fan_in); ki += 1
        params["encoder"].append({"w": w, "b": b})
    for cin, cout in dec_defs:
        fan_in = cin * KS * KS
        w = _uniform(keys[ki], (cin, cout, KS, KS), fan_in); ki += 1
        b = _uniform(keys[ki], (cout,), fan_in); ki += 1
        params["decoder"].append({"w": w, "b": b})
    params["mean_w"] = _uniform(keys[ki], (64, latent_dim), 64); ki += 1
    params["mean_b"] = _uniform(keys[ki], (latent_dim,), 64); ki += 1
    params["logvar_w"] = _uniform(keys[ki], (64, latent_dim), 64); ki += 1
    params["logvar_b"] = _uniform(keys[ki], (latent_dim,), 64); ki += 1
    return params


def prepare_params(params, batch=2, input_size=16, latent_dim=64):
    """Build all kernel-ready constants with numpy, once, outside jit:
    per-tap 0/1 selection matrices (encode stride-2 patch gather AND zero
    padding), tap-stacked conv weights, fused head weights, and block-diagonal
    decoder weights.  bf16 matmul operands, f32 biases, pre-padded shapes."""
    f32 = np.float32

    # ---- encoder geometry (stride/pad are static module configuration) ----
    strides_pads = [(2, 1)] * 4 + [(1, 0)]
    geoms, h = [], input_size
    for s, p in strides_pads:
        ho = _conv_out(h, s, p)
        geoms.append((h, h, ho, ho, s, p))
        h = ho
    assert h == 1 and params["encoder"][-1]["w"].shape[0] == 64, \
        "BetaVAE is only shape-consistent for input_size == 16"

    mi_true = [batch * g[0] * g[1] for g in geoms]
    mo_true = [batch * g[2] * g[3] for g in geoms]
    mi_pad = [_round_up(mi_true[0], 16)] + [_round_up(m, 16) for m in mo_true[:-1]]
    mo_pad = [_round_up(m, 16) for m in mo_true]

    enc_g, enc_w, enc_b = [], [], []
    for li, (layer, geom) in enumerate(zip(params["encoder"], geoms)):
        h_in, w_in, h_out, w_out, s, p = geom
        w_t = np.asarray(layer["w"], f32)              # (cout, cin, 2, 2)
        b_t = np.asarray(layer["b"], f32)
        cout, cin = w_t.shape[0], w_t.shape[1]
        k_rows = _round_up(cin, 16) if li == 0 else cin  # pad 3 -> 16 input lanes

        # 0/1 selection matrices: one per kernel tap (also encodes padding=1)
        g = np.zeros((4, mo_pad[li], mi_pad[li]), f32)
        for ki in range(KS):
            for kj in range(KS):
                t = ki * KS + kj
                for b_i in range(batch):
                    for oh in range(h_out):
                        ih = oh * s + ki - p
                        if not (0 <= ih < h_in):
                            continue
                        for ow in range(w_out):
                            iw = ow * s + kj - p
                            if not (0 <= iw < w_in):
                                continue
                            r_out = (b_i * h_out + oh) * w_out + ow
                            r_in = (b_i * h_in + ih) * w_in + iw
                            g[t, r_out, r_in] = 1.0
        enc_g.append(jnp.asarray(g, jnp.bfloat16))

        # tap-stacked weights: (4, cin_pad, cout), rows are (ci -> co)
        ws = np.zeros((4, k_rows, cout), f32)
        for ki in range(KS):
            for kj in range(KS):
                ws[ki * KS + kj, :cin, :] = w_t[:, :, ki, kj].T
        enc_w.append(jnp.asarray(ws, jnp.bfloat16))
        enc_b.append(jnp.asarray(b_t.reshape(1, cout), jnp.float32))

    # ---- fused mean||logvar heads: (64, 2*latent) padded to 128 lanes ----
    wh = np.concatenate([np.asarray(params["mean_w"], f32),
                         np.asarray(params["logvar_w"], f32)], axis=1)
    bh = np.concatenate([np.asarray(params["mean_b"], f32),
                         np.asarray(params["logvar_b"], f32)]).reshape(1, -1)
    heads_w = _round_up(2 * latent_dim, 128)
    if heads_w != 2 * latent_dim:
        wh = np.pad(wh, ((0, 0), (0, heads_w - 2 * latent_dim)))
        bh = np.pad(bh, ((0, 0), (0, heads_w - 2 * latent_dim)))

    # ---- decoder ----
    dec_w, dec_b = [], []
    dec_layers = params["decoder"]
    # layer 0: ConvTranspose2d(64,64,(2,2)) stride 1 on a 1x1 input == matmul
    # producing (position=(ki,kj), cout) column layout.
    w0 = np.asarray(dec_layers[0]["w"], f32)            # (cin, cout, 2, 2)
    dec_w.append(jnp.asarray(w0.transpose(0, 2, 3, 1).reshape(w0.shape[0], -1),
                             jnp.bfloat16))
    dec_b.append(jnp.asarray(np.tile(np.asarray(dec_layers[0]["b"], f32), 4)
                             .reshape(1, -1), jnp.float32))
    # layers 1..4: ConvT(k=2,s=2,p=1) on 2x2 -> 2x2: output position p reads
    # input position p with exactly one kernel tap -> block-diagonal matmul.
    taps = ((1, 1), (1, 0), (0, 1), (0, 0))             # tap for p = (oh,ow) row-major
    for idx, layer in enumerate(dec_layers[1:]):
        wt = np.asarray(layer["w"], f32)                # (cin, cout, 2, 2)
        bt = np.asarray(layer["b"], f32)
        cin_d, cout_d = wt.shape[0], wt.shape[1]
        is_last = idx == len(dec_layers) - 2
        cols = _round_up(4 * cout_d, 128) if is_last else 4 * cout_d
        bd = np.zeros((4 * cin_d, cols), f32)
        bb = np.zeros((1, cols), f32)
        for pos, (ki, kj) in enumerate(taps):
            bd[pos * cin_d:(pos + 1) * cin_d, pos * cout_d:(pos + 1) * cout_d] = wt[:, :, ki, kj]
            bb[0, pos * cout_d:(pos + 1) * cout_d] = bt
        dec_w.append(jnp.asarray(bd, jnp.bfloat16))
        dec_b.append(jnp.asarray(bb, jnp.float32))

    return {"enc_g": tuple(enc_g), "enc_w": tuple(enc_w), "enc_b": tuple(enc_b),
            "wh": jnp.asarray(wh, jnp.bfloat16), "bh": jnp.asarray(bh, jnp.float32),
            "dec_w": tuple(dec_w), "dec_b": tuple(dec_b)}


# ----------------------------------------------------------------------------
# BetaVAE forward (one pallas_call + a handful of tiny I/O layout glue ops)
# ----------------------------------------------------------------------------
def beta_vae_forward(prep, x, eps, latent_dim=64):
    n, c, hh, ww = x.shape
    enc_g, enc_w, enc_b = prep["enc_g"], prep["enc_w"], prep["enc_b"]
    dec_w, dec_b = prep["dec_w"], prep["dec_b"]

    rows = n * hh * ww
    rows_pad = enc_g[0].shape[2]       # static: padded input row count
    cin_pad = enc_w[0].shape[1]        # static: padded input channel lanes
    mz = enc_g[-1].shape[1]            # static: padded rows of the latent stage
    heads_w = prep["wh"].shape[1]
    recon_w = dec_w[-1].shape[1]

    # NCHW -> (rows=(n,h,w), lanes=channel) once; pad to the prepared widths.
    x2d = jnp.transpose(x, (0, 2, 3, 1)).reshape(rows, c)
    x2d = jnp.pad(x2d, ((0, rows_pad - rows), (0, cin_pad - c))).astype(jnp.bfloat16)
    eps_p = jnp.pad(eps.astype(jnp.float32), ((0, mz - n), (0, 0)))

    args = [x2d, eps_p]
    for g, w, b in zip(enc_g, enc_w, enc_b):
        args += [g, w, b]
    args += [prep["wh"], prep["bh"]]
    for w, b in zip(dec_w, dec_b):
        args += [w, b]

    mlv, recon = pl.pallas_call(
        partial(_betavae_kernel, latent_dim=latent_dim,
                n_enc=len(enc_g), n_dec=len(dec_w)),
        out_shape=(jax.ShapeDtypeStruct((mz, heads_w), jnp.float32),
                   jax.ShapeDtypeStruct((mz, recon_w), jnp.float32)),
        in_specs=[_VMEM] * len(args),
        out_specs=(_VMEM, _VMEM),
    )(*args)

    mean = mlv[:n, :latent_dim]
    logvar = mlv[:n, latent_dim:2 * latent_dim]
    # recon columns are (oh, ow, cout); this decoder always emits 2x2 spatial.
    recon = recon[:n, :4 * c].reshape(n, 2, 2, c).transpose(0, 3, 1, 2)
    return recon, mean, logvar


# ----------------------------------------------------------------------------
# Main
# ----------------------------------------------------------------------------
if __name__ == "__main__":
    batch, input_channels, input_size, latent_dim = 2, 3, 16, 64

    root = jax.random.PRNGKey(0)
    k_x, k_p, k_eps = jax.random.split(root, 3)

    x = jax.random.normal(k_x, (batch, input_channels, input_size, input_size),
                          jnp.float32)
    eps = jax.random.normal(k_eps, (batch, latent_dim), jnp.float32)

    params = init_params(k_p, input_channels=input_channels, latent_dim=latent_dim)
    prep = prepare_params(params, batch=batch, input_size=input_size,
                          latent_dim=latent_dim)   # once, outside jit

    fwd = jax.jit(partial(beta_vae_forward, latent_dim=latent_dim))
    recon, mean, logvar = fwd(prep, x, eps)
    jax.block_until_ready((recon, mean, logvar))

    # shape sanity checks (decoder with these strides/paddings produces 2x2 output)
    assert mean.shape == (batch, latent_dim)
    assert logvar.shape == (batch, latent_dim)
    assert recon.shape == (batch, input_channels, 2, 2)
    assert bool(jnp.all(jnp.isfinite(recon))) and bool(jnp.all(jnp.isfinite(mean)))
    assert bool(jnp.all(jnp.isfinite(logvar)))

    print("KERNEL_OK")
</pallas_src>

<mosaic_0001>
module attributes {stable_mosaic.version = 11 : i64} {
  func.func @_betavae_kernel(%arg0: memref<512x16xbf16, #tpu.memory_space<vmem>>, %arg1: memref<16x64xf32, #tpu.memory_space<vmem>>, %arg2: memref<4x176x512xbf16, #tpu.memory_space<vmem>>, %arg3: memref<4x16x16xbf16, #tpu.memory_space<vmem>>, %arg4: memref<1x16xf32, #tpu.memory_space<vmem>>, %arg5: memref<4x64x176xbf16, #tpu.memory_space<vmem>>, %arg6: memref<4x16x32xbf16, #tpu.memory_space<vmem>>, %arg7: memref<1x32xf32, #tpu.memory_space<vmem>>, %arg8: memref<4x32x64xbf16, #tpu.memory_space<vmem>>, %arg9: memref<4x32x32xbf16, #tpu.memory_space<vmem>>, %arg10: memref<1x32xf32, #tpu.memory_space<vmem>>, %arg11: memref<4x16x32xbf16, #tpu.memory_space<vmem>>, %arg12: memref<4x32x64xbf16, #tpu.memory_space<vmem>>, %arg13: memref<1x64xf32, #tpu.memory_space<vmem>>, %arg14: memref<4x16x16xbf16, #tpu.memory_space<vmem>>, %arg15: memref<4x64x64xbf16, #tpu.memory_space<vmem>>, %arg16: memref<1x64xf32, #tpu.memory_space<vmem>>, %arg17: memref<64x128xbf16, #tpu.memory_space<vmem>>, %arg18: memref<1x128xf32, #tpu.memory_space<vmem>>, %arg19: memref<64x256xbf16, #tpu.memory_space<vmem>>, %arg20: memref<1x256xf32, #tpu.memory_space<vmem>>, %arg21: memref<256x128xbf16, #tpu.memory_space<vmem>>, %arg22: memref<1x128xf32, #tpu.memory_space<vmem>>, %arg23: memref<128x128xbf16, #tpu.memory_space<vmem>>, %arg24: memref<1x128xf32, #tpu.memory_space<vmem>>, %arg25: memref<128x64xbf16, #tpu.memory_space<vmem>>, %arg26: memref<1x64xf32, #tpu.memory_space<vmem>>, %arg27: memref<64x128xbf16, #tpu.memory_space<vmem>>, %arg28: memref<1x128xf32, #tpu.memory_space<vmem>>, %arg29: memref<16x128xf32, #tpu.memory_space<vmem>>, %arg30: memref<16x128xf32, #tpu.memory_space<vmem>>) attributes {dimension_semantics = [], scalar_prefetch = 0 : i64, scratch_operands = 0 : i64, tpu.core_type = #tpu.core_type<tc>} {
    %c0 = arith.constant 0 : index
    %c0_0 = arith.constant 0 : index
    %0 = vector.load %arg0[%c0, %c0_0] : memref<512x16xbf16, #tpu.memory_space<vmem>>, vector<512x16xbf16>
    %c0_1 = arith.constant 0 : index
    %c0_2 = arith.constant 0 : index
    %c0_3 = arith.constant 0 : index
    %1 = vector.load %arg2[%c0_1, %c0_2, %c0_3] : memref<4x176x512xbf16, #tpu.memory_space<vmem>>, vector<1x176x512xbf16>
    %2 = vector.shape_cast %1 : vector<1x176x512xbf16> to vector<176x512xbf16>
    %cst = arith.constant dense<0.000000e+00> : vector<176x16xf32>
    %3 = tpu.matmul %2, %0, %cst {dimension_numbers = #tpu.dot_dimension_numbers<[1], [0], [0], [1], [0, 0, 1, 1], [], []>} : vector<176x512xbf16>, vector<512x16xbf16>, vector<176x16xf32> -> vector<176x16xf32>
    %4 = arith.truncf %3 : vector<176x16xf32> to vector<176x16xbf16>
    %c0_4 = arith.constant 0 : index
    %c0_5 = arith.constant 0 : index
    %c0_6 = arith.constant 0 : index
    %5 = vector.load %arg3[%c0_4, %c0_5, %c0_6] : memref<4x16x16xbf16, #tpu.memory_space<vmem>>, vector<1x16x16xbf16>
    %6 = vector.shape_cast %5 : vector<1x16x16xbf16> to vector<16x16xbf16>
    %cst_7 = arith.constant dense<0.000000e+00> : vector<176x16xf32>
    %7 = tpu.matmul %4, %6, %cst_7 {dimension_numbers = #tpu.dot_dimension_numbers<[1], [0], [0], [1], [0, 0, 1, 1], [], []>} : vector<176x16xbf16>, vector<16x16xbf16>, vector<176x16xf32> -> vector<176x16xf32>
    %c1 = arith.constant 1 : index
    %c0_8 = arith.constant 0 : index
    %c0_9 = arith.constant 0 : index
    %8 = vector.load %arg2[%c1, %c0_8, %c0_9] : memref<4x176x512xbf16, #tpu.memory_space<vmem>>, vector<1x176x512xbf16>
    %9 = vector.shape_cast %8 : vector<1x176x512xbf16> to vector<176x512xbf16>
    %cst_10 = arith.constant dense<0.000000e+00> : vector<176x16xf32>
    %10 = tpu.matmul %9, %0, %cst_10 {dimension_numbers = #tpu.dot_dimension_numbers<[1], [0], [0], [1], [0, 0, 1, 1], [], []>} : vector<176x512xbf16>, vector<512x16xbf16>, vector<176x16xf32> -> vector<176x16xf32>
    %11 = arith.truncf %10 : vector<176x16xf32> to vector<176x16xbf16>
    %c1_11 = arith.constant 1 : index
    %c0_12 = arith.constant 0 : index
    %c0_13 = arith.constant 0 : index
    %12 = vector.load %arg3[%c1_11, %c0_12, %c0_13] : memref<4x16x16xbf16, #tpu.memory_space<vmem>>, vector<1x16x16xbf16>
    %13 = vector.shape_cast %12 : vector<1x16x16xbf16> to vector<16x16xbf16>
    %cst_14 = arith.constant dense<0.000000e+00> : vector<176x16xf32>
    %14 = tpu.matmul %11, %13, %cst_14 {dimension_numbers = #tpu.dot_dimension_numbers<[1], [0], [0], [1], [0, 0, 1, 1], [], []>} : vector<176x16xbf16>, vector<16x16xbf16>, vector<176x16xf32> -> vector<176x16xf32>
    %15 = arith.addf %7, %14 : vector<176x16xf32>
    %c2 = arith.constant 2 : index
    %c0_15 = arith.constant 0 : index
    %c0_16 = arith.constant 0 : index
    %16 = vector.load %arg2[%c2, %c0_15, %c0_16] : memref<4x176x512xbf16, #tpu.memory_space<vmem>>, vector<1x176x512xbf16>
    %17 = vector.shape_cast %16 : vector<1x176x512xbf16> to vector<176x512xbf16>
    %cst_17 = arith.constant dense<0.000000e+00> : vector<176x16xf32>
    %18 = tpu.matmul %17, %0, %cst_17 {dimension_numbers = #tpu.dot_dimension_numbers<[1], [0], [0], [1], [0, 0, 1, 1], [], []>} : vector<176x512xbf16>, vector<512x16xbf16>, vector<176x16xf32> -> vector<176x16xf32>
    %19 = arith.truncf %18 : vector<176x16xf32> to vector<176x16xbf16>
    %c2_18 = arith.constant 2 : index
    %c0_19 = arith.constant 0 : index
    %c0_20 = arith.constant 0 : index
    %20 = vector.load %arg3[%c2_18, %c0_19, %c0_20] : memref<4x16x16xbf16, #tpu.memory_space<vmem>>, vector<1x16x16xbf16>
    %21 = vector.shape_cast %20 : vector<1x16x16xbf16> to vector<16x16xbf16>
    %cst_21 = arith.constant dense<0.000000e+00> : vector<176x16xf32>
    %22 = tpu.matmul %19, %21, %cst_21 {dimension_numbers = #tpu.dot_dimension_numbers<[1], [0], [0], [1], [0, 0, 1, 1], [], []>} : vector<176x16xbf16>, vector<16x16xbf16>, vector<176x16xf32> -> vector<176x16xf32>
    %23 = arith.addf %15, %22 : vector<176x16xf32>
    %c3 = arith.constant 3 : index
    %c0_22 = arith.constant 0 : index
    %c0_23 = arith.constant 0 : index
    %24 = vector.load %arg2[%c3, %c0_22, %c0_23] : memref<4x176x512xbf16, #tpu.memory_space<vmem>>, vector<1x176x512xbf16>
    %25 = vector.shape_cast %24 : vector<1x176x512xbf16> to vector<176x512xbf16>
    %cst_24 = arith.constant dense<0.000000e+00> : vector<176x16xf32>
    %26 = tpu.matmul %25, %0, %cst_24 {dimension_numbers = #tpu.dot_dimension_numbers<[1], [0], [0], [1], [0, 0, 1, 1], [], []>} : vector<176x512xbf16>, vector<512x16xbf16>, vector<176x16xf32> -> vector<176x16xf32>
    %27 = arith.truncf %26 : vector<176x16xf32> to vector<176x16xbf16>
    %c3_25 = arith.constant 3 : index
    %c0_26 = arith.constant 0 : index
    %c0_27 = arith.constant 0 : index
    %28 = vector.load %arg3[%c3_25, %c0_26, %c0_27] : memref<4x16x16xbf16, #tpu.memory_space<vmem>>, vector<1x16x16xbf16>
    %29 = vector.shape_cast %28 : vector<1x16x16xbf16> to vector<16x16xbf16>
    %cst_28 = arith.constant dense<0.000000e+00> : vector<176x16xf32>
    %30 = tpu.matmul %27, %29, %cst_28 {dimension_numbers = #tpu.dot_dimension_numbers<[1], [0], [0], [1], [0, 0, 1, 1], [], []>} : vector<176x16xbf16>, vector<16x16xbf16>, vector<176x16xf32> -> vector<176x16xf32>
    %31 = arith.addf %23, %30 : vector<176x16xf32>
    %c0_29 = arith.constant 0 : index
    %c0_30 = arith.constant 0 : index
    %32 = vector.load %arg4[%c0_29, %c0_30] : memref<1x16xf32, #tpu.memory_space<vmem>>, vector<1x16xf32>
    %33 = vector.broadcast %32 : vector<1x16xf32> to vector<176x16xf32>
    %34 = arith.addf %31, %33 : vector<176x16xf32>
    %cst_31 = arith.constant 0.000000e+00 : f32
    %35 = vector.broadcast %cst_31 : f32 to vector<176x16xf32>
    %36 = arith.maximumf %34, %35 : vector<176x16xf32>
    %37 = arith.truncf %36 : vector<176x16xf32> to vector<176x16xbf16>
    %c0_32 = arith.constant 0 : index
    %c0_33 = arith.constant 0 : index
    %c0_34 = arith.constant 0 : index
    %38 = vector.load %arg5[%c0_32, %c0_33, %c0_34] : memref<4x64x176xbf16, #tpu.memory_space<vmem>>, vector<1x64x176xbf16>
    %39 = vector.shape_cast %38 : vector<1x64x176xbf16> to vector<64x176xbf16>
    %cst_35 = arith.constant dense<0.000000e+00> : vector<64x16xf32>
    %40 = tpu.matmul %39, %37, %cst_35 {dimension_numbers = #tpu.dot_dimension_numbers<[1], [0], [0], [1], [0, 0, 1, 1], [], []>} : vector<64x176xbf16>, vector<176x16xbf16>, vector<64x16xf32> -> vector<64x16xf32>
    %41 = arith.truncf %40 : vector<64x16xf32> to vector<64x16xbf16>
    %c0_36 = arith.constant 0 : index
    %c0_37 = arith.constant 0 : index
    %c0_38 = arith.constant 0 : index
    %42 = vector.load %arg6[%c0_36, %c0_37, %c0_38] : memref<4x16x32xbf16, #tpu.memory_space<vmem>>, vector<1x16x32xbf16>
    %43 = vector.shape_cast %42 : vector<1x16x32xbf16> to vector<16x32xbf16>
    %cst_39 = arith.constant dense<0.000000e+00> : vector<64x32xf32>
    %44 = tpu.matmul %41, %43, %cst_39 {dimension_numbers = #tpu.dot_dimension_numbers<[1], [0], [0], [1], [0, 0, 1, 1], [], []>} : vector<64x16xbf16>, vector<16x32xbf16>, vector<64x32xf32> -> vector<64x32xf32>
    %c1_40 = arith.constant 1 : index
    %c0_41 = arith.constant 0 : index
    %c0_42 = arith.constant 0 : index
    %45 = vector.load %arg5[%c1_40, %c0_41, %c0_42] : memref<4x64x176xbf16, #tpu.memory_space<vmem>>, vector<1x64x176xbf16>
    %46 = vector.shape_cast %45 : vector<1x64x176xbf16> to vector<64x176xbf16>
    %cst_43 = arith.constant dense<0.000000e+00> : vector<64x16xf32>
    %47 = tpu.matmul %46, %37, %cst_43 {dimension_numbers = #tpu.dot_dimension_numbers<[1], [0], [0], [1], [0, 0, 1, 1], [], []>} : vector<64x176xbf16>, vector<176x16xbf16>, vector<64x16xf32> -> vector<64x16xf32>
    %48 = arith.truncf %47 : vector<64x16xf32> to vector<64x16xbf16>
    %c1_44 = arith.constant 1 : index
    %c0_45 = arith.constant 0 : index
    %c0_46 = arith.constant 0 : index
    %49 = vector.load %arg6[%c1_44, %c0_45, %c0_46] : memref<4x16x32xbf16, #tpu.memory_space<vmem>>, vector<1x16x32xbf16>
    %50 = vector.shape_cast %49 : vector<1x16x32xbf16> to vector<16x32xbf16>
    %cst_47 = arith.constant dense<0.000000e+00> : vector<64x32xf32>
    %51 = tpu.matmul %48, %50, %cst_47 {dimension_numbers = #tpu.dot_dimension_numbers<[1], [0], [0], [1], [0, 0, 1, 1], [], []>} : vector<64x16xbf16>, vector<16x32xbf16>, vector<64x32xf32> -> vector<64x32xf32>
    %52 = arith.addf %44, %51 : vector<64x32xf32>
    %c2_48 = arith.constant 2 : index
    %c0_49 = arith.constant 0 : index
    %c0_50 = arith.constant 0 : index
    %53 = vector.load %arg5[%c2_48, %c0_49, %c0_50] : memref<4x64x176xbf16, #tpu.memory_space<vmem>>, vector<1x64x176xbf16>
    %54 = vector.shape_cast %53 : vector<1x64x176xbf16> to vector<64x176xbf16>
    %cst_51 = arith.constant dense<0.000000e+00> : vector<64x16xf32>
    %55 = tpu.matmul %54, %37, %cst_51 {dimension_numbers = #tpu.dot_dimension_numbers<[1], [0], [0], [1], [0, 0, 1, 1], [], []>} : vector<64x176xbf16>, vector<176x16xbf16>, vector<64x16xf32> -> vector<64x16xf32>
    %56 = arith.truncf %55 : vector<64x16xf32> to vector<64x16xbf16>
    %c2_52 = arith.constant 2 : index
    %c0_53 = arith.constant 0 : index
    %c0_54 = arith.constant 0 : index
    %57 = vector.load %arg6[%c2_52, %c0_53, %c0_54] : memref<4x16x32xbf16, #tpu.memory_space<vmem>>, vector<1x16x32xbf16>
    %58 = vector.shape_cast %57 : vector<1x16x32xbf16> to vector<16x32xbf16>
    %cst_55 = arith.constant dense<0.000000e+00> : vector<64x32xf32>
    %59 = tpu.matmul %56, %58, %cst_55 {dimension_numbers = #tpu.dot_dimension_numbers<[1], [0], [0], [1], [0, 0, 1, 1], [], []>} : vector<64x16xbf16>, vector<16x32xbf16>, vector<64x32xf32> -> vector<64x32xf32>
    %60 = arith.addf %52, %59 : vector<64x32xf32>
    %c3_56 = arith.constant 3 : index
    %c0_57 = arith.constant 0 : index
    %c0_58 = arith.constant 0 : index
    %61 = vector.load %arg5[%c3_56, %c0_57, %c0_58] : memref<4x64x176xbf16, #tpu.memory_space<vmem>>, vector<1x64x176xbf16>
    %62 = vector.shape_cast %61 : vector<1x64x176xbf16> to vector<64x176xbf16>
    %cst_59 = arith.constant dense<0.000000e+00> : vector<64x16xf32>
    %63 = tpu.matmul %62, %37, %cst_59 {dimension_numbers = #tpu.dot_dimension_numbers<[1], [0], [0], [1], [0, 0, 1, 1], [], []>} : vector<64x176xbf16>, vector<176x16xbf16>, vector<64x16xf32> -> vector<64x16xf32>
    %64 = arith.truncf %63 : vector<64x16xf32> to vector<64x16xbf16>
    %c3_60 = arith.constant 3 : index
    %c0_61 = arith.constant 0 : index
    %c0_62 = arith.constant 0 : index
    %65 = vector.load %arg6[%c3_60, %c0_61, %c0_62] : memref<4x16x32xbf16, #tpu.memory_space<vmem>>, vector<1x16x32xbf16>
    %66 = vector.shape_cast %65 : vector<1x16x32xbf16> to vector<16x32xbf16>
    %cst_63 = arith.constant dense<0.000000e+00> : vector<64x32xf32>
    %67 = tpu.matmul %64, %66, %cst_63 {dimension_numbers = #tpu.dot_dimension_numbers<[1], [0], [0], [1], [0, 0, 1, 1], [], []>} : vector<64x16xbf16>, vector<16x32xbf16>, vector<64x32xf32> -> vector<64x32xf32>
    %68 = arith.addf %60, %67 : vector<64x32xf32>
    %c0_64 = arith.constant 0 : index
    %c0_65 = arith.constant 0 : index
    %69 = vector.load %arg7[%c0_64, %c0_65] : memref<1x32xf32, #tpu.memory_space<vmem>>, vector<1x32xf32>
    %70 = vector.broadcast %69 : vector<1x32xf32> to vector<64x32xf32>
    %71 = arith.addf %68, %70 : vector<64x32xf32>
    %cst_66 = arith.constant 0.000000e+00 : f32
    %72 = vector.broadcast %cst_66 : f32 to vector<64x32xf32>
    %73 = arith.maximumf %71, %72 : vector<64x32xf32>
    %74 = arith.truncf %73 : vector<64x32xf32> to vector<64x32xbf16>
    %c0_67 = arith.constant 0 : index
    %c0_68 = arith.constant 0 : index
    %c0_69 = arith.constant 0 : index
    %75 = vector.load %arg8[%c0_67, %c0_68, %c0_69] : memref<4x32x64xbf16, #tpu.memory_space<vmem>>, vector<1x32x64xbf16>
    %76 = vector.shape_cast %75 : vector<1x32x64xbf16> to vector<32x64xbf16>
    %cst_70 = arith.constant dense<0.000000e+00> : vector<32x32xf32>
    %77 = tpu.matmul %76, %74, %cst_70 {dimension_numbers = #tpu.dot_dimension_numbers<[1], [0], [0], [1], [0, 0, 1, 1], [], []>} : vector<32x64xbf16>, vector<64x32xbf16>, vector<32x32xf32> -> vector<32x32xf32>
    %78 = arith.truncf %77 : vector<32x32xf32> to vector<32x32xbf16>
    %c0_71 = arith.constant 0 : index
    %c0_72 = arith.constant 0 : index
    %c0_73 = arith.constant 0 : index
    %79 = vector.load %arg9[%c0_71, %c0_72, %c0_73] : memref<4x32x32xbf16, #tpu.memory_space<vmem>>, vector<1x32x32xbf16>
    %80 = vector.shape_cast %79 : vector<1x32x32xbf16> to vector<32x32xbf16>
    %cst_74 = arith.constant dense<0.000000e+00> : vector<32x32xf32>
    %81 = tpu.matmul %78, %80, %cst_74 {dimension_numbers = #tpu.dot_dimension_numbers<[1], [0], [0], [1], [0, 0, 1, 1], [], []>} : vector<32x32xbf16>, vector<32x32xbf16>, vector<32x32xf32> -> vector<32x32xf32>
    %c1_75 = arith.constant 1 : index
    %c0_76 = arith.constant 0 : index
    %c0_77 = arith.constant 0 : index
    %82 = vector.load %arg8[%c1_75, %c0_76, %c0_77] : memref<4x32x64xbf16, #tpu.memory_space<vmem>>, vector<1x32x64xbf16>
    %83 = vector.shape_cast %82 : vector<1x32x64xbf16> to vector<32x64xbf16>
    %cst_78 = arith.constant dense<0.000000e+00> : vector<32x32xf32>
    %84 = tpu.matmul %83, %74, %cst_78 {dimension_numbers = #tpu.dot_dimension_numbers<[1], [0], [0], [1], [0, 0, 1, 1], [], []>} : vector<32x64xbf16>, vector<64x32xbf16>, vector<32x32xf32> -> vector<32x32xf32>
    %85 = arith.truncf %84 : vector<32x32xf32> to vector<32x32xbf16>
    %c1_79 = arith.constant 1 : index
    %c0_80 = arith.constant 0 : index
    %c0_81 = arith.constant 0 : index
    %86 = vector.load %arg9[%c1_79, %c0_80, %c0_81] : memref<4x32x32xbf16, #tpu.memory_space<vmem>>, vector<1x32x32xbf16>
    %87 = vector.shape_cast %86 : vector<1x32x32xbf16> to vector<32x32xbf16>
    %cst_82 = arith.constant dense<0.000000e+00> : vector<32x32xf32>
    %88 = tpu.matmul %85, %87, %cst_82 {dimension_numbers = #tpu.dot_dimension_numbers<[1], [0], [0], [1], [0, 0, 1, 1], [], []>} : vector<32x32xbf16>, vector<32x32xbf16>, vector<32x32xf32> -> vector<32x32xf32>
    %89 = arith.addf %81, %88 : vector<32x32xf32>
    %c2_83 = arith.constant 2 : index
    %c0_84 = arith.constant 0 : index
    %c0_85 = arith.constant 0 : index
    %90 = vector.load %arg8[%c2_83, %c0_84, %c0_85] : memref<4x32x64xbf16, #tpu.memory_space<vmem>>, vector<1x32x64xbf16>
    %91 = vector.shape_cast %90 : vector<1x32x64xbf16> to vector<32x64xbf16>
    %cst_86 = arith.constant dense<0.000000e+00> : vector<32x32xf32>
    %92 = tpu.matmul %91, %74, %cst_86 {dimension_numbers = #tpu.dot_dimension_numbers<[1], [0], [0], [1], [0, 0, 1, 1], [], []>} : vector<32x64xbf16>, vector<64x32xbf16>, vector<32x32xf32> -> vector<32x32xf32>
    %93 = arith.truncf %92 : vector<32x32xf32> to vector<32x32xbf16>
    %c2_87 = arith.constant 2 : index
    %c0_88 = arith.constant 0 : index
    %c0_89 = arith.constant 0 : index
    %94 = vector.load %arg9[%c2_87, %c0_88, %c0_89] : memref<4x32x32xbf16, #tpu.memory_space<vmem>>, vector<1x32x32xbf16>
    %95 = vector.shape_cast %94 : vector<1x32x32xbf16> to vector<32x32xbf16>
    %cst_90 = arith.constant dense<0.000000e+00> : vector<32x32xf32>
    %96 = tpu.matmul %93, %95, %cst_90 {dimension_numbers = #tpu.dot_dimension_numbers<[1], [0], [0], [1], [0, 0, 1, 1], [], []>} : vector<32x32xbf16>, vector<32x32xbf16>, vector<32x32xf32> -> vector<32x32xf32>
    %97 = arith.addf %89, %96 : vector<32x32xf32>
    %c3_91 = arith.constant 3 : index
    %c0_92 = arith.constant 0 : index
    %c0_93 = arith.constant 0 : index
    %98 = vector.load %arg8[%c3_91, %c0_92, %c0_93] : memref<4x32x64xbf16, #tpu.memory_space<vmem>>, vector<1x32x64xbf16>
    %99 = vector.shape_cast %98 : vector<1x32x64xbf16> to vector<32x64xbf16>
    %cst_94 = arith.constant dense<0.000000e+00> : vector<32x32xf32>
    %100 = tpu.matmul %99, %74, %cst_94 {dimension_numbers = #tpu.dot_dimension_numbers<[1], [0], [0], [1], [0, 0, 1, 1], [], []>} : vector<32x64xbf16>, vector<64x32xbf16>, vector<32x32xf32> -> vector<32x32xf32>
    %101 = arith.truncf %100 : vector<32x32xf32> to vector<32x32xbf16>
    %c3_95 = arith.constant 3 : index
    %c0_96 = arith.constant 0 : index
    %c0_97 = arith.constant 0 : index
    %102 = vector.load %arg9[%c3_95, %c0_96, %c0_97] : memref<4x32x32xbf16, #tpu.memory_space<vmem>>, vector<1x32x32xbf16>
    %103 = vector.shape_cast %102 : vector<1x32x32xbf16> to vector<32x32xbf16>
    %cst_98 = arith.constant dense<0.000000e+00> : vector<32x32xf32>
    %104 = tpu.matmul %101, %103, %cst_98 {dimension_numbers = #tpu.dot_dimension_numbers<[1], [0], [0], [1], [0, 0, 1, 1], [], []>} : vector<32x32xbf16>, vector<32x32xbf16>, vector<32x32xf32> -> vector<32x32xf32>
    %105 = arith.addf %97, %104 : vector<32x32xf32>
    %c0_99 = arith.constant 0 : index
    %c0_100 = arith.constant 0 : index
    %106 = vector.load %arg10[%c0_99, %c0_100] : memref<1x32xf32, #tpu.memory_space<vmem>>, vector<1x32xf32>
    %107 = vector.broadcast %106 : vector<1x32xf32> to vector<32x32xf32>
    %108 = arith.addf %105, %107 : vector<32x32xf32>
    %cst_101 = arith.constant 0.000000e+00 : f32
    %109 = vector.broadcast %cst_101 : f32 to vector<32x32xf32>
    %110 = arith.maximumf %108, %109 : vector<32x32xf32>
    %111 = arith.truncf %110 : vector<32x32xf32> to vector<32x32xbf16>
    %c0_102 = arith.constant 0 : index
    %c0_103 = arith.constant 0 : index
    %c0_104 = arith.constant 0 : index
    %112 = vector.load %arg11[%c0_102, %c0_103, %c0_104] : memref<4x16x32xbf16, #tpu.memory_space<vmem>>, vector<1x16x32xbf16>
    %113 = vector.shape_cast %112 : vector<1x16x32xbf16> to vector<16x32xbf16>
    %cst_105 = arith.constant dense<0.000000e+00> : vector<16x32xf32>
    %114 = tpu.matmul %113, %111, %cst_105 {dimension_numbers = #tpu.dot_dimension_numbers<[1], [0], [0], [1], [0, 0, 1, 1], [], []>} : vector<16x32xbf16>, vector<32x32xbf16>, vector<16x32xf32> -> vector<16x32xf32>
    %115 = arith.truncf %114 : vector<16x32xf32> to vector<16x32xbf16>
    %c0_106 = arith.constant 0 : index
    %c0_107 = arith.constant 0 : index
    %c0_108 = arith.constant 0 : index
    %116 = vector.load %arg12[%c0_106, %c0_107, %c0_108] : memref<4x32x64xbf16, #tpu.memory_space<vmem>>, vector<1x32x64xbf16>
    %117 = vector.shape_cast %116 : vector<1x32x64xbf16> to vector<32x64xbf16>
    %cst_109 = arith.constant dense<0.000000e+00> : vector<16x64xf32>
    %118 = tpu.matmul %115, %117, %cst_109 {dimension_numbers = #tpu.dot_dimension_numbers<[1], [0], [0], [1], [0, 0, 1, 1], [], []>} : vector<16x32xbf16>, vector<32x64xbf16>, vector<16x64xf32> -> vector<16x64xf32>
    %c1_110 = arith.constant 1 : index
    %c0_111 = arith.constant 0 : index
    %c0_112 = arith.constant 0 : index
    %119 = vector.load %arg11[%c1_110, %c0_111, %c0_112] : memref<4x16x32xbf16, #tpu.memory_space<vmem>>, vector<1x16x32xbf16>
    %120 = vector.shape_cast %119 : vector<1x16x32xbf16> to vector<16x32xbf16>
    %cst_113 = arith.constant dense<0.000000e+00> : vector<16x32xf32>
    %121 = tpu.matmul %120, %111, %cst_113 {dimension_numbers = #tpu.dot_dimension_numbers<[1], [0], [0], [1], [0, 0, 1, 1], [], []>} : vector<16x32xbf16>, vector<32x32xbf16>, vector<16x32xf32> -> vector<16x32xf32>
    %122 = arith.truncf %121 : vector<16x32xf32> to vector<16x32xbf16>
    %c1_114 = arith.constant 1 : index
    %c0_115 = arith.constant 0 : index
    %c0_116 = arith.constant 0 : index
    %123 = vector.load %arg12[%c1_114, %c0_115, %c0_116] : memref<4x32x64xbf16, #tpu.memory_space<vmem>>, vector<1x32x64xbf16>
    %124 = vector.shape_cast %123 : vector<1x32x64xbf16> to vector<32x64xbf16>
    %cst_117 = arith.constant dense<0.000000e+00> : vector<16x64xf32>
    %125 = tpu.matmul %122, %124, %cst_117 {dimension_numbers = #tpu.dot_dimension_numbers<[1], [0], [0], [1], [0, 0, 1, 1], [], []>} : vector<16x32xbf16>, vector<32x64xbf16>, vector<16x64xf32> -> vector<16x64xf32>
    %126 = arith.addf %118, %125 : vector<16x64xf32>
    %c2_118 = arith.constant 2 : index
    %c0_119 = arith.constant 0 : index
    %c0_120 = arith.constant 0 : index
    %127 = vector.load %arg11[%c2_118, %c0_119, %c0_120] : memref<4x16x32xbf16, #tpu.memory_space<vmem>>, vector<1x16x32xbf16>
    %128 = vector.shape_cast %127 : vector<1x16x32xbf16> to vector<16x32xbf16>
    %cst_121 = arith.constant dense<0.000000e+00> : vector<16x32xf32>
    %129 = tpu.matmul %128, %111, %cst_121 {dimension_numbers = #tpu.dot_dimension_numbers<[1], [0], [0], [1], [0, 0, 1, 1], [], []>} : vector<16x32xbf16>, vector<32x32xbf16>, vector<16x32xf32> -> vector<16x32xf32>
    %130 = arith.truncf %129 : vector<16x32xf32> to vector<16x32xbf16>
    %c2_122 = arith.constant 2 : index
    %c0_123 = arith.constant 0 : index
    %c0_124 = arith.constant 0 : index
    %131 = vector.load %arg12[%c2_122, %c0_123, %c0_124] : memref<4x32x64xbf16, #tpu.memory_space<vmem>>, vector<1x32x64xbf16>
    %132 = vector.shape_cast %131 : vector<1x32x64xbf16> to vector<32x64xbf16>
    %cst_125 = arith.constant dense<0.000000e+00> : vector<16x64xf32>
    %133 = tpu.matmul %130, %132, %cst_125 {dimension_numbers = #tpu.dot_dimension_numbers<[1], [0], [0], [1], [0, 0, 1, 1], [], []>} : vector<16x32xbf16>, vector<32x64xbf16>, vector<16x64xf32> -> vector<16x64xf32>
    %134 = arith.addf %126, %133 : vector<16x64xf32>
    %c3_126 = arith.constant 3 : index
    %c0_127 = arith.constant 0 : index
    %c0_128 = arith.constant 0 : index
    %135 = vector.load %arg11[%c3_126, %c0_127, %c0_128] : memref<4x16x32xbf16, #tpu.memory_space<vmem>>, vector<1x16x32xbf16>
    %136 = vector.shape_cast %135 : vector<1x16x32xbf16> to vector<16x32xbf16>
    %cst_129 = arith.constant dense<0.000000e+00> : vector<16x32xf32>
    %137 = tpu.matmul %136, %111, %cst_129 {dimension_numbers = #tpu.dot_dimension_numbers<[1], [0], [0], [1], [0, 0, 1, 1], [], []>} : vector<16x32xbf16>, vector<32x32xbf16>, vector<16x32xf32> -> vector<16x32xf32>
    %138 = arith.truncf %137 : vector<16x32xf32> to vector<16x32xbf16>
    %c3_130 = arith.constant 3 : index
    %c0_131 = arith.constant 0 : index
    %c0_132 = arith.constant 0 : index
    %139 = vector.load %arg12[%c3_130, %c0_131, %c0_132] : memref<4x32x64xbf16, #tpu.memory_space<vmem>>, vector<1x32x64xbf16>
    %140 = vector.shape_cast %139 : vector<1x32x64xbf16> to vector<32x64xbf16>
    %cst_133 = arith.constant dense<0.000000e+00> : vector<16x64xf32>
    %141 = tpu.matmul %138, %140, %cst_133 {dimension_numbers = #tpu.dot_dimension_numbers<[1], [0], [0], [1], [0, 0, 1, 1], [], []>} : vector<16x32xbf16>, vector<32x64xbf16>, vector<16x64xf32> -> vector<16x64xf32>
    %142 = arith.addf %134, %141 : vector<16x64xf32>
    %c0_134 = arith.constant 0 : index
    %c0_135 = arith.constant 0 : index
    %143 = vector.load %arg13[%c0_134, %c0_135] : memref<1x64xf32, #tpu.memory_space<vmem>>, vector<1x64xf32>
    %144 = vector.broadcast %143 : vector<1x64xf32> to vector<16x64xf32>
    %145 = arith.addf %142, %144 : vector<16x64xf32>
    %cst_136 = arith.constant 0.000000e+00 : f32
    %146 = vector.broadcast %cst_136 : f32 to vector<16x64xf32>
    %147 = arith.maximumf %145, %146 : vector<16x64xf32>
    %148 = arith.truncf %147 : vector<16x64xf32> to vector<16x64xbf16>
    %c0_137 = arith.constant 0 : index
    %c0_138 = arith.constant 0 : index
    %c0_139 = arith.constant 0 : index
    %149 = vector.load %arg14[%c0_137, %c0_138, %c0_139] : memref<4x16x16xbf16, #tpu.memory_space<vmem>>, vector<1x16x16xbf16>
    %150 = vector.shape_cast %149 : vector<1x16x16xbf16> to vector<16x16xbf16>
    %cst_140 = arith.constant dense<0.000000e+00> : vector<16x64xf32>
    %151 = tpu.matmul %150, %148, %cst_140 {dimension_numbers = #tpu.dot_dimension_numbers<[1], [0], [0], [1], [0, 0, 1, 1], [], []>} : vector<16x16xbf16>, vector<16x64xbf16>, vector<16x64xf32> -> vector<16x64xf32>
    %152 = arith.truncf %151 : vector<16x64xf32> to vector<16x64xbf16>
    %c0_141 = arith.constant 0 : index
    %c0_142 = arith.constant 0 : index
    %c0_143 = arith.constant 0 : index
    %153 = vector.load %arg15[%c0_141, %c0_142, %c0_143] : memref<4x64x64xbf16, #tpu.memory_space<vmem>>, vector<1x64x64xbf16>
    %154 = vector.shape_cast %153 : vector<1x64x64xbf16> to vector<64x64xbf16>
    %cst_144 = arith.constant dense<0.000000e+00> : vector<16x64xf32>
    %155 = tpu.matmul %152, %154, %cst_144 {dimension_numbers = #tpu.dot_dimension_numbers<[1], [0], [0], [1], [0, 0, 1, 1], [], []>} : vector<16x64xbf16>, vector<64x64xbf16>, vector<16x64xf32> -> vector<16x64xf32>
    %c1_145 = arith.constant 1 : index
    %c0_146 = arith.constant 0 : index
    %c0_147 = arith.constant 0 : index
    %156 = vector.load %arg14[%c1_145, %c0_146, %c0_147] : memref<4x16x16xbf16, #tpu.memory_space<vmem>>, vector<1x16x16xbf16>
    %157 = vector.shape_cast %156 : vector<1x16x16xbf16> to vector<16x16xbf16>
    %cst_148 = arith.constant dense<0.000000e+00> : vector<16x64xf32>
    %158 = tpu.matmul %157, %148, %cst_148 {dimension_numbers = #tpu.dot_dimension_numbers<[1], [0], [0], [1], [0, 0, 1, 1], [], []>} : vector<16x16xbf16>, vector<16x64xbf16>, vector<16x64xf32> -> vector<16x64xf32>
    %159 = arith.truncf %158 : vector<16x64xf32> to vector<16x64xbf16>
    %c1_149 = arith.constant 1 : index
    %c0_150 = arith.constant 0 : index
    %c0_151 = arith.constant 0 : index
    %160 = vector.load %arg15[%c1_149, %c0_150, %c0_151] : memref<4x64x64xbf16, #tpu.memory_space<vmem>>, vector<1x64x64xbf16>
    %161 = vector.shape_cast %160 : vector<1x64x64xbf16> to vector<64x64xbf16>
    %cst_152 = arith.constant dense<0.000000e+00> : vector<16x64xf32>
    %162 = tpu.matmul %159, %161, %cst_152 {dimension_numbers = #tpu.dot_dimension_numbers<[1], [0], [0], [1], [0, 0, 1, 1], [], []>} : vector<16x64xbf16>, vector<64x64xbf16>, vector<16x64xf32> -> vector<16x64xf32>
    %163 = arith.addf %155, %162 : vector<16x64xf32>
    %c2_153 = arith.constant 2 : index
    %c0_154 = arith.constant 0 : index
    %c0_155 = arith.constant 0 : index
    %164 = vector.load %arg14[%c2_153, %c0_154, %c0_155] : memref<4x16x16xbf16, #tpu.memory_space<vmem>>, vector<1x16x16xbf16>
    %165 = vector.shape_cast %164 : vector<1x16x16xbf16> to vector<16x16xbf16>
    %cst_156 = arith.constant dense<0.000000e+00> : vector<16x64xf32>
    %166 = tpu.matmul %165, %148, %cst_156 {dimension_numbers = #tpu.dot_dimension_numbers<[1], [0], [0], [1], [0, 0, 1, 1], [], []>} : vector<16x16xbf16>, vector<16x64xbf16>, vector<16x64xf32> -> vector<16x64xf32>
    %167 = arith.truncf %166 : vector<16x64xf32> to vector<16x64xbf16>
    %c2_157 = arith.constant 2 : index
    %c0_158 = arith.constant 0 : index
    %c0_159 = arith.constant 0 : index
    %168 = vector.load %arg15[%c2_157, %c0_158, %c0_159] : memref<4x64x64xbf16, #tpu.memory_space<vmem>>, vector<1x64x64xbf16>
    %169 = vector.shape_cast %168 : vector<1x64x64xbf16> to vector<64x64xbf16>
    %cst_160 = arith.constant dense<0.000000e+00> : vector<16x64xf32>
    %170 = tpu.matmul %167, %169, %cst_160 {dimension_numbers = #tpu.dot_dimension_numbers<[1], [0], [0], [1], [0, 0, 1, 1], [], []>} : vector<16x64xbf16>, vector<64x64xbf16>, vector<16x64xf32> -> vector<16x64xf32>
    %171 = arith.addf %163, %170 : vector<16x64xf32>
    %c3_161 = arith.constant 3 : index
    %c0_162 = arith.constant 0 : index
    %c0_163 = arith.constant 0 : index
    %172 = vector.load %arg14[%c3_161, %c0_162, %c0_163] : memref<4x16x16xbf16, #tpu.memory_space<vmem>>, vector<1x16x16xbf16>
    %173 = vector.shape_cast %172 : vector<1x16x16xbf16> to vector<16x16xbf16>
    %cst_164 = arith.constant dense<0.000000e+00> : vector<16x64xf32>
    %174 = tpu.matmul %173, %148, %cst_164 {dimension_numbers = #tpu.dot_dimension_numbers<[1], [0], [0], [1], [0, 0, 1, 1], [], []>} : vector<16x16xbf16>, vector<16x64xbf16>, vector<16x64xf32> -> vector<16x64xf32>
    %175 = arith.truncf %174 : vector<16x64xf32> to vector<16x64xbf16>
    %c3_165 = arith.constant 3 : index
    %c0_166 = arith.constant 0 : index
    %c0_167 = arith.constant 0 : index
    %176 = vector.load %arg15[%c3_165, %c0_166, %c0_167] : memref<4x64x64xbf16, #tpu.memory_space<vmem>>, vector<1x64x64xbf16>
    %177 = vector.shape_cast %176 : vector<1x64x64xbf16> to vector<64x64xbf16>
    %cst_168 = arith.constant dense<0.000000e+00> : vector<16x64xf32>
    %178 = tpu.matmul %175, %177, %cst_168 {dimension_numbers = #tpu.dot_dimension_numbers<[1], [0], [0], [1], [0, 0, 1, 1], [], []>} : vector<16x64xbf16>, vector<64x64xbf16>, vector<16x64xf32> -> vector<16x64xf32>
    %179 = arith.addf %171, %178 : vector<16x64xf32>
    %c0_169 = arith.constant 0 : index
    %c0_170 = arith.constant 0 : index
    %180 = vector.load %arg16[%c0_169, %c0_170] : memref<1x64xf32, #tpu.memory_space<vmem>>, vector<1x64xf32>
    %181 = vector.broadcast %180 : vector<1x64xf32> to vector<16x64xf32>
    %182 = arith.addf %179, %181 : vector<16x64xf32>
    %183 = arith.truncf %182 : vector<16x64xf32> to vector<16x64xbf16>
    %c0_171 = arith.constant 0 : index
    %c0_172 = arith.constant 0 : index
    %184 = vector.load %arg17[%c0_171, %c0_172] : memref<64x128xbf16, #tpu.memory_space<vmem>>, vector<64x128xbf16>
    %cst_173 = arith.constant dense<0.000000e+00> : vector<16x128xf32>
    %185 = tpu.matmul %183, %184, %cst_173 {dimension_numbers = #tpu.dot_dimension_numbers<[1], [0], [0], [1], [0, 0, 1, 1], [], []>} : vector<16x64xbf16>, vector<64x128xbf16>, vector<16x128xf32> -> vector<16x128xf32>
    %c0_174 = arith.constant 0 : index
    %c0_175 = arith.constant 0 : index
    %186 = vector.load %arg18[%c0_174, %c0_175] : memref<1x128xf32, #tpu.memory_space<vmem>>, vector<1x128xf32>
    %187 = vector.broadcast %186 : vector<1x128xf32> to vector<16x128xf32>
    %188 = arith.addf %185, %187 : vector<16x128xf32>
    %c0_176 = arith.constant 0 : index
    %c0_177 = arith.constant 0 : index
    %189 = vector.load %arg29[%c0_176, %c0_177] : memref<16x128xf32, #tpu.memory_space<vmem>>, vector<16x128xf32>
    tpu.vector_store %arg29[%c0_176, %c0_177], %188 {strides = array<i32>} : memref<16x128xf32, #tpu.memory_space<vmem>>, vector<16x128xf32>,
    %190 = vector.extract_strided_slice %188 {offsets = [0, 0], sizes = [16, 64], strides = [1, 1]} : vector<16x128xf32> to vector<16x64xf32>
    %191 = vector.extract_strided_slice %188 {offsets = [0, 64], sizes = [16, 64], strides = [1, 1]} : vector<16x128xf32> to vector<16x64xf32>
    %cst_178 = arith.constant 5.000000e-01 : f32
    %192 = vector.broadcast %cst_178 : f32 to vector<16x64xf32>
    %193 = arith.mulf %192, %191 : vector<16x64xf32>
    %194 = math.exp %193 : vector<16x64xf32>
    %c0_179 = arith.constant 0 : index
    %c0_180 = arith.constant 0 : index
    %195 = vector.load %arg1[%c0_179, %c0_180] : memref<16x64xf32, #tpu.memory_space<vmem>>, vector<16x64xf32>
    %196 = arith.mulf %194, %195 : vector<16x64xf32>
    %197 = arith.addf %190, %196 : vector<16x64xf32>
    %198 = arith.truncf %197 : vector<16x64xf32> to vector<16x64xbf16>
    %c0_181 = arith.constant 0 : index
    %c0_182 = arith.constant 0 : index
    %199 = vector.load %arg19[%c0_181, %c0_182] : memref<64x256xbf16, #tpu.memory_space<vmem>>, vector<64x256xbf16>
    %cst_183 = arith.constant dense<0.000000e+00> : vector<16x256xf32>
    %200 = tpu.matmul %198, %199, %cst_183 {dimension_numbers = #tpu.dot_dimension_numbers<[1], [0], [0], [1], [0, 0, 1, 1], [], []>} : vector<16x64xbf16>, vector<64x256xbf16>, vector<16x256xf32> -> vector<16x256xf32>
    %c0_184 = arith.constant 0 : index
    %c0_185 = arith.constant 0 : index
    %201 = vector.load %arg20[%c0_184, %c0_185] : memref<1x256xf32, #tpu.memory_space<vmem>>, vector<1x256xf32>
    %202 = vector.broadcast %201 : vector<1x256xf32> to vector<16x256xf32>
    %203 = arith.addf %200, %202 : vector<16x256xf32>
    %cst_186 = arith.constant 0.000000e+00 : f32
    %204 = vector.broadcast %cst_186 : f32 to vector<16x256xf32>
    %205 = arith.maximumf %203, %204 : vector<16x256xf32>
    %206 = arith.truncf %205 : vector<16x256xf32> to vector<16x256xbf16>
    %c0_187 = arith.constant 0 : index
    %c0_188 = arith.constant 0 : index
    %207 = vector.load %arg21[%c0_187, %c0_188] : memref<256x128xbf16, #tpu.memory_space<vmem>>, vector<256x128xbf16>
    %cst_189 = arith.constant dense<0.000000e+00> : vector<16x128xf32>
    %208 = tpu.matmul %206, %207, %cst_189 {dimension_numbers = #tpu.dot_dimension_numbers<[1], [0], [0], [1], [0, 0, 1, 1], [], []>} : vector<16x256xbf16>, vector<256x128xbf16>, vector<16x128xf32> -> vector<16x128xf32>
    %c0_190 = arith.constant 0 : index
    %c0_191 = arith.constant 0 : index
    %209 = vector.load %arg22[%c0_190, %c0_191] : memref<1x128xf32, #tpu.memory_space<vmem>>, vector<1x128xf32>
    %210 = vector.broadcast %209 : vector<1x128xf32> to vector<16x128xf32>
    %211 = arith.addf %208, %210 : vector<16x128xf32>
    %cst_192 = arith.constant 0.000000e+00 : f32
    %212 = vector.broadcast %cst_192 : f32 to vector<16x128xf32>
    %213 = arith.maximumf %211, %212 : vector<16x128xf32>
    %214 = arith.truncf %213 : vector<16x128xf32> to vector<16x128xbf16>
    %c0_193 = arith.constant 0 : index
    %c0_194 = arith.constant 0 : index
    %215 = vector.load %arg23[%c0_193, %c0_194] : memref<128x128xbf16, #tpu.memory_space<vmem>>, vector<128x128xbf16>
    %cst_195 = arith.constant dense<0.000000e+00> : vector<16x128xf32>
    %216 = tpu.matmul %214, %215, %cst_195 {dimension_numbers = #tpu.dot_dimension_numbers<[1], [0], [0], [1], [0, 0, 1, 1], [], []>} : vector<16x128xbf16>, vector<128x128xbf16>, vector<16x128xf32> -> vector<16x128xf32>
    %c0_196 = arith.constant 0 : index
    %c0_197 = arith.constant 0 : index
    %217 = vector.load %arg24[%c0_196, %c0_197] : memref<1x128xf32, #tpu.memory_space<vmem>>, vector<1x128xf32>
    %218 = vector.broadcast %217 : vector<1x128xf32> to vector<16x128xf32>
    %219 = arith.addf %216, %218 : vector<16x128xf32>
    %cst_198 = arith.constant 0.000000e+00 : f32
    %220 = vector.broadcast %cst_198 : f32 to vector<16x128xf32>
    %221 = arith.maximumf %219, %220 : vector<16x128xf32>
    %222 = arith.truncf %221 : vector<16x128xf32> to vector<16x128xbf16>
    %c0_199 = arith.constant 0 : index
    %c0_200 = arith.constant 0 : index
    %223 = vector.load %arg25[%c0_199, %c0_200] : memref<128x64xbf16, #tpu.memory_space<vmem>>, vector<128x64xbf16>
    %cst_201 = arith.constant dense<0.000000e+00> : vector<16x64xf32>
    %224 = tpu.matmul %222, %223, %cst_201 {dimension_numbers = #tpu.dot_dimension_numbers<[1], [0], [0], [1], [0, 0, 1, 1], [], []>} : vector<16x128xbf16>, vector<128x64xbf16>, vector<16x64xf32> -> vector<16x64xf32>
    %c0_202 = arith.constant 0 : index
    %c0_203 = arith.constant 0 : index
    %225 = vector.load %arg26[%c0_202, %c0_203] : memref<1x64xf32, #tpu.memory_space<vmem>>, vector<1x64xf32>
    %226 = vector.broadcast %225 : vector<1x64xf32> to vector<16x64xf32>
    %227 = arith.addf %224, %226 : vector<16x64xf32>
    %cst_204 = arith.constant 0.000000e+00 : f32
    %228 = vector.broadcast %cst_204 : f32 to vector<16x64xf32>
    %229 = arith.maximumf %227, %228 : vector<16x64xf32>
    %230 = arith.truncf %229 : vector<16x64xf32> to vector<16x64xbf16>
    %c0_205 = arith.constant 0 : index
    %c0_206 = arith.constant 0 : index
    %231 = vector.load %arg27[%c0_205, %c0_206] : memref<64x128xbf16, #tpu.memory_space<vmem>>, vector<64x128xbf16>
    %cst_207 = arith.constant dense<0.000000e+00> : vector<16x128xf32>
    %232 = tpu.matmul %230, %231, %cst_207 {dimension_numbers = #tpu.dot_dimension_numbers<[1], [0], [0], [1], [0, 0, 1, 1], [], []>} : vector<16x64xbf16>, vector<64x128xbf16>, vector<16x128xf32> -> vector<16x128xf32>
    %c0_208 = arith.constant 0 : index
    %c0_209 = arith.constant 0 : index
    %233 = vector.load %arg28[%c0_208, %c0_209] : memref<1x128xf32, #tpu.memory_space<vmem>>, vector<1x128xf32>
    %234 = vector.broadcast %233 : vector<1x128xf32> to vector<16x128xf32>
    %235 = arith.addf %232, %234 : vector<16x128xf32>
    %c0_210 = arith.constant 0 : index
    %c0_211 = arith.constant 0 : index
    %236 = vector.load %arg30[%c0_210, %c0_211] : memref<16x128xf32, #tpu.memory_space<vmem>>, vector<16x128xf32>
    tpu.vector_store %arg30[%c0_210, %c0_211], %235 {strides = array<i32>} : memref<16x128xf32, #tpu.memory_space<vmem>>, vector<16x128xf32>,
    return
  }
}

</mosaic_0001>

<bundles_post_ra>
// kernel: beta_vae_forward.1
= control target key start
LH: loop header
LB: loop body
LE: loop exit
PB: predicated region body
PF: predicated region fallthrough
CT: control target
= control target key end

     0   :  { %s9020_s6 = smov 1   ;;  %s9021_s10 = smov 2   ;;  %s10355_s0 = inlined_call_operand.smem [shape: u32[31], index: -1, kind: input, shape index: {}] }
   0x1   :  { %s9065_s5 = sld [smem:[%s10355_s0]]   ;;  %s9022_s14 = smov 3  }
   0x2   :  { %s9070_s9 = sld [smem:[%s10355_s0 + %s9020_s6]]   ;;  %s9023_s18 = smov 4  }
   0x3   :  { %s9075_s13 = sld [smem:[%s10355_s0 + %s9021_s10]]   ;;  %s9024_s22 = smov 5  }
   0x4   :  { %s9080_s17 = sld [smem:[%s10355_s0 + %s9022_s14]]   ;;  %s9025_s26 = smov 6  }
   0x5   :  { %s9085_s21 = sld [smem:[%s10355_s0 + %s9023_s18]]   ;;  %s9026_s30 = smov 7  }
   0x6   :  { %s9090_s25 = sld [smem:[%s10355_s0 + %s9024_s22]]   ;;  %s9027_s4 = smov 8  }
   0x7   :  { %s9095_s29 = sld [smem:[%s10355_s0 + %s9025_s26]]   ;;  %s9028_s10 = smov 9  }
   0x8   :  { %10363 = sst [smem:[#allocation5_spill]] %s9070_s9  ;;  %s9029_s15 = smov 10  }
   0x9   :  { %s9100_s3 = sld [smem:[%s10355_s0 + %s9026_s30]]   ;;  %s9030_s20 = smov 11  }
   0xa   :  { %s9105_s8 = sld [smem:[%s10355_s0 + %s9027_s4]]   ;;  %s9031_s26 = smov 12  }
   0xb   :  { %s9110_s14 = sld [smem:[%s10355_s0 + %s9028_s10]]   ;;  %s9032_s1 = smov 13  }
   0xc   :  { %s9115_s19 = sld [smem:[%s10355_s0 + %s9029_s15]]   ;;  %s9033_s7 = smov 14  }
   0xd   :  { %s9120_s24 = sld [smem:[%s10355_s0 + %s9030_s20]]   ;;  %s9034_s15 = smov 15  }
   0xe   :  { %s9125_s30 = sld [smem:[%s10355_s0 + %s9031_s26]]   ;;  %s9035_s22 = smov 16  }
   0xf   :  { %s9130_s6 = sld [smem:[%s10355_s0 + %s9032_s1]]   ;;  %s9036_s28 = smov 17  }
  0x10   :  { %s9135_s12 = sld [smem:[%s10355_s0 + %s9033_s7]]   ;;  %s9037_s7 = smov 18  }
  0x11   :  { %s9140_s20 = sld [smem:[%s10355_s0 + %s9034_s15]]   ;;  %s9038_s15 = smov 19  }
  0x12   :  { %s9145_s27 = sld [smem:[%s10355_s0 + %s9035_s22]]   ;;  %s9039_s22 = smov 20  }
  0x13   :  { %s9150_s4 = sld [smem:[%s10355_s0 + %s9036_s28]]   ;;  %s9040_s28 = smov 21  }
  0x14   :  { %s9155_s9 = sld [smem:[%s10355_s0 + %s9037_s7]]   ;;  %s9041_s7 = smov 22  }
  0x17   :  { %10364 = sst [smem:[#allocation6_spill]] %s9140_s20 }
  0x18   :  { %10365 = sst [smem:[#allocation7_spill]] %s9145_s27 }
  0x19   :  { %10366 = sst [smem:[#allocation8_spill]] %s9150_s4 }
  0x1a   :  { %10367 = sst [smem:[#allocation9_spill]] %s9155_s9 }
  0x1b   :  { %s9160_s20 = sld [smem:[%s10355_s0 + %s9038_s15]]   ;;  %s9042_s15 = smov 23  }
  0x1c   :  { %s9165_s27 = sld [smem:[%s10355_s0 + %s9039_s22]]   ;;  %s9043_s22 = smov 24  }
  0x1d   :  { %s9170_s4 = sld [smem:[%s10355_s0 + %s9040_s28]]   ;;  %s9044_s28 = smov 25  }
  0x1e   :  { %s9175_s9 = sld [smem:[%s10355_s0 + %s9041_s7]]   ;;  %s9045_s7 = smov 26  }
  0x21   :  { %10368 = sst [smem:[#allocation10_spill]] %s9160_s20 }
  0x22   :  { %10369 = sst [smem:[#allocation11_spill]] %s9165_s27 }
  0x23   :  { %10370 = sst [smem:[#allocation12_spill]] %s9170_s4 }
  0x24   :  { %10371 = sst [smem:[#allocation13_spill]] %s9175_s9 }
  0x25   :  { %s9180_s20 = sld [smem:[%s10355_s0 + %s9042_s15]]   ;;  %s9046_s15 = smov 27  }
  0x26   :  { %s9185_s27 = sld [smem:[%s10355_s0 + %s9043_s22]]   ;;  %s9047_s22 = smov 28  }
  0x27   :  { %s9190_s4 = sld [smem:[%s10355_s0 + %s9044_s28]]   ;;  %s9048_s28 = smov 29  }
  0x28   :  { %s9195_s9 = sld [smem:[%s10355_s0 + %s9045_s7]]   ;;  %s9049_s7 = smov 30  }
  0x2b   :  { %10372 = sst [smem:[#allocation14_spill]] %s9180_s20 }
  0x2c   :  { %10373 = sst [smem:[#allocation15_spill]] %s9185_s27 }
  0x2d   :  { %10374 = sst [smem:[#allocation16_spill]] %s9190_s4 }
  0x2e   :  { %10375 = sst [smem:[#allocation17_spill]] %s9195_s9 }
  0x2f   :  { %s9200_s20 = sld [smem:[%s10355_s0 + %s9046_s15]]  }
  0x30   :  { %s9205_s27 = sld [smem:[%s10355_s0 + %s9047_s22]]  }
  0x31   :  { %s9210_s4 = sld [smem:[%s10355_s0 + %s9048_s28]]  }
  0x32   :  { %s9215_s9 = sld [smem:[%s10355_s0 + %s9049_s7]]  }
  0x33   :  { %67 = vsyncpa [#allocation3], 0  ;;  %s9050_s15 = smov [#allocation2]   ;;  %s8996_s18 = scalar_lea.hbm %s9075_s13, 22528 }
  0x34   :  { %s77_s16 = sshll.u32 %s9050_s15, 4  ;;  %p8997_p0 = scmp.ne.s32.totalorder %s9075_s13, %s8996_s18  ;;  %s78_s16 = int_to_ptr.vmem [resolvable:$true] %s77_s16 }
  0x35   :  { %p9000_p1 = scmp.lt.u32.totalorder %s8996_s18, %s9075_s13 }
  0x37   :  { %p9002_p2 = pnand %p9000_p1, %p8997_p0 }
  0x39   :  { %9005 = shalt.err (!%p9002_p2)
}
  0x3a   :  { %s9006_s22 = scalar_lea.vmem %s78_s16, 22528  ;;  %p9011_p4 = scmp.lt.s32.totalorder %s78_s16, %s78_s16 }
  0x3b   :  { %p9007_p3 = scmp.ne.s32.totalorder %s78_s16, %s9006_s22  ;;  %p9012_p5 = scmp.lt.s32.totalorder %s9006_s22, %s9006_s22 }
  0x3d   :  { %p9013_p6 = por %p9012_p5, %p9011_p4 }
  0x3f   :  { %p9014_p7 = pnand %p9013_p6, %p9007_p3 }
  0x41   :  { %9017 = shalt.err (!%p9014_p7)
}
  0x42   :  { %s9051_s0 = smov 256   ;;  %s9052_s23 = smov 16  }
  0x43   :  { %83 = dma.hbm_to_vmem [thread:$0]  %s9075_s13, 22528, %s78_s16, [#allocation3], %s9051_s0, %s9051_s0, %s9052_s23  }
  0x44   :  { %9018 = dma.done.wait [#allocation3], 22528  }
  0x45   :  { %9019 = vsyncadd [#allocation3], 4294944768  ;;  %v9222_v0 = vld [vmem:[%s9065_s5 + $0x40] sm:$0xff]   ;;  %v9237_v4 = vld [vmem:[%s9065_s5 + $0x48] sm:$0xff]   ;;  %vm9054_vm0 = vmmov 0   ;;  %vm1442_vm1 = vcmask 130048  }
  0x46   :  { %v9225_v1 = vld [vmem:[%s9065_s5 + $0xc0] sm:$0xff]   ;;  %7050 = vmatprep.subr.bf16.mxu0 %v9222_v0  ;;  %v9241_v5 = vld [vmem:[%s9065_s5 + $0xc8] sm:$0xff]   ;;  %v9253_v8 = vld [vmem:[%s9065_s5 + $0x50] sm:$0xff]   ;;  %vm3269_vm2 = vcmask 392192   ;;  %vm4129_vm3 = vcmask 523264   ;;  %vm4280_vm4 = vcmask 261120  }
  0x47   :  { %v9229_v2 = vld [vmem:[%s9065_s5] sm:$0xff]   ;;  %7132 = vmatprep.subr.bf16.mxu1 %v9225_v1  ;;  %v9245_v6 = vld [vmem:[%s9065_s5 + $0x8] sm:$0xff]   ;;  %v9257_v9 = vld [vmem:[%s9065_s5 + $0xd0] sm:$0xff]   ;;  %s10377_s13 = sld [smem:[#allocation8_spill]] }
  0x48   :  { %v9233_v3 = vld [vmem:[%s9065_s5 + $0x80] sm:$0xff]   ;;  %7051 = vmatpush3.bf16.msra.mxu0 %v9229_v2  ;;  %v9249_v7 = vld [vmem:[%s9065_s5 + $0x88] sm:$0xff]   ;;  %v9261_v10 = vld [vmem:[%s9065_s5 + $0x10] sm:$0xff]  }
  0x49   :  { %7133 = vmatpush3.bf16.msra.mxu1 %v9233_v3  ;;  %7052 = vmatprep.subr.bf16.mxu0 %v9237_v4  ;;  %v9265_v11 = vld [vmem:[%s9065_s5 + $0x90] sm:$0xff]   ;;  %v9269_v12 = vld [vmem:[%s9065_s5 + $0x58] sm:$0xff]   ;;  %v9285_v16 = vld [vmem:[%s9065_s5 + $0x60] sm:$0xff]  }
  0x4a   :  { %7134 = vmatprep.subr.bf16.mxu1 %v9241_v5  ;;  %v9273_v13 = vld [vmem:[%s9065_s5 + $0xd8] sm:$0xff]   ;;  %v9289_v17 = vld [vmem:[%s9065_s5 + $0xe0] sm:$0xff]   ;;  %v9301_v20 = vld [vmem:[%s9065_s5 + $0x68] sm:$0xff]  }
  0x4b   :  { %v9277_v14 = vld [vmem:[%s9065_s5 + $0x18] sm:$0xff]   ;;  %v9293_v18 = vld [vmem:[%s9065_s5 + $0x20] sm:$0xff]   ;;  %v9305_v21 = vld [vmem:[%s9065_s5 + $0xe8] sm:$0xff]  }
  0x4c   :  { %7053 = vmatpush3.bf16.msra.mxu0 %v9245_v6  ;;  %v9281_v15 = vld [vmem:[%s9065_s5 + $0x98] sm:$0xff]   ;;  %v9297_v19 = vld [vmem:[%s9065_s5 + $0xa0] sm:$0xff]   ;;  %v9309_v22 = vld [vmem:[%s9065_s5 + $0x28] sm:$0xff]  }
  0x4d   :  { %7135 = vmatpush3.bf16.msra.mxu1 %v9249_v7  ;;  %7054 = vmatprep.subr.bf16.mxu0 %v9253_v8  ;;  %v9313_v23 = vld [vmem:[%s9065_s5 + $0xa8] sm:$0xff]   ;;  %v9317_v24 = vld [vmem:[%s9065_s5 + $0x70] sm:$0xff]   ;;  %v9333_v28 = vld [vmem:[%s9065_s5 + $0x78] sm:$0xff]  }
  0x4e   :  { %7136 = vmatprep.subr.bf16.mxu1 %v9257_v9  ;;  %v9321_v25 = vld [vmem:[%s9065_s5 + $0xf0] sm:$0xff]   ;;  %v9337_v29 = vld [vmem:[%s9065_s5 + $0xf8] sm:$0xff]  }
  0x4f   :  { %v9325_v26 = vld [vmem:[%s9065_s5 + $0x30] sm:$0xff]   ;;  %v9341_v30 = vld [vmem:[%s9065_s5 + $0x38] sm:$0xff]  }
  0x50   :  { %7055 = vmatpush3.bf16.msra.mxu0 %v9261_v10  ;;  %v9329_v27 = vld [vmem:[%s9065_s5 + $0xb0] sm:$0xff]   ;;  %v9345_v31 = vld [vmem:[%s9065_s5 + $0xb8] sm:$0xff]  }
  0x51   :  { %7137 = vmatpush3.bf16.msra.mxu1 %v9265_v11  ;;  %7056 = vmatprep.subr.bf16.mxu0 %v9269_v12  ;;  %v8525_v32 = vld [vmem:[#allocation2] ss:$16 sps:$4 sm:$0xff]   ;;  %v8527_v33 = vld [vmem:[#allocation2 + $0x4] ss:$16 sps:$4 sm:$0xff]   ;;  %v8528_v34 = vld [vmem:[#allocation2 + $0x8] ss:$16 sps:$4 sm:$0xff]  }
  0x52   :  { %7138 = vmatprep.subr.bf16.mxu1 %v9273_v13  ;;  %v8530_v35 = vld [vmem:[#allocation2 + $0xc] ss:$16 sps:$4 sm:$0xff]   ;;  %692 = vmatprep.mubr.bf16.mxu0 %v8527_v33  ;;  %v8531_v36 = vld [vmem:[#allocation2 + $0x24] ss:$16 sps:$4 sm:$0xff]   ;;  %v8535_v38 = vld [vmem:[#allocation2 + $0x20] ss:$16 sps:$4 sm:$0xff]  }
  0x53   :  { %813 = vmatprep.mubr.bf16.mxu1 %v8530_v35  ;;  %v8533_v37 = vld [vmem:[#allocation2 + $0x2c] ss:$16 sps:$4 sm:$0xff]   ;;  %v8536_v39 = vld [vmem:[#allocation2 + $0x28] ss:$16 sps:$4 sm:$0xff]   ;;  %v8537_v40 = vld [vmem:[#allocation2 + $0x44] ss:$16 sps:$4 sm:$0xff]  }
  0x54   :  { %7057 = vmatpush3.bf16.msra.mxu0 %v9277_v14  ;;  %v8539_v41 = vld [vmem:[#allocation2 + $0x4c] ss:$16 sps:$4 sm:$0xff]   ;;  %v8541_v42 = vld [vmem:[#allocation2 + $0x40] ss:$16 sps:$4 sm:$0xff]   ;;  %v8542_v43 = vld [vmem:[#allocation2 + $0x48] ss:$16 sps:$4 sm:$0xff]  }
  0x55   :  { %7139 = vmatpush3.bf16.msra.mxu1 %v9281_v15  ;;  %7058 = vmatprep.subr.bf16.mxu0 %v9285_v16  ;;  %v8543_v44 = vld [vmem:[#allocation2 + $0x64] ss:$16 sps:$4 sm:$0xff]   ;;  %v8545_v45 = vld [vmem:[#allocation2 + $0x6c] ss:$16 sps:$4 sm:$0xff]   ;;  %v8547_v46 = vld [vmem:[#allocation2 + $0x60] ss:$16 sps:$4 sm:$0xff]  }
  0x56   :  { %7140 = vmatprep.subr.bf16.mxu1 %v9289_v17  ;;  %v8548_v47 = vld [vmem:[#allocation2 + $0x68] ss:$16 sps:$4 sm:$0xff]   ;;  %v8549_v48 = vld [vmem:[#allocation2 + $0x84] ss:$16 sps:$4 sm:$0xff]   ;;  %v8551_v49 = vld [vmem:[#allocation2 + $0x8c] ss:$16 sps:$4 sm:$0xff]  }
  0x57   :  { %v8553_v50 = vld [vmem:[#allocation2 + $0x80] ss:$16 sps:$4 sm:$0xff]   ;;  %v8554_v51 = vld [vmem:[#allocation2 + $0x88] ss:$16 sps:$4 sm:$0xff]   ;;  %v8555_v52 = vld [vmem:[#allocation2 + $0xa4] ss:$16 sps:$4 sm:$0xff]  }
  0x58   :  { %7059 = vmatpush3.bf16.msra.mxu0 %v9293_v18  ;;  %v8557_v53 = vld [vmem:[#allocation2 + $0xac] ss:$16 sps:$4 sm:$0xff]   ;;  %v8559_v54 = vld [vmem:[#allocation2 + $0xa0] ss:$16 sps:$4 sm:$0xff]   ;;  %v8560_v55 = vld [vmem:[#allocation2 + $0xa8] ss:$16 sps:$4 sm:$0xff]  }
  0x59   :  { %7141 = vmatpush3.bf16.msra.mxu1 %v9297_v19  ;;  %7060 = vmatprep.subr.bf16.mxu0 %v9301_v20  ;;  %v8561_v56 = vld [vmem:[#allocation2 + $0xc4] ss:$16 sps:$4 sm:$0xff]   ;;  %v8563_v57 = vld [vmem:[#allocation2 + $0xcc] ss:$16 sps:$4 sm:$0xff]   ;;  %v8565_v58 = vld [vmem:[#allocation2 + $0xc0] ss:$16 sps:$4 sm:$0xff]  }
  0x5a   :  { %7142 = vmatprep.subr.bf16.mxu1 %v9305_v21  ;;  %v8566_v59 = vld [vmem:[#allocation2 + $0xc8] ss:$16 sps:$4 sm:$0xff]   ;;  %v8567_v60 = vld [vmem:[#allocation2 + $0xe4] ss:$16 sps:$4 sm:$0xff]   ;;  %v8569_v61 = vld [vmem:[#allocation2 + $0xec] ss:$16 sps:$4 sm:$0xff]  }
  0x5b   :  { %v8571_v62 = vld [vmem:[#allocation2 + $0xe0] ss:$16 sps:$4 sm:$0xff]   ;;  %v8572_v63 = vld [vmem:[#allocation2 + $0xe8] ss:$16 sps:$4 sm:$0xff]   ;;  %v8615_v33 = vld [vmem:[#allocation2 + $0x1e4] ss:$16 sps:$4 sm:$0xff]  }
  0x5c   :  { %7061 = vmatpush3.bf16.msra.mxu0 %v9309_v22  ;;  %v8620_v35 = vld [vmem:[#allocation2 + $0x1e8] ss:$16 sps:$4 sm:$0xff]  }
  0x5d   :  { %7143 = vmatpush3.bf16.msra.mxu1 %v9313_v23  ;;  %7062 = vmatprep.subr.bf16.mxu0 %v9317_v24 }
  0x5e   :  { %7144 = vmatprep.subr.bf16.mxu1 %v9321_v25 }
  0x60   :  { %7063 = vmatpush3.bf16.msra.mxu0 %v9325_v26 }
  0x61   :  { %7145 = vmatpush3.bf16.msra.mxu1 %v9329_v27  ;;  %7064 = vmatprep.subr.bf16.mxu0 %v9333_v28 }
  0x62   :  { %7146 = vmatprep.subr.bf16.mxu1 %v9337_v29 }
  0x64   :  { %7065 = vmatpush3.bf16.msra.mxu0 %v9341_v30 }
  0x65   :  { %7147 = vmatpush3.bf16.msra.mxu1 %v9345_v31  ;;  %7214 = vmatprep.subr.bf16.mxu0 %v9222_v0 }
  0x66   :  { %7296 = vmatprep.subr.bf16.mxu1 %v9225_v1 }
  0x67   :  { %693 = vmatmul.mubr.bf16.vlgmr.msra.gmra.mrb[0].mxu0 %v8525_v32  ;;  %v8614_v32 = vld [vmem:[#allocation2 + $0x1c8] ss:$16 sps:$4 sm:$0xff]  }
  0x68   :  { %814 = vmatmul.mubr.bf16.vlgmr.msra.gmra.mrb[0].mxu1 %v8528_v34  ;;  %7215 = vmatpush3.bf16.msra.mxu0 %v9229_v2  ;;  %v8573_v2 = vld [vmem:[#allocation2 + $0x104] ss:$16 sps:$4 sm:$0xff]   ;;  %v8619_v34 = vld [vmem:[#allocation2 + $0x1e0] ss:$16 sps:$4 sm:$0xff]  }
  0x69   :  { %7297 = vmatpush3.bf16.msra.mxu1 %v9233_v3  ;;  %700 = vmatprep.mubr.bf16.mxu0 %v8531_v36  ;;  %v8575_v3 = vld [vmem:[#allocation2 + $0x10c] ss:$16 sps:$4 sm:$0xff]   ;;  %v8621_v36 = vld [vmem:[#allocation2 + $0x204] ss:$16 sps:$4 sm:$0xff]  }
  0x6a   :  { %821 = vmatprep.mubr.bf16.mxu1 %v8533_v37  ;;  %7216 = vmatprep.subr.bf16.mxu0 %v9237_v4  ;;  %v8577_v4 = vld [vmem:[#allocation2 + $0x100] ss:$16 sps:$4 sm:$0xff]   ;;  %v8623_v37 = vld [vmem:[#allocation2 + $0x20c] ss:$16 sps:$4 sm:$0xff]  }
  0x6b   :  { %7298 = vmatprep.subr.bf16.mxu1 %v9241_v5  ;;  %v8578_v5 = vld [vmem:[#allocation2 + $0x108] ss:$16 sps:$4 sm:$0xff]  }
  0x6c   :  { %7217 = vmatpush3.bf16.msra.mxu0 %v9245_v6  ;;  %v8579_v6 = vld [vmem:[#allocation2 + $0x124] ss:$16 sps:$4 sm:$0xff]  }
  0x6d   :  { %7299 = vmatpush3.bf16.msra.mxu1 %v9249_v7  ;;  %7218 = vmatprep.subr.bf16.mxu0 %v9253_v8  ;;  %v8581_v7 = vld [vmem:[#allocation2 + $0x12c] ss:$16 sps:$4 sm:$0xff]   ;;  %v8583_v8 = vld [vmem:[#allocation2 + $0x120] ss:$16 sps:$4 sm:$0xff]  }
  0x6e   :  { %7300 = vmatprep.subr.bf16.mxu1 %v9257_v9  ;;  %v8584_v9 = vld [vmem:[#allocation2 + $0x128] ss:$16 sps:$4 sm:$0xff]  }
  0x6f   :  { %701 = vmatmul.mubr.bf16.gmra.mrb[4].mxu0 %v8535_v38  ;;  %v8626_v38 = vld [vmem:[#allocation2 + $0x208] ss:$16 sps:$4 sm:$0xff]  }
  0x70   :  { %822 = vmatmul.mubr.bf16.gmra.mrb[4].mxu1 %v8536_v39  ;;  %708 = vmatprep.mubr.bf16.mxu0 %v8537_v40  ;;  %v8627_v39 = vld [vmem:[#allocation2 + $0x224] ss:$16 sps:$4 sm:$0xff]   ;;  %v8629_v40 = vld [vmem:[#allocation2 + $0x22c] ss:$16 sps:$4 sm:$0xff]  }
  0x71   :  { %829 = vmatprep.mubr.bf16.mxu1 %v8539_v41  ;;  %7219 = vmatpush3.bf16.msra.mxu0 %v9261_v10  ;;  %v8585_v10 = vld [vmem:[#allocation2 + $0x144] ss:$16 sps:$4 sm:$0xff]   ;;  %v8631_v41 = vld [vmem:[#allocation2 + $0x220] ss:$16 sps:$4 sm:$0xff]  }
  0x72   :  { %7301 = vmatpush3.bf16.msra.mxu1 %v9265_v11  ;;  %7220 = vmatprep.subr.bf16.mxu0 %v9269_v12  ;;  %v8587_v11 = vld [vmem:[#allocation2 + $0x14c] ss:$16 sps:$4 sm:$0xff]   ;;  %v8589_v12 = vld [vmem:[#allocation2 + $0x140] ss:$16 sps:$4 sm:$0xff]  }
  0x73   :  { %7302 = vmatprep.subr.bf16.mxu1 %v9273_v13  ;;  %v8590_v13 = vld [vmem:[#allocation2 + $0x148] ss:$16 sps:$4 sm:$0xff]  }
  0x75   :  { %7221 = vmatpush3.bf16.msra.mxu0 %v9277_v14  ;;  %v8593_v14 = vld [vmem:[#allocation2 + $0x164] ss:$16 sps:$4 sm:$0xff]  }
  0x76   :  { %7303 = vmatpush3.bf16.msra.mxu1 %v9281_v15  ;;  %7222 = vmatprep.subr.bf16.mxu0 %v9285_v16  ;;  %v8596_v15 = vld [vmem:[#allocation2 + $0x16c] ss:$16 sps:$4 sm:$0xff]   ;;  %v8591_v16 = vld [vmem:[#allocation2 + $0x160] ss:$16 sps:$4 sm:$0xff]  }
  0x77   :  { %709 = vmatmul.mubr.bf16.gmra.mrb[8].mxu0 %v8541_v42  ;;  %7304 = vmatprep.subr.bf16.mxu1 %v9289_v17  ;;  %v8594_v17 = vld [vmem:[#allocation2 + $0x168] ss:$16 sps:$4 sm:$0xff]  }
  0x78   :  { %830 = vmatmul.mubr.bf16.gmra.mrb[8].mxu1 %v8542_v43  ;;  %716 = vmatprep.mubr.bf16.mxu0 %v8543_v44  ;;  %v8632_v42 = vld [vmem:[#allocation2 + $0x228] ss:$16 sps:$4 sm:$0xff]   ;;  %v8633_v43 = vld [vmem:[#allocation2 + $0x244] ss:$16 sps:$4 sm:$0xff]   ;;  %v8635_v44 = vld [vmem:[#allocation2 + $0x24c] ss:$16 sps:$4 sm:$0xff]  }
  0x79   :  { %837 = vmatprep.mubr.bf16.mxu1 %v8545_v45  ;;  %7223 = vmatpush3.bf16.msra.mxu0 %v9293_v18  ;;  %v8597_v18 = vld [vmem:[#allocation2 + $0x184] ss:$16 sps:$4 sm:$0xff]   ;;  %v8637_v45 = vld [vmem:[#allocation2 + $0x240] ss:$16 sps:$4 sm:$0xff]  }
  0x7a   :  { %7305 = vmatpush3.bf16.msra.mxu1 %v9297_v19  ;;  %7224 = vmatprep.subr.bf16.mxu0 %v9301_v20  ;;  %v8599_v19 = vld [vmem:[#allocation2 + $0x18c] ss:$16 sps:$4 sm:$0xff]   ;;  %v8657_v20 = vld [vmem:[%s9080_s17] sm:$0xff]  }
  0x7b   :  { %7306 = vmatprep.subr.bf16.mxu1 %v9305_v21  ;;  %v8601_v21 = vld [vmem:[#allocation2 + $0x180] ss:$16 sps:$4 sm:$0xff]  }
  0x7d   :  { %7225 = vmatpush3.bf16.msra.mxu0 %v9309_v22  ;;  %v9053_v22 = vmov 0.0  }
  0x7e   :  { %7307 = vmatpush3.bf16.msra.mxu1 %v9313_v23  ;;  %7226 = vmatprep.subr.bf16.mxu0 %v9317_v24  ;;  %v8602_v23 = vld [vmem:[#allocation2 + $0x188] ss:$16 sps:$4 sm:$0xff]   ;;  %v8603_v24 = vld [vmem:[#allocation2 + $0x1a4] ss:$16 sps:$4 sm:$0xff]  }
  0x7f   :  { %717 = vmatmul.mubr.bf16.gmra.mrb[12].mxu0 %v8547_v46  ;;  %7308 = vmatprep.subr.bf16.mxu1 %v9321_v25  ;;  %v8605_v25 = vld [vmem:[#allocation2 + $0x1ac] ss:$16 sps:$4 sm:$0xff]   ;;  %v8638_v46 = vld [vmem:[#allocation2 + $0x248] ss:$16 sps:$4 sm:$0xff]  }
  0x80   :  { %838 = vmatmul.mubr.bf16.gmra.mrb[12].mxu1 %v8548_v47  ;;  %724 = vmatprep.mubr.bf16.mxu0 %v8549_v48  ;;  %v8639_v47 = vld [vmem:[#allocation2 + $0x264] ss:$16 sps:$4 sm:$0xff]   ;;  %v8641_v48 = vld [vmem:[#allocation2 + $0x26c] ss:$16 sps:$4 sm:$0xff]  }
  0x81   :  { %845 = vmatprep.mubr.bf16.mxu1 %v8551_v49  ;;  %7227 = vmatpush3.bf16.msra.mxu0 %v9325_v26  ;;  %v8607_v26 = vld [vmem:[#allocation2 + $0x1a0] ss:$16 sps:$4 sm:$0xff]  }
  0x82   :  { %7309 = vmatpush3.bf16.msra.mxu1 %v9329_v27  ;;  %7228 = vmatprep.subr.bf16.mxu0 %v9333_v28  ;;  %v8658_v27 = vld [vmem:[%s9080_s17 + $0x8] sm:$0xff]   ;;  %v8643_v49 = vld [vmem:[#allocation2 + $0x260] ss:$16 sps:$4 sm:$0xff]  }
  0x83   :  { %7310 = vmatprep.subr.bf16.mxu1 %v9337_v29  ;;  %v8608_v28 = vld [vmem:[#allocation2 + $0x1a8] ss:$16 sps:$4 sm:$0xff]   ;;  %v8609_v29 = vld [vmem:[#allocation2 + $0x1c4] ss:$16 sps:$4 sm:$0xff]  }
  0x85   :  { %7229 = vmatpush3.bf16.msra.mxu0 %v9341_v30  ;;  %v8611_v30 = vld [vmem:[#allocation2 + $0x1cc] ss:$16 sps:$4 sm:$0xff]  }
  0x86   :  { %7311 = vmatpush3.bf16.msra.mxu1 %v9345_v31  ;;  %7916 = vmatprep.subr.bf16.mxu0 %v9053_v22  ;;  %v8613_v31 = vld [vmem:[#allocation2 + $0x1c0] ss:$16 sps:$4 sm:$0xff]  }
  0x87   :  { %725 = vmatmul.mubr.bf16.gmra.mrb[16].mxu0 %v8553_v50  ;;  %7962 = vmatprep.subr.bf16.mxu1 %v9053_v22  ;;  %v8644_v50 = vld [vmem:[#allocation2 + $0x268] ss:$16 sps:$4 sm:$0xff]  }
  0x88   :  { %846 = vmatmul.mubr.bf16.gmra.mrb[16].mxu1 %v8554_v51  ;;  %732 = vmatprep.mubr.bf16.mxu0 %v8555_v52  ;;  %v8645_v51 = vld [vmem:[#allocation2 + $0x284] ss:$16 sps:$4 sm:$0xff]   ;;  %v8647_v52 = vld [vmem:[#allocation2 + $0x28c] ss:$16 sps:$4 sm:$0xff]  }
  0x89   :  { %853 = vmatprep.mubr.bf16.mxu1 %v8557_v53  ;;  %v8649_v53 = vld [vmem:[#allocation2 + $0x280] ss:$16 sps:$4 sm:$0xff]  }
  0x8f   :  { %733 = vmatmul.mubr.bf16.gmra.mrb[20].mxu0 %v8559_v54  ;;  %v8650_v54 = vld [vmem:[#allocation2 + $0x288] ss:$16 sps:$4 sm:$0xff]  }
  0x90   :  { %854 = vmatmul.mubr.bf16.gmra.mrb[20].mxu1 %v8560_v55  ;;  %740 = vmatprep.mubr.bf16.mxu0 %v8561_v56  ;;  %v8651_v55 = vld [vmem:[#allocation2 + $0x2a4] ss:$16 sps:$4 sm:$0xff]   ;;  %v8653_v56 = vld [vmem:[#allocation2 + $0x2ac] ss:$16 sps:$4 sm:$0xff]  }
  0x91   :  { %861 = vmatprep.mubr.bf16.mxu1 %v8563_v57  ;;  %v8655_v57 = vld [vmem:[#allocation2 + $0x2a0] ss:$16 sps:$4 sm:$0xff]  }
  0x97   :  { %741 = vmatmul.mubr.bf16.gmra.mrb[24].mxu0 %v8565_v58  ;;  %v8656_v58 = vld [vmem:[#allocation2 + $0x2a8] ss:$16 sps:$4 sm:$0xff]  }
  0x98   :  { %862 = vmatmul.mubr.bf16.gmra.mrb[24].mxu1 %v8566_v59  ;;  %748 = vmatprep.mubr.bf16.mxu0 %v8567_v60 }
  0x99   :  { %869 = vmatprep.mubr.bf16.mxu1 %v8569_v61 }
  0x9f   :  { %749 = vmatmul.mubr.bf16.gmra.mrb[28].mxu0 %v8571_v62 }
  0xa0   :  { %870 = vmatmul.mubr.bf16.gmra.mrb[28].mxu1 %v8572_v63  ;;  %756 = vmatprep.mubr.bf16.mxu0 %v8573_v2 }
  0xa1   :  { %877 = vmatprep.mubr.bf16.mxu1 %v8575_v3 }
  0xa7   :  { %757 = vmatmul.mubr.bf16.gmra.mrb[32].mxu0 %v8577_v4 }
  0xa8   :  { %878 = vmatmul.mubr.bf16.gmra.mrb[32].mxu1 %v8578_v5  ;;  %764 = vmatprep.mubr.bf16.mxu0 %v8579_v6 }
  0xa9   :  { %885 = vmatprep.mubr.bf16.mxu1 %v8581_v7 }
  0xaf   :  { %765 = vmatmul.mubr.bf16.gmra.mrb[36].mxu0 %v8583_v8 }
  0xb0   :  { %886 = vmatmul.mubr.bf16.gmra.mrb[36].mxu1 %v8584_v9  ;;  %772 = vmatprep.mubr.bf16.mxu0 %v8585_v10 }
  0xb1   :  { %893 = vmatprep.mubr.bf16.mxu1 %v8587_v11 }
  0xb7   :  { %773 = vmatmul.mubr.bf16.gmra.mrb[40].mxu0 %v8589_v12 }
  0xb8   :  { %894 = vmatmul.mubr.bf16.gmra.mrb[40].mxu1 %v8590_v13  ;;  %1212 = vmatprep.mubr.bf16.mxu0 %v8593_v14 }
  0xb9   :  { %1333 = vmatprep.mubr.bf16.mxu1 %v8596_v15 }
  0xbf   :  { %1213 = vmatmul.mubr.bf16.vlgmr.msra.gmra.mrb[44].mxu0 %v8591_v16 }
  0xc0   :  { %1334 = vmatmul.mubr.bf16.vlgmr.msra.gmra.mrb[44].mxu1 %v8594_v17  ;;  %1220 = vmatprep.mubr.bf16.mxu0 %v8597_v18 }
  0xc1   :  { %1341 = vmatprep.mubr.bf16.mxu1 %v8599_v19  ;;  %7963 = vmatpush3.bf16.msra.mxu1 %v8657_v20 }
  0xc2   :  { %7484 = vmatprep.subr.bf16.mxu1 %v9225_v1  ;;  %7917 = vmatpush3.bf16.msra.mxu0 %v8658_v27  ;;  %v8617_v1 = vld [vmem:[#allocation2 + $0x1ec] ss:$16 sps:$4 sm:$0xff]  }
  0xc3   :  { %7402 = vmatprep.subr.bf16.mxu0 %v9222_v0  ;;  %v8625_v0 = vld [vmem:[#allocation2 + $0x200] ss:$16 sps:$4 sm:$0xff]   ;;  %v8950_v27 = vld [vmem:[%s9065_s5 + $0xc8] sm:$0xff]  }
  0xc7   :  { %1221 = vmatmul.mubr.bf16.gmra.mrb[48].mxu0 %v8601_v21 }
  0xc8   :  { %1342 = vmatmul.mubr.bf16.gmra.mrb[48].mxu1 %v8602_v23  ;;  %1228 = vmatprep.mubr.bf16.mxu0 %v8603_v24  ;;  %v8949_v24 = vld [vmem:[%s9065_s5 + $0x80] sm:$0xff]  }
  0xc9   :  { %1349 = vmatprep.mubr.bf16.mxu1 %v8605_v25 }
  0xcf   :  { %1229 = vmatmul.mubr.bf16.gmra.mrb[52].mxu0 %v8607_v26 }
  0xd0   :  { %1350 = vmatmul.mubr.bf16.gmra.mrb[52].mxu1 %v8608_v28  ;;  %1236 = vmatprep.mubr.bf16.mxu0 %v8609_v29 }
  0xd1   :  { %1357 = vmatprep.mubr.bf16.mxu1 %v8611_v30  ;;  %v8951_v30 = vld [vmem:[%s9065_s5 + $0x88] sm:$0xff]  }
  0xd7   :  { %1237 = vmatmul.mubr.bf16.gmra.mrb[56].mxu0 %v8613_v31 }
  0xd8   :  { %1358 = vmatmul.mubr.bf16.gmra.mrb[56].mxu1 %v8614_v32  ;;  %1244 = vmatprep.mubr.bf16.mxu0 %v8615_v33 }
  0xd9   :  { %1365 = vmatprep.mubr.bf16.mxu1 %v8617_v1  ;;  %v8952_v1 = vld [vmem:[%s9065_s5 + $0xd0] sm:$0xff]  }
  0xdf   :  { %1245 = vmatmul.mubr.bf16.gmra.mrb[60].mxu0 %v8619_v34 }
  0xe0   :  { %1366 = vmatmul.mubr.bf16.gmra.mrb[60].mxu1 %v8620_v35  ;;  %1252 = vmatprep.mubr.bf16.mxu0 %v8621_v36 }
  0xe1   :  { %1373 = vmatprep.mubr.bf16.mxu1 %v8623_v37 }
  0xe7   :  { %1253 = vmatmul.mubr.bf16.gmra.mrb[64].mxu0 %v8625_v0 }
  0xe8   :  { %1374 = vmatmul.mubr.bf16.gmra.mrb[64].mxu1 %v8626_v38  ;;  %1260 = vmatprep.mubr.bf16.mxu0 %v8627_v39 }
  0xe9   :  { %1381 = vmatprep.mubr.bf16.mxu1 %v8629_v40 }
  0xef   :  { %1261 = vmatmul.mubr.bf16.gmra.mrb[68].mxu0 %v8631_v41  ;;  %v8953_v41 = vld [vmem:[%s9065_s5 + $0x90] sm:$0xff]  }
  0xf0   :  { %1382 = vmatmul.mubr.bf16.gmra.mrb[68].mxu1 %v8632_v42  ;;  %1268 = vmatprep.mubr.bf16.mxu0 %v8633_v43 }
  0xf1   :  { %1389 = vmatprep.mubr.bf16.mxu1 %v8635_v44  ;;  %v8954_v44 = vld [vmem:[%s9065_s5 + $0xd8] sm:$0xff]  }
  0xf7   :  { %1269 = vmatmul.mubr.bf16.gmra.mrb[72].mxu0 %v8637_v45 }
  0xf8   :  { %1390 = vmatmul.mubr.bf16.gmra.mrb[72].mxu1 %v8638_v46  ;;  %1276 = vmatprep.mubr.bf16.mxu0 %v8639_v47  ;;  %v8955_v47 = vld [vmem:[%s9065_s5 + $0x98] sm:$0xff]  }
  0xf9   :  { %1397 = vmatprep.mubr.bf16.mxu1 %v8641_v48 }
  0xff   :  { %1277 = vmatmul.mubr.bf16.gmra.mrb[76].mxu0 %v8643_v49 }
 0x100   :  { %1398 = vmatmul.mubr.bf16.gmra.mrb[76].mxu1 %v8644_v50  ;;  %1284 = vmatprep.mubr.bf16.mxu0 %v8645_v51  ;;  %v8956_v51 = vld [vmem:[%s9065_s5 + $0xe0] sm:$0xff]  }
 0x101   :  { %1405 = vmatprep.mubr.bf16.mxu1 %v8647_v52 }
 0x107   :  { %1285 = vmatmul.mubr.bf16.gmra.mrb[80].mxu0 %v8649_v53 }
 0x108   :  { %1406 = vmatmul.mubr.bf16.gmra.mrb[80].mxu1 %v8650_v54  ;;  %1292 = vmatprep.mubr.bf16.mxu0 %v8651_v55 }
 0x109   :  { %1413 = vmatprep.mubr.bf16.mxu1 %v8653_v56 }
 0x10f   :  { %1293 = vmatmul.mubr.bf16.gmra.mrb[84].mxu0 %v8655_v57 }
 0x110   :  { %1414 = vmatmul.mubr.bf16.gmra.mrb[84].mxu1 %v8656_v58  ;;  %7918 = vmatprep.mubr.msk.bf16.mxu0 %vm9054_vm0, %v9053_v22 }
 0x111   :  { %7964 = vmatprep.mubr.msk.bf16.mxu1 %vm9054_vm0, %v9053_v22 }
 0x13a   :  { %v7066_v59 = vpop.f32.mrb[0].mxu0 }
 0x13b   :  { %v7148_v60 = vpop.f32.mrb[0].mxu1  ;;  %v7067_v61 = vpop.f32.mrb[1].mxu0 }
 0x13c   :  { %v7068_v62 = vadd.f32 %v7067_v61, %v7066_v59  ;;  %v7149_v63 = vpop.f32.mrb[1].mxu1  ;;  %v7069_v2 = vpop.f32.mrb[2].mxu0 }
 0x13d   :  { %v7150_v3 = vadd.f32 %v7149_v63, %v7148_v60  ;;  %v7151_v4 = vpop.f32.mrb[2].mxu1  ;;  %v7070_v5 = vpop.f32.mrb[3].mxu0  ;;  %v8957_v60 = vld [vmem:[%s9065_s5 + $0xa0] sm:$0xff]   ;;  %v8958_v63 = vld [vmem:[%s9065_s5 + $0xe8] sm:$0xff]  }
 0x13e   :  { %v7071_v6 = vadd.f32 %v7070_v5, %v7069_v2  ;;  %v7152_v7 = vpop.f32.mrb[3].mxu1 }
 0x13f   :  { %v816_v8 = vadd.f32 %v7150_v3, %v7068_v62  ;;  %v7153_v9 = vadd.f32 %v7152_v7, %v7151_v4  ;;  %v8959_v4 = vld [vmem:[%s9065_s5 + $0xa8] sm:$0xff]  }
 0x141   :  { %v819_v10 = vadd.f32 %v7153_v9, %v7071_v6 }
 0x142   :  { %v7072_v11 = vpop.f32.mrb[4].mxu0 }
 0x143   :  { %v902_v12 = vpack.c.bf16 %v819_v10, %v816_v8  ;;  %v7154_v13 = vpop.f32.mrb[4].mxu1  ;;  %v7073_v14 = vpop.f32.mrb[5].mxu0  ;;  %v8960_v8 = vld [vmem:[%s9065_s5 + $0xf0] sm:$0xff]  }
 0x144   :  { %v7074_v15 = vadd.f32 %v7073_v14, %v7072_v11  ;;  %v7155_v16 = vpop.f32.mrb[5].mxu1  ;;  %v7075_v17 = vpop.f32.mrb[6].mxu0 }
 0x145   :  { %v7156_v18 = vadd.f32 %v7155_v16, %v7154_v13  ;;  %v7157_v19 = vpop.f32.mrb[6].mxu1  ;;  %7965 = vmatmul.mubr.msk.bf16.vlgmr.msra.gmra.mrb[88].mxu1 %vm1442_vm1, %v902_v12  ;;  %v7076_v20 = vpop.f32.mrb[7].mxu0 }
 0x146   :  { %v7077_v21 = vadd.f32 %v7076_v20, %v7075_v17  ;;  %v7158_v23 = vpop.f32.mrb[7].mxu1  ;;  %7968 = vmatprep.mubr.msk.bf16.mxu1 %vm9054_vm0, %v9053_v22  ;;  %7485 = vmatpush3.bf16.msra.mxu1 %v8949_v24  ;;  %v8961_v17 = vld [vmem:[%s9065_s5 + $0xb0] sm:$0xff]   ;;  %v8962_v20 = vld [vmem:[%s9065_s5 + $0xf8] sm:$0xff]  }
 0x147   :  { %v824_v25 = vadd.f32 %v7156_v18, %v7074_v15  ;;  %v7159_v26 = vadd.f32 %v7158_v23, %v7157_v19  ;;  %7486 = vmatprep.subr.bf16.mxu1 %v8950_v27  ;;  %v8963_v24 = vld [vmem:[%s9065_s5 + $0xb8] sm:$0xff]  }
 0x149   :  { %v827_v28 = vadd.f32 %v7159_v26, %v7077_v21 }
 0x14a   :  { %v7078_v29 = vpop.f32.mrb[8].mxu0  ;;  %7487 = vmatpush3.bf16.msra.mxu1 %v8951_v30 }
 0x14b   :  { %v7160_v31 = vpop.f32.mrb[8].mxu1  ;;  %v7079_v32 = vpop.f32.mrb[9].mxu0  ;;  %v903_v33 = vpack.c.bf16 %v827_v28, %v824_v25  ;;  %7488 = vmatprep.subr.bf16.mxu1 %v8952_v1  ;;  %v8964_v28 = vld [vmem:[%s9065_s5 + $0x40] sm:$0xff]  }
 0x14c   :  { %v7080_v34 = vadd.f32 %v7079_v32, %v7078_v29  ;;  %v7161_v35 = vpop.f32.mrb[9].mxu1  ;;  %v7081_v36 = vpop.f32.mrb[10].mxu0 }
 0x14d   :  { %v7162_v37 = vadd.f32 %v7161_v35, %v7160_v31  ;;  %v7163_v0 = vpop.f32.mrb[10].mxu1  ;;  %7969 = vmatmul.mubr.msk.bf16.gmra.mrb[92].mxu1 %vm1442_vm1, %v903_v33  ;;  %v7082_v38 = vpop.f32.mrb[11].mxu0 }
 0x14e   :  { %v7083_v39 = vadd.f32 %v7082_v38, %v7081_v36  ;;  %v7164_v40 = vpop.f32.mrb[11].mxu1  ;;  %7972 = vmatprep.mubr.msk.bf16.mxu1 %vm9054_vm0, %v9053_v22  ;;  %7489 = vmatpush3.bf16.msra.mxu1 %v8953_v41 }
 0x14f   :  { %v832_v42 = vadd.f32 %v7162_v37, %v7080_v34  ;;  %v7165_v43 = vadd.f32 %v7164_v40, %v7163_v0  ;;  %7490 = vmatprep.subr.bf16.mxu1 %v8954_v44 }
 0x151   :  { %v835_v45 = vadd.f32 %v7165_v43, %v7083_v39 }
 0x152   :  { %v7084_v46 = vpop.f32.mrb[12].mxu0  ;;  %7491 = vmatpush3.bf16.msra.mxu1 %v8955_v47 }
 0x153   :  { %v7166_v48 = vpop.f32.mrb[12].mxu1  ;;  %v7085_v49 = vpop.f32.mrb[13].mxu0  ;;  %v904_v50 = vpack.c.bf16 %v835_v45, %v832_v42  ;;  %7492 = vmatprep.subr.bf16.mxu1 %v8956_v51 }
 0x154   :  { %v7086_v52 = vadd.f32 %v7085_v49, %v7084_v46  ;;  %v7167_v53 = vpop.f32.mrb[13].mxu1  ;;  %v7087_v54 = vpop.f32.mrb[14].mxu0 }
 0x155   :  { %v7168_v55 = vadd.f32 %v7167_v53, %v7166_v48  ;;  %v7169_v56 = vpop.f32.mrb[14].mxu1  ;;  %7973 = vmatmul.mubr.msk.bf16.gmra.mrb[96].mxu1 %vm1442_vm1, %v904_v50  ;;  %v7088_v57 = vpop.f32.mrb[15].mxu0 }
 0x156   :  { %v7089_v58 = vadd.f32 %v7088_v57, %v7087_v54  ;;  %v7170_v59 = vpop.f32.mrb[15].mxu1  ;;  %7976 = vmatprep.mubr.msk.bf16.mxu1 %vm9054_vm0, %v9053_v22  ;;  %7493 = vmatpush3.bf16.msra.mxu1 %v8957_v60 }
 0x157   :  { %v840_v61 = vadd.f32 %v7168_v55, %v7086_v52  ;;  %v7171_v62 = vadd.f32 %v7170_v59, %v7169_v56  ;;  %7494 = vmatprep.subr.bf16.mxu1 %v8958_v63 }
 0x159   :  { %v843_v2 = vadd.f32 %v7171_v62, %v7089_v58 }
 0x15a   :  { %v7090_v3 = vpop.f32.mrb[16].mxu0  ;;  %7495 = vmatpush3.bf16.msra.mxu1 %v8959_v4 }
 0x15b   :  { %v7172_v5 = vpop.f32.mrb[16].mxu1  ;;  %v7091_v6 = vpop.f32.mrb[17].mxu0  ;;  %v905_v7 = vpack.c.bf16 %v843_v2, %v840_v61  ;;  %7496 = vmatprep.subr.bf16.mxu1 %v8960_v8 }
 0x15c   :  { %v7092_v9 = vadd.f32 %v7091_v6, %v7090_v3  ;;  %v7173_v10 = vpop.f32.mrb[17].mxu1  ;;  %v7093_v11 = vpop.f32.mrb[18].mxu0 }
 0x15d   :  { %v7174_v12 = vadd.f32 %v7173_v10, %v7172_v5  ;;  %v7175_v13 = vpop.f32.mrb[18].mxu1  ;;  %7977 = vmatmul.mubr.msk.bf16.gmra.mrb[100].mxu1 %vm1442_vm1, %v905_v7  ;;  %v7094_v14 = vpop.f32.mrb[19].mxu0 }
 0x15e   :  { %v7095_v15 = vadd.f32 %v7094_v14, %v7093_v11  ;;  %v7176_v16 = vpop.f32.mrb[19].mxu1  ;;  %7980 = vmatprep.mubr.msk.bf16.mxu1 %vm9054_vm0, %v9053_v22  ;;  %7497 = vmatpush3.bf16.msra.mxu1 %v8961_v17 }
 0x15f   :  { %v848_v18 = vadd.f32 %v7174_v12, %v7092_v9  ;;  %v7177_v19 = vadd.f32 %v7176_v16, %v7175_v13  ;;  %7498 = vmatprep.subr.bf16.mxu1 %v8962_v20 }
 0x161   :  { %v851_v21 = vadd.f32 %v7177_v19, %v7095_v15 }
 0x162   :  { %v7096_v23 = vpop.f32.mrb[20].mxu0  ;;  %7499 = vmatpush3.bf16.msra.mxu1 %v8963_v24 }
 0x163   :  { %v7178_v25 = vpop.f32.mrb[20].mxu1  ;;  %v7097_v26 = vpop.f32.mrb[21].mxu0  ;;  %v906_v27 = vpack.c.bf16 %v851_v21, %v848_v18  ;;  %7578 = vmatprep.subr.bf16.mxu1 %v8964_v28 }
 0x164   :  { %v7098_v29 = vadd.f32 %v7097_v26, %v7096_v23  ;;  %v7179_v30 = vpop.f32.mrb[21].mxu1  ;;  %v7099_v31 = vpop.f32.mrb[22].mxu0 }
 0x165   :  { %v7180_v32 = vadd.f32 %v7179_v30, %v7178_v25  ;;  %v7181_v33 = vpop.f32.mrb[22].mxu1  ;;  %7981 = vmatmul.mubr.msk.bf16.gmra.mrb[104].mxu1 %vm1442_vm1, %v906_v27  ;;  %v7100_v1 = vpop.f32.mrb[23].mxu0 }
 0x166   :  { %v7101_v34 = vadd.f32 %v7100_v1, %v7099_v31  ;;  %v7182_v35 = vpop.f32.mrb[23].mxu1  ;;  %7984 = vmatprep.mubr.msk.bf16.mxu1 %vm9054_vm0, %v9053_v22 }
 0x167   :  { %v856_v36 = vadd.f32 %v7180_v32, %v7098_v29  ;;  %v7183_v37 = vadd.f32 %v7182_v35, %v7181_v33 }
 0x169   :  { %v859_v0 = vadd.f32 %v7183_v37, %v7101_v34 }
 0x16a   :  { %v7102_v38 = vpop.f32.mrb[24].mxu0 }
 0x16b   :  { %v7184_v39 = vpop.f32.mrb[24].mxu1  ;;  %v7103_v40 = vpop.f32.mrb[25].mxu0  ;;  %v907_v41 = vpack.c.bf16 %v859_v0, %v856_v36 }
 0x16c   :  { %v7104_v42 = vadd.f32 %v7103_v40, %v7102_v38  ;;  %v7185_v43 = vpop.f32.mrb[25].mxu1  ;;  %v7105_v44 = vpop.f32.mrb[26].mxu0 }
 0x16d   :  { %v7186_v45 = vadd.f32 %v7185_v43, %v7184_v39  ;;  %v7187_v46 = vpop.f32.mrb[26].mxu1  ;;  %7985 = vmatmul.mubr.msk.bf16.gmra.mrb[108].mxu1 %vm1442_vm1, %v907_v41  ;;  %v7106_v47 = vpop.f32.mrb[27].mxu0 }
 0x16e   :  { %v7107_v48 = vadd.f32 %v7106_v47, %v7105_v44  ;;  %v7188_v49 = vpop.f32.mrb[27].mxu1  ;;  %7988 = vmatprep.mubr.msk.bf16.mxu1 %vm9054_vm0, %v9053_v22 }
 0x16f   :  { %v864_v50 = vadd.f32 %v7186_v45, %v7104_v42  ;;  %v7189_v51 = vadd.f32 %v7188_v49, %v7187_v46 }
 0x171   :  { %v867_v52 = vadd.f32 %v7189_v51, %v7107_v48  ;;  %v8661_v51 = vld [vmem:[#allocation2 + $0x2cc] ss:$16 sps:$4 sm:$0xff]  }
 0x172   :  { %v7108_v53 = vpop.f32.mrb[28].mxu0 }
 0x173   :  { %v7190_v54 = vpop.f32.mrb[28].mxu1  ;;  %v7109_v55 = vpop.f32.mrb[29].mxu0  ;;  %v908_v56 = vpack.c.bf16 %v867_v52, %v864_v50 }
 0x174   :  { %v7110_v57 = vadd.f32 %v7109_v55, %v7108_v53  ;;  %v7191_v58 = vpop.f32.mrb[29].mxu1  ;;  %v7111_v59 = vpop.f32.mrb[30].mxu0 }
 0x175   :  { %v7192_v60 = vadd.f32 %v7191_v58, %v7190_v54  ;;  %v7193_v61 = vpop.f32.mrb[30].mxu1  ;;  %7989 = vmatmul.mubr.msk.bf16.gmra.mrb[112].mxu1 %vm1442_vm1, %v908_v56  ;;  %v7112_v62 = vpop.f32.mrb[31].mxu0 }
 0x176   :  { %v7113_v63 = vadd.f32 %v7112_v62, %v7111_v59  ;;  %v7194_v2 = vpop.f32.mrb[31].mxu1  ;;  %7992 = vmatprep.mubr.msk.bf16.mxu1 %vm9054_vm0, %v9053_v22 }
 0x177   :  { %v872_v3 = vadd.f32 %v7192_v60, %v7110_v57  ;;  %v7195_v4 = vadd.f32 %v7194_v2, %v7193_v61 }
 0x179   :  { %v875_v5 = vadd.f32 %v7195_v4, %v7113_v63  ;;  %v8659_v4 = vld [vmem:[#allocation2 + $0x2c8] ss:$16 sps:$4 sm:$0xff]  }
 0x17a   :  { %v7114_v6 = vpop.f32.mrb[32].mxu0 }
 0x17b   :  { %v7196_v7 = vpop.f32.mrb[32].mxu1  ;;  %v7115_v8 = vpop.f32.mrb[33].mxu0  ;;  %v909_v9 = vpack.c.bf16 %v875_v5, %v872_v3 }
 0x17c   :  { %v7116_v10 = vadd.f32 %v7115_v8, %v7114_v6  ;;  %v7197_v11 = vpop.f32.mrb[33].mxu1  ;;  %v7117_v12 = vpop.f32.mrb[34].mxu0 }
 0x17d   :  { %v7198_v13 = vadd.f32 %v7197_v11, %v7196_v7  ;;  %v7199_v14 = vpop.f32.mrb[34].mxu1  ;;  %7993 = vmatmul.mubr.msk.bf16.gmra.mrb[116].mxu1 %vm1442_vm1, %v909_v9  ;;  %v7118_v15 = vpop.f32.mrb[35].mxu0  ;;  %v8665_v9 = vld [vmem:[#allocation2 + $0x2ec] ss:$16 sps:$4 sm:$0xff]  }
 0x17e   :  { %v7119_v16 = vadd.f32 %v7118_v15, %v7117_v12  ;;  %v7200_v17 = vpop.f32.mrb[35].mxu1  ;;  %7996 = vmatprep.mubr.msk.bf16.mxu1 %vm9054_vm0, %v9053_v22 }
 0x17f   :  { %v880_v18 = vadd.f32 %v7198_v13, %v7116_v10  ;;  %v7201_v19 = vadd.f32 %v7200_v17, %v7199_v14 }
 0x181   :  { %v883_v20 = vadd.f32 %v7201_v19, %v7119_v16 }
 0x182   :  { %v7120_v21 = vpop.f32.mrb[36].mxu0 }
 0x183   :  { %v7202_v23 = vpop.f32.mrb[36].mxu1  ;;  %v7121_v24 = vpop.f32.mrb[37].mxu0  ;;  %v910_v25 = vpack.c.bf16 %v883_v20, %v880_v18  ;;  %v8965_v18 = vld [vmem:[%s9065_s5] sm:$0xff]  }
 0x184   :  { %v7122_v26 = vadd.f32 %v7121_v24, %v7120_v21  ;;  %v7203_v27 = vpop.f32.mrb[37].mxu1  ;;  %v7123_v28 = vpop.f32.mrb[38].mxu0  ;;  %v8966_v21 = vld [vmem:[%s9065_s5 + $0x48] sm:$0xff]  }
 0x185   :  { %v7204_v29 = vadd.f32 %v7203_v27, %v7202_v23  ;;  %v7205_v30 = vpop.f32.mrb[38].mxu1  ;;  %7997 = vmatmul.mubr.msk.bf16.gmra.mrb[120].mxu1 %vm1442_vm1, %v910_v25  ;;  %v7124_v31 = vpop.f32.mrb[39].mxu0  ;;  %v8667_v24 = vld [vmem:[#allocation2 + $0x2e8] ss:$16 sps:$4 sm:$0xff]  }
 0x186   :  { %v7125_v32 = vadd.f32 %v7124_v31, %v7123_v28  ;;  %v7206_v33 = vpop.f32.mrb[39].mxu1  ;;  %8000 = vmatprep.mubr.msk.bf16.mxu1 %vm9054_vm0, %v9053_v22  ;;  %v8671_v31 = vld [vmem:[#allocation2 + $0x30c] ss:$16 sps:$4 sm:$0xff]  }
 0x187   :  { %v888_v1 = vadd.f32 %v7204_v29, %v7122_v26  ;;  %v7207_v34 = vadd.f32 %v7206_v33, %v7205_v30  ;;  %v8967_v26 = vld [vmem:[%s9065_s5 + $0x8] sm:$0xff]   ;;  %v8968_v30 = vld [vmem:[%s9065_s5 + $0x50] sm:$0xff]  }
 0x189   :  { %v891_v35 = vadd.f32 %v7207_v34, %v7125_v32 }
 0x18a   :  { %v7126_v36 = vpop.f32.mrb[40].mxu0 }
 0x18b   :  { %v7208_v37 = vpop.f32.mrb[40].mxu1  ;;  %v7127_v0 = vpop.f32.mrb[41].mxu0  ;;  %v911_v38 = vpack.c.bf16 %v891_v35, %v888_v1 }
 0x18c   :  { %v7128_v39 = vadd.f32 %v7127_v0, %v7126_v36  ;;  %v7209_v40 = vpop.f32.mrb[41].mxu1  ;;  %v7129_v41 = vpop.f32.mrb[42].mxu0 }
 0x18d   :  { %v7210_v42 = vadd.f32 %v7209_v40, %v7208_v37  ;;  %v7211_v43 = vpop.f32.mrb[42].mxu1  ;;  %8001 = vmatmul.mubr.msk.bf16.gmra.mrb[124].mxu1 %vm1442_vm1, %v911_v38  ;;  %v7130_v44 = vpop.f32.mrb[43].mxu0  ;;  %v8969_v38 = vld [vmem:[%s9065_s5 + $0x10] sm:$0xff]  }
 0x18e   :  { %v7131_v45 = vadd.f32 %v7130_v44, %v7129_v41  ;;  %v7212_v46 = vpop.f32.mrb[43].mxu1  ;;  %8004 = vmatprep.mubr.msk.bf16.mxu1 %vm9054_vm0, %v9053_v22  ;;  %v8970_v41 = vld [vmem:[%s9065_s5 + $0x58] sm:$0xff]  }
 0x18f   :  { %v896_v47 = vadd.f32 %v7210_v42, %v7128_v39  ;;  %v7213_v48 = vadd.f32 %v7212_v46, %v7211_v43  ;;  %v8673_v43 = vld [vmem:[#allocation2 + $0x308] ss:$16 sps:$4 sm:$0xff]  }
 0x191   :  { %v899_v49 = vadd.f32 %v7213_v48, %v7131_v45  ;;  %v8971_v45 = vld [vmem:[%s9065_s5 + $0x18] sm:$0xff]  }
 0x192   :  { %v7230_v50 = vpop.f32.mrb[44].mxu0 }
 0x193   :  { %v7312_v52 = vpop.f32.mrb[44].mxu1  ;;  %v7231_v53 = vpop.f32.mrb[45].mxu0  ;;  %v912_v54 = vpack.c.bf16 %v899_v49, %v896_v47  ;;  %v8972_v49 = vld [vmem:[%s9065_s5 + $0x60] sm:$0xff]  }
 0x194   :  { %v7232_v55 = vadd.f32 %v7231_v53, %v7230_v50  ;;  %v7313_v56 = vpop.f32.mrb[45].mxu1  ;;  %v7233_v57 = vpop.f32.mrb[46].mxu0  ;;  %v8677_v50 = vld [vmem:[#allocation2 + $0x32c] ss:$16 sps:$4 sm:$0xff]  }
 0x195   :  { %v7314_v58 = vadd.f32 %v7313_v56, %v7312_v52  ;;  %v7315_v59 = vpop.f32.mrb[46].mxu1  ;;  %8005 = vmatmul.mubr.msk.bf16.gmra.mrb[128].mxu1 %vm1442_vm1, %v912_v54  ;;  %v7234_v60 = vpop.f32.mrb[47].mxu0 }
 0x196   :  { %v7235_v61 = vadd.f32 %v7234_v60, %v7233_v57  ;;  %v7316_v62 = vpop.f32.mrb[47].mxu1  ;;  %2175 = vmatprep.mubr.bf16.mxu1 %v8661_v51 }
 0x197   :  { %v1336_v63 = vadd.f32 %v7314_v58, %v7232_v55  ;;  %v7317_v2 = vadd.f32 %v7316_v62, %v7315_v59  ;;  %v8973_v59 = vld [vmem:[%s9065_s5 + $0x20] sm:$0xff]   ;;  %v8974_v62 = vld [vmem:[%s9065_s5 + $0x68] sm:$0xff]  }
 0x199   :  { %v1339_v3 = vadd.f32 %v7317_v2, %v7235_v61  ;;  %v8679_v2 = vld [vmem:[#allocation2 + $0x328] ss:$16 sps:$4 sm:$0xff]  }
 0x19a   :  { %v7236_v5 = vpop.f32.mrb[48].mxu0 }
 0x19b   :  { %v1422_v6 = vpack.c.bf16 %v1339_v3, %v1336_v63  ;;  %v7318_v7 = vpop.f32.mrb[48].mxu1  ;;  %v7237_v8 = vpop.f32.mrb[49].mxu0 }
 0x19c   :  { %v7238_v10 = vadd.f32 %v7237_v8, %v7236_v5  ;;  %v7319_v11 = vpop.f32.mrb[49].mxu1  ;;  %v7239_v12 = vpop.f32.mrb[50].mxu0  ;;  %v8976_v8 = vld [vmem:[%s9065_s5 + $0x70] sm:$0xff]  }
 0x19d   :  { %v7320_v13 = vadd.f32 %v7319_v11, %v7318_v7  ;;  %v7321_v14 = vpop.f32.mrb[50].mxu1  ;;  %7919 = vmatmul.mubr.msk.bf16.vlgmr.msra.gmra.mrb[88].mxu0 %vm1442_vm1, %v1422_v6  ;;  %v7240_v15 = vpop.f32.mrb[51].mxu0  ;;  %2176 = vmatmul.mubr.bf16.vlgmr.msra.gmra.mrb[132].mxu1 %v8659_v4  ;;  %v8975_v4 = vld [vmem:[%s9065_s5 + $0x28] sm:$0xff]  }
 0x19e   :  { %v7241_v16 = vadd.f32 %v7240_v15, %v7239_v12  ;;  %v7322_v17 = vpop.f32.mrb[51].mxu1  ;;  %7403 = vmatpush3.bf16.msra.mxu0 %v8965_v18  ;;  %7922 = vmatprep.mubr.msk.bf16.mxu0 %vm9054_vm0, %v9053_v22 }
 0x19f   :  { %v1344_v19 = vadd.f32 %v7320_v13, %v7238_v10  ;;  %v7323_v20 = vadd.f32 %v7322_v17, %v7321_v14  ;;  %7404 = vmatprep.subr.bf16.mxu0 %v8966_v21  ;;  %2183 = vmatprep.mubr.bf16.mxu1 %v8665_v9  ;;  %v8683_v9 = vld [vmem:[#allocation2 + $0x34c] ss:$16 sps:$4 sm:$0xff]  }
 0x1a0   :  { %7579 = vmatpush3.bf16.msra.mxu1 %v8965_v18  ;;  %v8977_v18 = vld [vmem:[%s9065_s5 + $0x30] sm:$0xff]  }
 0x1a1   :  { %v1347_v23 = vadd.f32 %v7323_v20, %v7241_v16  ;;  %7580 = vmatprep.subr.bf16.mxu1 %v8966_v21  ;;  %v8978_v21 = vld [vmem:[%s9065_s5 + $0x78] sm:$0xff]  }
 0x1a2   :  { %v7242_v25 = vpop.f32.mrb[52].mxu0  ;;  %7405 = vmatpush3.bf16.msra.mxu0 %v8967_v26 }
 0x1a3   :  { %v7324_v27 = vpop.f32.mrb[52].mxu1  ;;  %v7243_v28 = vpop.f32.mrb[53].mxu0  ;;  %v1423_v29 = vpack.c.bf16 %v1347_v23, %v1344_v19  ;;  %7406 = vmatprep.subr.bf16.mxu0 %v8968_v30 }
 0x1a4   :  { %v7244_v32 = vadd.f32 %v7243_v28, %v7242_v25  ;;  %v7325_v33 = vpop.f32.mrb[53].mxu1  ;;  %v7245_v1 = vpop.f32.mrb[54].mxu0  ;;  %7581 = vmatpush3.bf16.msra.mxu1 %v8967_v26  ;;  %v8979_v26 = vld [vmem:[%s9065_s5 + $0x38] sm:$0xff]  }
 0x1a5   :  { %v7326_v34 = vadd.f32 %v7325_v33, %v7324_v27  ;;  %v7327_v35 = vpop.f32.mrb[54].mxu1  ;;  %7923 = vmatmul.mubr.msk.bf16.gmra.mrb[92].mxu0 %vm1442_vm1, %v1423_v29  ;;  %v7246_v36 = vpop.f32.mrb[55].mxu0  ;;  %2184 = vmatmul.mubr.bf16.gmra.mrb[136].mxu1 %v8667_v24  ;;  %v8685_v24 = vld [vmem:[#allocation2 + $0x348] ss:$16 sps:$4 sm:$0xff]   ;;  %v8689_v27 = vld [vmem:[#allocation2 + $0x36c] ss:$16 sps:$4 sm:$0xff]  }
 0x1a6   :  { %v7247_v37 = vadd.f32 %v7246_v36, %v7245_v1  ;;  %v7328_v0 = vpop.f32.mrb[55].mxu1  ;;  %7926 = vmatprep.mubr.msk.bf16.mxu0 %vm9054_vm0, %v9053_v22  ;;  %7407 = vmatpush3.bf16.msra.mxu0 %v8969_v38 }
 0x1a7   :  { %v1352_v39 = vadd.f32 %v7326_v34, %v7244_v32  ;;  %v7329_v40 = vadd.f32 %v7328_v0, %v7327_v35  ;;  %7408 = vmatprep.subr.bf16.mxu0 %v8970_v41  ;;  %2191 = vmatprep.mubr.bf16.mxu1 %v8671_v31 }
 0x1a8   :  { %7582 = vmatprep.subr.bf16.mxu1 %v8968_v30 }
 0x1a9   :  { %v1355_v42 = vadd.f32 %v7329_v40, %v7247_v37  ;;  %7583 = vmatpush3.bf16.msra.mxu1 %v8969_v38  ;;  %v8691_v40 = vld [vmem:[#allocation2 + $0x368] ss:$16 sps:$4 sm:$0xff]  }
 0x1aa   :  { %v7248_v44 = vpop.f32.mrb[56].mxu0  ;;  %7409 = vmatpush3.bf16.msra.mxu0 %v8971_v45  ;;  %7584 = vmatprep.subr.bf16.mxu1 %v8970_v41 }
 0x1ab   :  { %v7330_v46 = vpop.f32.mrb[56].mxu1  ;;  %v7249_v47 = vpop.f32.mrb[57].mxu0  ;;  %v1424_v48 = vpack.c.bf16 %v1355_v42, %v1352_v39  ;;  %7410 = vmatprep.subr.bf16.mxu0 %v8972_v49  ;;  %v8695_v42 = vld [vmem:[#allocation2 + $0x38c] ss:$16 sps:$4 sm:$0xff]  }
 0x1ac   :  { %v7250_v51 = vadd.f32 %v7249_v47, %v7248_v44  ;;  %v7331_v52 = vpop.f32.mrb[57].mxu1  ;;  %v7251_v53 = vpop.f32.mrb[58].mxu0 }
 0x1ad   :  { %v7332_v54 = vadd.f32 %v7331_v52, %v7330_v46  ;;  %v7333_v55 = vpop.f32.mrb[58].mxu1  ;;  %7927 = vmatmul.mubr.msk.bf16.gmra.mrb[96].mxu0 %vm1442_vm1, %v1424_v48  ;;  %v7252_v56 = vpop.f32.mrb[59].mxu0  ;;  %2192 = vmatmul.mubr.bf16.gmra.mrb[140].mxu1 %v8673_v43 }
 0x1ae   :  { %v7253_v57 = vadd.f32 %v7252_v56, %v7251_v53  ;;  %v7334_v58 = vpop.f32.mrb[59].mxu1  ;;  %7930 = vmatprep.mubr.msk.bf16.mxu0 %vm9054_vm0, %v9053_v22  ;;  %7411 = vmatpush3.bf16.msra.mxu0 %v8973_v59 }
 0x1af   :  { %v1360_v60 = vadd.f32 %v7332_v54, %v7250_v51  ;;  %v7335_v61 = vadd.f32 %v7334_v58, %v7333_v55  ;;  %7412 = vmatprep.subr.bf16.mxu0 %v8974_v62  ;;  %2199 = vmatprep.mubr.bf16.mxu1 %v8677_v50 }
 0x1b0   :  { %7585 = vmatpush3.bf16.msra.mxu1 %v8971_v45 }
 0x1b1   :  { %v1363_v63 = vadd.f32 %v7335_v61, %v7253_v57  ;;  %7586 = vmatprep.subr.bf16.mxu1 %v8972_v49  ;;  %v8697_v57 = vld [vmem:[#allocation2 + $0x388] ss:$16 sps:$4 sm:$0xff]  }
 0x1b2   :  { %v7254_v3 = vpop.f32.mrb[60].mxu0  ;;  %7413 = vmatpush3.bf16.msra.mxu0 %v8975_v4 }
 0x1b3   :  { %v7336_v5 = vpop.f32.mrb[60].mxu1  ;;  %v7255_v6 = vpop.f32.mrb[61].mxu0  ;;  %v1425_v7 = vpack.c.bf16 %v1363_v63, %v1360_v60  ;;  %7414 = vmatprep.subr.bf16.mxu0 %v8976_v8 }
 0x1b4   :  { %v7256_v10 = vadd.f32 %v7255_v6, %v7254_v3  ;;  %v7337_v11 = vpop.f32.mrb[61].mxu1  ;;  %v7257_v12 = vpop.f32.mrb[62].mxu0  ;;  %7587 = vmatpush3.bf16.msra.mxu1 %v8973_v59  ;;  %v8701_v59 = vld [vmem:[#allocation2 + $0x3ac] ss:$16 sps:$4 sm:$0xff]  }
 0x1b5   :  { %v7338_v13 = vadd.f32 %v7337_v11, %v7336_v5  ;;  %v7339_v14 = vpop.f32.mrb[62].mxu1  ;;  %7931 = vmatmul.mubr.msk.bf16.gmra.mrb[100].mxu0 %vm1442_vm1, %v1425_v7  ;;  %v7258_v15 = vpop.f32.mrb[63].mxu0  ;;  %2200 = vmatmul.mubr.bf16.gmra.mrb[144].mxu1 %v8679_v2 }
 0x1b6   :  { %v7259_v16 = vadd.f32 %v7258_v15, %v7257_v12  ;;  %v7340_v17 = vpop.f32.mrb[63].mxu1  ;;  %7934 = vmatprep.mubr.msk.bf16.mxu0 %vm9054_vm0, %v9053_v22  ;;  %7415 = vmatpush3.bf16.msra.mxu0 %v8977_v18  ;;  %v8703_v12 = vld [vmem:[#allocation2 + $0x3a8] ss:$16 sps:$4 sm:$0xff]  }
 0x1b7   :  { %v1368_v19 = vadd.f32 %v7338_v13, %v7256_v10  ;;  %v7341_v20 = vadd.f32 %v7340_v17, %v7339_v14  ;;  %7416 = vmatprep.subr.bf16.mxu0 %v8978_v21  ;;  %2207 = vmatprep.mubr.bf16.mxu1 %v8683_v9  ;;  %v8707_v14 = vld [vmem:[#allocation2 + $0x3cc] ss:$16 sps:$4 sm:$0xff]  }
 0x1b8   :  { %7588 = vmatprep.subr.bf16.mxu1 %v8974_v62 }
 0x1b9   :  { %v1371_v23 = vadd.f32 %v7341_v20, %v7259_v16  ;;  %7589 = vmatpush3.bf16.msra.mxu1 %v8975_v4 }
 0x1ba   :  { %v7260_v25 = vpop.f32.mrb[64].mxu0  ;;  %7417 = vmatpush3.bf16.msra.mxu0 %v8979_v26  ;;  %7590 = vmatprep.subr.bf16.mxu1 %v8976_v8 }
 0x1bb   :  { %v7342_v28 = vpop.f32.mrb[64].mxu1  ;;  %v7261_v29 = vpop.f32.mrb[65].mxu0  ;;  %v1426_v30 = vpack.c.bf16 %v1371_v23, %v1368_v19  ;;  %8008 = vmatprep.subr.bf16.mxu0 %v9053_v22 }
 0x1bc   :  { %v7262_v31 = vadd.f32 %v7261_v29, %v7260_v25  ;;  %v7343_v32 = vpop.f32.mrb[65].mxu1  ;;  %v7263_v33 = vpop.f32.mrb[66].mxu0 }
 0x1bd   :  { %v7344_v1 = vadd.f32 %v7343_v32, %v7342_v28  ;;  %v7345_v34 = vpop.f32.mrb[66].mxu1  ;;  %7935 = vmatmul.mubr.msk.bf16.gmra.mrb[104].mxu0 %vm1442_vm1, %v1426_v30  ;;  %v7264_v35 = vpop.f32.mrb[67].mxu0  ;;  %2208 = vmatmul.mubr.bf16.gmra.mrb[148].mxu1 %v8685_v24  ;;  %v8709_v30 = vld [vmem:[#allocation2 + $0x3c8] ss:$16 sps:$4 sm:$0xff]   ;;  %v8713_v32 = vld [vmem:[#allocation2 + $0x3ec] ss:$16 sps:$4 sm:$0xff]  }
 0x1be   :  { %v7265_v36 = vadd.f32 %v7264_v35, %v7263_v33  ;;  %v7346_v37 = vpop.f32.mrb[67].mxu1  ;;  %7938 = vmatprep.mubr.msk.bf16.mxu0 %vm9054_vm0, %v9053_v22  ;;  %2215 = vmatprep.mubr.bf16.mxu1 %v8689_v27 }
 0x1bf   :  { %v1376_v0 = vadd.f32 %v7344_v1, %v7262_v31  ;;  %v7347_v38 = vadd.f32 %v7346_v37, %v7345_v34  ;;  %7591 = vmatpush3.bf16.msra.mxu1 %v8977_v18 }
 0x1c0   :  { %7592 = vmatprep.subr.bf16.mxu1 %v8978_v21 }
 0x1c1   :  { %v1379_v39 = vadd.f32 %v7347_v38, %v7265_v36 }
 0x1c2   :  { %v7266_v41 = vpop.f32.mrb[68].mxu0 }
 0x1c3   :  { %v7348_v43 = vpop.f32.mrb[68].mxu1  ;;  %v7267_v44 = vpop.f32.mrb[69].mxu0  ;;  %v1427_v45 = vpack.c.bf16 %v1379_v39, %v1376_v0  ;;  %7593 = vmatpush3.bf16.msra.mxu1 %v8979_v26 }
 0x1c4   :  { %v7268_v46 = vadd.f32 %v7267_v44, %v7266_v41  ;;  %v7349_v47 = vpop.f32.mrb[69].mxu1  ;;  %v7269_v48 = vpop.f32.mrb[70].mxu0  ;;  %8054 = vmatprep.subr.bf16.mxu1 %v9053_v22 }
 0x1c5   :  { %v7350_v49 = vadd.f32 %v7349_v47, %v7348_v43  ;;  %v7351_v50 = vpop.f32.mrb[70].mxu1  ;;  %7939 = vmatmul.mubr.msk.bf16.gmra.mrb[108].mxu0 %vm1442_vm1, %v1427_v45  ;;  %v7270_v51 = vpop.f32.mrb[71].mxu0  ;;  %2216 = vmatmul.mubr.bf16.gmra.mrb[152].mxu1 %v8691_v40  ;;  %v8715_v45 = vld [vmem:[#allocation2 + $0x3e8] ss:$16 sps:$4 sm:$0xff]   ;;  %v8719_v47 = vld [vmem:[#allocation2 + $0x40c] ss:$16 sps:$4 sm:$0xff]  }
 0x1c6   :  { %v7271_v52 = vadd.f32 %v7270_v51, %v7269_v48  ;;  %v7352_v53 = vpop.f32.mrb[71].mxu1  ;;  %7942 = vmatprep.mubr.msk.bf16.mxu0 %vm9054_vm0, %v9053_v22  ;;  %2223 = vmatprep.mubr.bf16.mxu1 %v8695_v42 }
 0x1c7   :  { %v1384_v54 = vadd.f32 %v7350_v49, %v7268_v46  ;;  %v7353_v55 = vadd.f32 %v7352_v53, %v7351_v50 }
 0x1c9   :  { %v1387_v56 = vadd.f32 %v7353_v55, %v7271_v52 }
 0x1ca   :  { %v7272_v58 = vpop.f32.mrb[72].mxu0 }
 0x1cb   :  { %v7354_v60 = vpop.f32.mrb[72].mxu1  ;;  %v7273_v61 = vpop.f32.mrb[73].mxu0  ;;  %v1428_v62 = vpack.c.bf16 %v1387_v56, %v1384_v54 }
 0x1cc   :  { %v7274_v63 = vadd.f32 %v7273_v61, %v7272_v58  ;;  %v7355_v2 = vpop.f32.mrb[73].mxu1  ;;  %v7275_v3 = vpop.f32.mrb[74].mxu0 }
 0x1cd   :  { %v7356_v4 = vadd.f32 %v7355_v2, %v7354_v60  ;;  %v7357_v5 = vpop.f32.mrb[74].mxu1  ;;  %7943 = vmatmul.mubr.msk.bf16.gmra.mrb[112].mxu0 %vm1442_vm1, %v1428_v62  ;;  %v7276_v6 = vpop.f32.mrb[75].mxu0  ;;  %2224 = vmatmul.mubr.bf16.gmra.mrb[156].mxu1 %v8697_v57  ;;  %v8721_v62 = vld [vmem:[#allocation2 + $0x408] ss:$16 sps:$4 sm:$0xff]  }
 0x1ce   :  { %v7277_v7 = vadd.f32 %v7276_v6, %v7275_v3  ;;  %v7358_v8 = vpop.f32.mrb[75].mxu1  ;;  %7946 = vmatprep.mubr.msk.bf16.mxu0 %vm9054_vm0, %v9053_v22  ;;  %2231 = vmatprep.mubr.bf16.mxu1 %v8701_v59  ;;  %v8662_v3 = vld [vmem:[#allocation2 + $0x2c0] ss:$16 sps:$4 sm:$0xff]   ;;  %v8674_v6 = vld [vmem:[#allocation2 + $0x304] ss:$16 sps:$4 sm:$0xff]  }
 0x1cf   :  { %v1392_v9 = vadd.f32 %v7356_v4, %v7274_v63  ;;  %v7359_v10 = vadd.f32 %v7358_v8, %v7357_v5  ;;  %v8664_v63 = vld [vmem:[#allocation2 + $0x2c4] ss:$16 sps:$4 sm:$0xff]   ;;  %v8670_v5 = vld [vmem:[#allocation2 + $0x2e0] ss:$16 sps:$4 sm:$0xff]  }
 0x1d0   :  { %v8668_v4 = vld [vmem:[#allocation2 + $0x2e4] ss:$16 sps:$4 sm:$0xff]  }
 0x1d1   :  { %v1395_v11 = vadd.f32 %v7359_v10, %v7277_v7  ;;  %v8725_v7 = vld [vmem:[%s9080_s17 + $0x10] sm:$0xff]   ;;  %v8980_v8 = vld [vmem:[%s9065_s5 + $0xc0] sm:$0xff]  }
 0x1d2   :  { %v7278_v13 = vpop.f32.mrb[76].mxu0  ;;  %v8680_v10 = vld [vmem:[#allocation2 + $0x324] ss:$16 sps:$4 sm:$0xff]  }
 0x1d3   :  { %v7360_v15 = vpop.f32.mrb[76].mxu1  ;;  %v7279_v16 = vpop.f32.mrb[77].mxu0  ;;  %v1429_v17 = vpack.c.bf16 %v1395_v11, %v1392_v9  ;;  %v8676_v9 = vld [vmem:[#allocation2 + $0x300] ss:$16 sps:$4 sm:$0xff]  }
 0x1d4   :  { %v7280_v18 = vadd.f32 %v7279_v16, %v7278_v13  ;;  %v7361_v19 = vpop.f32.mrb[77].mxu1  ;;  %v7281_v20 = vpop.f32.mrb[78].mxu0  ;;  %v8682_v11 = vld [vmem:[#allocation2 + $0x320] ss:$16 sps:$4 sm:$0xff]  }
 0x1d5   :  { %v7362_v21 = vadd.f32 %v7361_v19, %v7360_v15  ;;  %v7363_v23 = vpop.f32.mrb[78].mxu1  ;;  %7947 = vmatmul.mubr.msk.bf16.gmra.mrb[116].mxu0 %vm1442_vm1, %v1429_v17  ;;  %v7282_v24 = vpop.f32.mrb[79].mxu0  ;;  %2232 = vmatmul.mubr.bf16.gmra.mrb[160].mxu1 %v8703_v12  ;;  %v8686_v12 = vld [vmem:[#allocation2 + $0x344] ss:$16 sps:$4 sm:$0xff]   ;;  %v8688_v13 = vld [vmem:[#allocation2 + $0x340] ss:$16 sps:$4 sm:$0xff]  }
 0x1d6   :  { %v7283_v25 = vadd.f32 %v7282_v24, %v7281_v20  ;;  %v7364_v26 = vpop.f32.mrb[79].mxu1  ;;  %7950 = vmatprep.mubr.msk.bf16.mxu0 %vm9054_vm0, %v9053_v22  ;;  %2239 = vmatprep.mubr.bf16.mxu1 %v8707_v14  ;;  %v8692_v14 = vld [vmem:[#allocation2 + $0x364] ss:$16 sps:$4 sm:$0xff]   ;;  %v8694_v17 = vld [vmem:[#allocation2 + $0x360] ss:$16 sps:$4 sm:$0xff]  }
 0x1d7   :  { %v1400_v27 = vadd.f32 %v7362_v21, %v7280_v18  ;;  %v7365_v28 = vadd.f32 %v7364_v26, %v7363_v23  ;;  %v8698_v19 = vld [vmem:[#allocation2 + $0x384] ss:$16 sps:$4 sm:$0xff]   ;;  %v8700_v24 = vld [vmem:[#allocation2 + $0x380] ss:$16 sps:$4 sm:$0xff]  }
 0x1d8   :  { %v8704_v26 = vld [vmem:[#allocation2 + $0x3a4] ss:$16 sps:$4 sm:$0xff]  }
 0x1d9   :  { %v1403_v29 = vadd.f32 %v7365_v28, %v7283_v25 }
 0x1da   :  { %v7284_v31 = vpop.f32.mrb[80].mxu0 }
 0x1db   :  { %v7366_v33 = vpop.f32.mrb[80].mxu1  ;;  %v7285_v1 = vpop.f32.mrb[81].mxu0  ;;  %v1430_v34 = vpack.c.bf16 %v1403_v29, %v1400_v27 }
 0x1dc   :  { %v7286_v35 = vadd.f32 %v7285_v1, %v7284_v31  ;;  %v7367_v36 = vpop.f32.mrb[81].mxu1  ;;  %v7287_v37 = vpop.f32.mrb[82].mxu0 }
 0x1dd   :  { %v7368_v0 = vadd.f32 %v7367_v36, %v7366_v33  ;;  %v7369_v38 = vpop.f32.mrb[82].mxu1  ;;  %7951 = vmatmul.mubr.msk.bf16.gmra.mrb[120].mxu0 %vm1442_vm1, %v1430_v34  ;;  %v7288_v39 = vpop.f32.mrb[83].mxu0  ;;  %2240 = vmatmul.mubr.bf16.gmra.mrb[164].mxu1 %v8709_v30  ;;  %v8706_v30 = vld [vmem:[#allocation2 + $0x3a0] ss:$16 sps:$4 sm:$0xff]  }
 0x1de   :  { %v7289_v40 = vadd.f32 %v7288_v39, %v7287_v37  ;;  %v7370_v41 = vpop.f32.mrb[83].mxu1  ;;  %7954 = vmatprep.mubr.msk.bf16.mxu0 %vm9054_vm0, %v9053_v22  ;;  %2247 = vmatprep.mubr.bf16.mxu1 %v8713_v32  ;;  %v8710_v32 = vld [vmem:[#allocation2 + $0x3c4] ss:$16 sps:$4 sm:$0xff]  }
 0x1df   :  { %v1408_v42 = vadd.f32 %v7368_v0, %v7286_v35  ;;  %v7371_v43 = vadd.f32 %v7370_v41, %v7369_v38  ;;  %v8712_v35 = vld [vmem:[#allocation2 + $0x3c0] ss:$16 sps:$4 sm:$0xff]   ;;  %v8716_v37 = vld [vmem:[#allocation2 + $0x3e4] ss:$16 sps:$4 sm:$0xff]  }
 0x1e1   :  { %v1411_v44 = vadd.f32 %v7371_v43, %v7289_v40  ;;  %v8718_v40 = vld [vmem:[#allocation2 + $0x3e0] ss:$16 sps:$4 sm:$0xff]  }
 0x1e2   :  { %v7290_v46 = vpop.f32.mrb[84].mxu0 }
 0x1e3   :  { %v7372_v48 = vpop.f32.mrb[84].mxu1  ;;  %v7291_v49 = vpop.f32.mrb[85].mxu0  ;;  %v1431_v50 = vpack.c.bf16 %v1411_v44, %v1408_v42  ;;  %v8722_v42 = vld [vmem:[#allocation2 + $0x404] ss:$16 sps:$4 sm:$0xff]  }
 0x1e4   :  { %v7292_v51 = vadd.f32 %v7291_v49, %v7290_v46  ;;  %v7373_v52 = vpop.f32.mrb[85].mxu1  ;;  %v7293_v53 = vpop.f32.mrb[86].mxu0  ;;  %v8724_v46 = vld [vmem:[#allocation2 + $0x400] ss:$16 sps:$4 sm:$0xff]  }
 0x1e5   :  { %v7374_v54 = vadd.f32 %v7373_v52, %v7372_v48  ;;  %v7375_v55 = vpop.f32.mrb[86].mxu1  ;;  %7955 = vmatmul.mubr.msk.bf16.gmra.mrb[124].mxu0 %vm1442_vm1, %v1431_v50  ;;  %v7294_v56 = vpop.f32.mrb[87].mxu0  ;;  %2248 = vmatmul.mubr.bf16.gmra.mrb[168].mxu1 %v8715_v45 }
 0x1e6   :  { %v7295_v57 = vadd.f32 %v7294_v56, %v7293_v53  ;;  %v7376_v58 = vpop.f32.mrb[87].mxu1  ;;  %7958 = vmatprep.mubr.msk.bf16.mxu0 %vm9054_vm0, %v9053_v22  ;;  %2255 = vmatprep.mubr.bf16.mxu1 %v8719_v47 }
 0x1e7   :  { %v1416_v59 = vadd.f32 %v7374_v54, %v7292_v51  ;;  %v7377_v60 = vadd.f32 %v7376_v58, %v7375_v55 }
 0x1e9   :  { %v1419_v61 = vadd.f32 %v7377_v60, %v7295_v57 }
 0x1eb   :  { %v1432_v2 = vpack.c.bf16 %v1419_v61, %v1416_v59 }
 0x1ed   :  { %7959 = vmatmul.mubr.msk.bf16.gmra.mrb[128].mxu0 %vm1442_vm1, %v1432_v2  ;;  %2256 = vmatmul.mubr.bf16.gmra.mrb[172].mxu1 %v8721_v62 }
 0x1ee   :  { %2054 = vmatprep.mubr.bf16.mxu0 %v8664_v63 }
 0x1f5   :  { %2055 = vmatmul.mubr.bf16.vlgmr.msra.gmra.mrb[132].mxu0 %v8662_v3 }
 0x1f6   :  { %2062 = vmatprep.mubr.bf16.mxu0 %v8668_v4  ;;  %8009 = vmatpush3.bf16.msra.mxu0 %v8725_v7 }
 0x1f7   :  { %7660 = vmatprep.subr.bf16.mxu0 %v8980_v8 }
 0x1fd   :  { %2063 = vmatmul.mubr.bf16.gmra.mrb[136].mxu0 %v8670_v5 }
 0x1fe   :  { %2070 = vmatprep.mubr.bf16.mxu0 %v8674_v6 }
 0x205   :  { %2071 = vmatmul.mubr.bf16.gmra.mrb[140].mxu0 %v8676_v9 }
 0x206   :  { %2078 = vmatprep.mubr.bf16.mxu0 %v8680_v10 }
 0x20d   :  { %2079 = vmatmul.mubr.bf16.gmra.mrb[144].mxu0 %v8682_v11 }
 0x20e   :  { %2086 = vmatprep.mubr.bf16.mxu0 %v8686_v12 }
 0x215   :  { %2087 = vmatmul.mubr.bf16.gmra.mrb[148].mxu0 %v8688_v13 }
 0x216   :  { %2094 = vmatprep.mubr.bf16.mxu0 %v8692_v14 }
 0x218   :  { %v9488_v15 = vpop.f32.mrb[88].mxu1 }
 0x219   :  { %v7966_v16 = vpop.f32.mrb[89].mxu1 }
 0x21a   :  { %v9490_v18 = vpop.f32.mrb[90].mxu1 }
 0x21b   :  { %v7967_v20 = vpop.f32.mrb[91].mxu1 }
 0x21d   :  { %2095 = vmatmul.mubr.bf16.gmra.mrb[152].mxu0 %v8694_v17 }
 0x21e   :  { %2102 = vmatprep.mubr.bf16.mxu0 %v8698_v19 }
 0x220   :  { %v9492_v21 = vpop.f32.mrb[92].mxu1 }
 0x221   :  { %v7970_v23 = vpop.f32.mrb[93].mxu1 }
 0x222   :  { %v9494_v25 = vpop.f32.mrb[94].mxu1 }
 0x223   :  { %v7971_v27 = vpop.f32.mrb[95].mxu1 }
 0x225   :  { %2103 = vmatmul.mubr.bf16.gmra.mrb[156].mxu0 %v8700_v24 }
 0x226   :  { %2110 = vmatprep.mubr.bf16.mxu0 %v8704_v26 }
 0x228   :  { %v9496_v28 = vpop.f32.mrb[96].mxu1 }
 0x229   :  { %v7974_v29 = vpop.f32.mrb[97].mxu1 }
 0x22a   :  { %v9498_v31 = vpop.f32.mrb[98].mxu1 }
 0x22b   :  { %v7975_v33 = vpop.f32.mrb[99].mxu1 }
 0x22d   :  { %2111 = vmatmul.mubr.bf16.gmra.mrb[160].mxu0 %v8706_v30 }
 0x22e   :  { %2118 = vmatprep.mubr.bf16.mxu0 %v8710_v32 }
 0x230   :  { %v9500_v1 = vpop.f32.mrb[100].mxu1 }
 0x231   :  { %v7978_v34 = vpop.f32.mrb[101].mxu1 }
 0x232   :  { %v9502_v36 = vpop.f32.mrb[102].mxu1 }
 0x233   :  { %v7979_v0 = vpop.f32.mrb[103].mxu1 }
 0x235   :  { %2119 = vmatmul.mubr.bf16.gmra.mrb[164].mxu0 %v8712_v35 }
 0x236   :  { %2126 = vmatprep.mubr.bf16.mxu0 %v8716_v37 }
 0x238   :  { %v9504_v38 = vpop.f32.mrb[104].mxu1 }
 0x239   :  { %v7982_v39 = vpop.f32.mrb[105].mxu1 }
 0x23a   :  { %v9506_v41 = vpop.f32.mrb[106].mxu1 }
 0x23b   :  { %v7983_v43 = vpop.f32.mrb[107].mxu1 }
 0x23d   :  { %2127 = vmatmul.mubr.bf16.gmra.mrb[168].mxu0 %v8718_v40 }
 0x23e   :  { %2134 = vmatprep.mubr.bf16.mxu0 %v8722_v42 }
 0x240   :  { %v9508_v44 = vpop.f32.mrb[108].mxu1 }
 0x241   :  { %v7986_v45 = vpop.f32.mrb[109].mxu1 }
 0x242   :  { %v9510_v47 = vpop.f32.mrb[110].mxu1 }
 0x243   :  { %v7987_v48 = vpop.f32.mrb[111].mxu1 }
 0x245   :  { %2135 = vmatmul.mubr.bf16.gmra.mrb[172].mxu0 %v8724_v46 }
 0x246   :  { %8010 = vmatprep.mubr.msk.bf16.mxu0 %vm9054_vm0, %v9053_v22 }
 0x248   :  { %v9514_v49 = vpop.f32.mrb[112].mxu1 }
 0x249   :  { %v7990_v50 = vpop.f32.mrb[113].mxu1 }
 0x24a   :  { %v9516_v51 = vpop.f32.mrb[114].mxu1 }
 0x24b   :  { %v7991_v52 = vpop.f32.mrb[115].mxu1 }
 0x250   :  { %v9518_v53 = vpop.f32.mrb[116].mxu1 }
 0x251   :  { %v7994_v54 = vpop.f32.mrb[117].mxu1 }
 0x252   :  { %v9520_v55 = vpop.f32.mrb[118].mxu1 }
 0x253   :  { %v7995_v56 = vpop.f32.mrb[119].mxu1 }
 0x258   :  { %v9522_v57 = vpop.f32.mrb[120].mxu1 }
 0x259   :  { %v7998_v58 = vpop.f32.mrb[121].mxu1 }
 0x25a   :  { %v9524_v59 = vpop.f32.mrb[122].mxu1 }
 0x25b   :  { %v7999_v60 = vpop.f32.mrb[123].mxu1 }
 0x260   :  { %v9526_v61 = vpop.f32.mrb[124].mxu1 }
 0x261   :  { %v8002_v62 = vpop.f32.mrb[125].mxu1 }
 0x262   :  { %v9528_v63 = vpop.f32.mrb[126].mxu1 }
 0x263   :  { %v8003_v2 = vpop.f32.mrb[127].mxu1 }
 0x268   :  { %v9530_v3 = vpop.f32.mrb[128].mxu1 }
 0x269   :  { %v8006_v4 = vpop.f32.mrb[129].mxu1 }
 0x26a   :  { %v9532_v5 = vpop.f32.mrb[130].mxu1 }
 0x26b   :  { %v8007_v6 = vpop.f32.mrb[131].mxu1 }
 0x270   :  { %v1510_v7 = vpop.f32.mrb[88].mxu0  ;;  %v7500_v8 = vpop.f32.mrb[132].mxu1 }
 0x271   :  { %v9535_v9 = vadd.f32 %v9488_v15, %v1510_v7  ;;  %v7920_v10 = vpop.f32.mrb[89].mxu0  ;;  %v7501_v11 = vpop.f32.mrb[133].mxu1 }
 0x272   :  { %v1513_v12 = vpop.f32.mrb[90].mxu0  ;;  %v9537_v13 = vadd.f32 %v7501_v11, %v7500_v8  ;;  %v7503_v14 = vpop.f32.mrb[134].mxu1 }
 0x273   :  { %v9540_v16 = vadd.f32 %v9490_v18, %v1513_v12  ;;  %v7921_v17 = vpop.f32.mrb[91].mxu0  ;;  %v7504_v19 = vpop.f32.mrb[135].mxu1 }
 0x274   :  { %v9542_v20 = vadd.f32 %v7504_v19, %v7503_v14 }
 0x278   :  { %v1518_v23 = vpop.f32.mrb[92].mxu0  ;;  %v7506_v24 = vpop.f32.mrb[136].mxu1 }
 0x279   :  { %v9545_v26 = vadd.f32 %v9492_v21, %v1518_v23  ;;  %v7924_v15 = vpop.f32.mrb[93].mxu0  ;;  %v7507_v27 = vpop.f32.mrb[137].mxu1 }
 0x27a   :  { %v1521_v29 = vpop.f32.mrb[94].mxu0  ;;  %v9547_v30 = vadd.f32 %v7507_v27, %v7506_v24  ;;  %v7509_v32 = vpop.f32.mrb[138].mxu1 }
 0x27b   :  { %v9550_v33 = vadd.f32 %v9494_v25, %v1521_v29  ;;  %v7925_v18 = vpop.f32.mrb[95].mxu0  ;;  %v7510_v34 = vpop.f32.mrb[139].mxu1 }
 0x27c   :  { %v9552_v35 = vadd.f32 %v7510_v34, %v7509_v32 }
 0x280   :  { %v1526_v37 = vpop.f32.mrb[96].mxu0  ;;  %v7512_v0 = vpop.f32.mrb[140].mxu1 }
 0x281   :  { %v9555_v39 = vadd.f32 %v9496_v28, %v1526_v37  ;;  %v7928_v21 = vpop.f32.mrb[97].mxu0  ;;  %v7513_v40 = vpop.f32.mrb[141].mxu1 }
 0x282   :  { %v1529_v42 = vpop.f32.mrb[98].mxu0  ;;  %v9557_v43 = vadd.f32 %v7513_v40, %v7512_v0  ;;  %v7515_v45 = vpop.f32.mrb[142].mxu1 }
 0x283   :  { %v9560_v46 = vadd.f32 %v9498_v31, %v1529_v42  ;;  %v7929_v25 = vpop.f32.mrb[99].mxu0  ;;  %v7516_v48 = vpop.f32.mrb[143].mxu1 }
 0x284   :  { %v9562_v50 = vadd.f32 %v7516_v48, %v7515_v45 }
 0x288   :  { %v1534_v52 = vpop.f32.mrb[100].mxu0  ;;  %v7518_v54 = vpop.f32.mrb[144].mxu1 }
 0x289   :  { %v9565_v56 = vadd.f32 %v9500_v1, %v1534_v52  ;;  %v7932_v28 = vpop.f32.mrb[101].mxu0  ;;  %v7519_v58 = vpop.f32.mrb[145].mxu1 }
 0x28a   :  { %v1537_v60 = vpop.f32.mrb[102].mxu0  ;;  %v9567_v62 = vadd.f32 %v7519_v58, %v7518_v54  ;;  %v7521_v2 = vpop.f32.mrb[146].mxu1 }
 0x28b   :  { %v9570_v4 = vadd.f32 %v9502_v36, %v1537_v60  ;;  %v7933_v31 = vpop.f32.mrb[103].mxu0  ;;  %v7522_v6 = vpop.f32.mrb[147].mxu1  ;;  %v8726_v60 = vld [vmem:[#allocation2 + $0x420] ss:$16 sps:$4 sm:$0xff]  }
 0x28c   :  { %v9572_v7 = vadd.f32 %v7522_v6, %v7521_v2  ;;  %v8728_v2 = vld [vmem:[#allocation2 + $0x424] ss:$16 sps:$4 sm:$0xff]  }
 0x28d   :  { %2757 = vmatprep.mubr.bf16.mxu1 %v8728_v2 }
 0x28e   :  { %2758 = vmatmul.mubr.bf16.vlgmr.msra.gmra.mrb[176].mxu1 %v8726_v60 }
 0x290   :  { %v1542_v8 = vpop.f32.mrb[104].mxu0  ;;  %v7524_v10 = vpop.f32.mrb[148].mxu1 }
 0x291   :  { %v9575_v11 = vadd.f32 %v9504_v38, %v1542_v8  ;;  %v7936_v1 = vpop.f32.mrb[105].mxu0  ;;  %v7525_v12 = vpop.f32.mrb[149].mxu1 }
 0x292   :  { %v1545_v14 = vpop.f32.mrb[106].mxu0  ;;  %v9577_v17 = vadd.f32 %v7525_v12, %v7524_v10  ;;  %v7527_v19 = vpop.f32.mrb[150].mxu1 }
 0x293   :  { %v9580_v23 = vadd.f32 %v9506_v41, %v1545_v14  ;;  %v7937_v36 = vpop.f32.mrb[107].mxu0  ;;  %v7528_v24 = vpop.f32.mrb[151].mxu1 }
 0x294   :  { %v9582_v15 = vadd.f32 %v7528_v24, %v7527_v19 }
 0x298   :  { %v1550_v27 = vpop.f32.mrb[108].mxu0  ;;  %v7530_v29 = vpop.f32.mrb[152].mxu1 }
 0x299   :  { %v9585_v32 = vadd.f32 %v9508_v44, %v1550_v27  ;;  %v7940_v38 = vpop.f32.mrb[109].mxu0  ;;  %v7531_v18 = vpop.f32.mrb[153].mxu1  ;;  %v8732_v27 = vld [vmem:[#allocation2 + $0x444] ss:$16 sps:$4 sm:$0xff]  }
 0x29a   :  { %v1553_v34 = vpop.f32.mrb[110].mxu0  ;;  %v9587_v37 = vadd.f32 %v7531_v18, %v7530_v29  ;;  %v7533_v0 = vpop.f32.mrb[154].mxu1  ;;  %2765 = vmatprep.mubr.bf16.mxu1 %v8732_v27  ;;  %v8744_v27 = vld [vmem:[#allocation2 + $0x484] ss:$16 sps:$4 sm:$0xff]  }
 0x29b   :  { %v9590_v21 = vadd.f32 %v9510_v47, %v1553_v34  ;;  %v7941_v41 = vpop.f32.mrb[111].mxu0  ;;  %v7534_v40 = vpop.f32.mrb[155].mxu1 }
 0x29c   :  { %v9592_v42 = vadd.f32 %v7534_v40, %v7533_v0 }
 0x2a0   :  { %v1558_v45 = vpop.f32.mrb[112].mxu0  ;;  %v7536_v25 = vpop.f32.mrb[156].mxu1 }
 0x2a1   :  { %v9595_v48 = vadd.f32 %v9514_v49, %v1558_v45  ;;  %v7944_v44 = vpop.f32.mrb[113].mxu0  ;;  %v7537_v52 = vpop.f32.mrb[157].mxu1 }
 0x2a2   :  { %v1561_v54 = vpop.f32.mrb[114].mxu0  ;;  %v9597_v28 = vadd.f32 %v7537_v52, %v7536_v25  ;;  %v7539_v58 = vpop.f32.mrb[158].mxu1 }
 0x2a3   :  { %v9600_v47 = vadd.f32 %v9516_v51, %v1561_v54  ;;  %v7945_v31 = vpop.f32.mrb[115].mxu0  ;;  %v7540_v6 = vpop.f32.mrb[159].mxu1  ;;  %v8734_v51 = vld [vmem:[#allocation2 + $0x440] ss:$16 sps:$4 sm:$0xff]   ;;  %v8738_v54 = vld [vmem:[#allocation2 + $0x464] ss:$16 sps:$4 sm:$0xff]  }
 0x2a4   :  { %v9602_v8 = vadd.f32 %v7540_v6, %v7539_v58  ;;  %2766 = vmatmul.mubr.bf16.gmra.mrb[180].mxu1 %v8734_v51 }
 0x2a5   :  { %2773 = vmatprep.mubr.bf16.mxu1 %v8738_v54 }
 0x2a8   :  { %v1566_v10 = vpop.f32.mrb[116].mxu0  ;;  %v7542_v49 = vpop.f32.mrb[160].mxu1 }
 0x2a9   :  { %v9605_v1 = vadd.f32 %v9518_v53, %v1566_v10  ;;  %v7948_v12 = vpop.f32.mrb[117].mxu0  ;;  %v7543_v14 = vpop.f32.mrb[161].mxu1 }
 0x2aa   :  { %v1569_v19 = vpop.f32.mrb[118].mxu0  ;;  %v9607_v36 = vadd.f32 %v7543_v14, %v7542_v49  ;;  %v7545_v24 = vpop.f32.mrb[162].mxu1 }
 0x2ab   :  { %v9610_v29 = vadd.f32 %v9520_v55, %v1569_v19  ;;  %v7949_v38 = vpop.f32.mrb[119].mxu0  ;;  %v7546_v18 = vpop.f32.mrb[163].mxu1  ;;  %v8740_v55 = vld [vmem:[#allocation2 + $0x460] ss:$16 sps:$4 sm:$0xff]  }
 0x2ac   :  { %v9612_v34 = vadd.f32 %v7546_v18, %v7545_v24  ;;  %2774 = vmatmul.mubr.bf16.gmra.mrb[184].mxu1 %v8740_v55 }
 0x2ad   :  { %2781 = vmatprep.mubr.bf16.mxu1 %v8744_v27  ;;  %v8756_v27 = vld [vmem:[#allocation2 + $0x4c4] ss:$16 sps:$4 sm:$0xff]  }
 0x2b0   :  { %v1574_v0 = vpop.f32.mrb[120].mxu0  ;;  %v7548_v53 = vpop.f32.mrb[164].mxu1 }
 0x2b1   :  { %v9615_v41 = vadd.f32 %v9522_v57, %v1574_v0  ;;  %v7952_v40 = vpop.f32.mrb[121].mxu0  ;;  %v7549_v45 = vpop.f32.mrb[165].mxu1 }
 0x2b2   :  { %v1577_v25 = vpop.f32.mrb[122].mxu0  ;;  %v9617_v44 = vadd.f32 %v7549_v45, %v7548_v53  ;;  %v7551_v52 = vpop.f32.mrb[166].mxu1 }
 0x2b3   :  { %v9620_v58 = vadd.f32 %v9524_v59, %v1577_v25  ;;  %v7953_v60 = vpop.f32.mrb[123].mxu0  ;;  %v7552_v2 = vpop.f32.mrb[167].mxu1  ;;  %v8746_v59 = vld [vmem:[#allocation2 + $0x480] ss:$16 sps:$4 sm:$0xff]  }
 0x2b4   :  { %v9622_v31 = vadd.f32 %v7552_v2, %v7551_v52  ;;  %2782 = vmatmul.mubr.bf16.gmra.mrb[188].mxu1 %v8746_v59  ;;  %v8750_v60 = vld [vmem:[#allocation2 + $0x4a4] ss:$16 sps:$4 sm:$0xff]   ;;  %v8758_v59 = vld [vmem:[#allocation2 + $0x4c0] ss:$16 sps:$4 sm:$0xff]  }
 0x2b5   :  { %2789 = vmatprep.mubr.bf16.mxu1 %v8750_v60  ;;  %v8762_v60 = vld [vmem:[#allocation2 + $0x4e4] ss:$16 sps:$4 sm:$0xff]  }
 0x2b8   :  { %v1582_v6 = vpop.f32.mrb[124].mxu0  ;;  %v7554_v57 = vpop.f32.mrb[168].mxu1 }
 0x2b9   :  { %v9625_v10 = vadd.f32 %v9526_v61, %v1582_v6  ;;  %v7956_v49 = vpop.f32.mrb[125].mxu0  ;;  %v7555_v12 = vpop.f32.mrb[169].mxu1 }
 0x2ba   :  { %v1585_v14 = vpop.f32.mrb[126].mxu0  ;;  %v9627_v19 = vadd.f32 %v7555_v12, %v7554_v57  ;;  %v7557_v24 = vpop.f32.mrb[170].mxu1 }
 0x2bb   :  { %v9630_v51 = vadd.f32 %v9528_v63, %v1585_v14  ;;  %v7957_v38 = vpop.f32.mrb[127].mxu0  ;;  %v7558_v18 = vpop.f32.mrb[171].mxu1  ;;  %v8752_v63 = vld [vmem:[#allocation2 + $0x4a0] ss:$16 sps:$4 sm:$0xff]  }
 0x2bc   :  { %v9632_v0 = vadd.f32 %v7558_v18, %v7557_v24  ;;  %2790 = vmatmul.mubr.bf16.gmra.mrb[192].mxu1 %v8752_v63  ;;  %v8764_v63 = vld [vmem:[#allocation2 + $0x4e0] ss:$16 sps:$4 sm:$0xff]  }
 0x2bd   :  { %2797 = vmatprep.mubr.bf16.mxu1 %v8756_v27 }
 0x2c0   :  { %v1590_v53 = vpop.f32.mrb[128].mxu0  ;;  %v7560_v61 = vpop.f32.mrb[172].mxu1 }
 0x2c1   :  { %v9635_v40 = vadd.f32 %v9530_v3, %v1590_v53  ;;  %v7960_v45 = vpop.f32.mrb[129].mxu0  ;;  %v7561_v25 = vpop.f32.mrb[173].mxu1 }
 0x2c2   :  { %v1593_v52 = vpop.f32.mrb[130].mxu0  ;;  %v9637_v54 = vadd.f32 %v7561_v25, %v7560_v61  ;;  %v7563_v55 = vpop.f32.mrb[174].mxu1 }
 0x2c3   :  { %v9640_v2 = vadd.f32 %v9532_v5, %v1593_v52  ;;  %v7961_v6 = vpop.f32.mrb[131].mxu0  ;;  %v7564_v57 = vpop.f32.mrb[175].mxu1 }
 0x2c4   :  { %v9642_v49 = vadd.f32 %v7564_v57, %v7563_v55  ;;  %2798 = vmatmul.mubr.bf16.gmra.mrb[196].mxu1 %v8758_v59  ;;  %v8981_v57 = vld [vmem:[%s9065_s5 + $0x80] sm:$0xff]   ;;  %v8984_v59 = vld [vmem:[%s9065_s5 + $0xd0] sm:$0xff]  }
 0x2c5   :  { %2805 = vmatprep.mubr.bf16.mxu1 %v8762_v60  ;;  %v8987_v60 = vld [vmem:[%s9065_s5 + $0x98] sm:$0xff]  }
 0x2c8   :  { %v7418_v12 = vpop.f32.mrb[132].mxu0 }
 0x2c9   :  { %v7419_v3 = vpop.f32.mrb[133].mxu0 }
 0x2ca   :  { %v7420_v14 = vadd.f32 %v7419_v3, %v7418_v12  ;;  %v7421_v24 = vpop.f32.mrb[134].mxu0  ;;  %v8982_v12 = vld [vmem:[%s9065_s5 + $0xc8] sm:$0xff]  }
 0x2cb   :  { %v7422_v38 = vpop.f32.mrb[135].mxu0 }
 0x2cc   :  { %v2178_v18 = vadd.f32 %v9537_v13, %v7420_v14  ;;  %v7423_v53 = vadd.f32 %v7422_v38, %v7421_v24  ;;  %2806 = vmatmul.mubr.bf16.gmra.mrb[200].mxu1 %v8764_v63  ;;  %v8983_v14 = vld [vmem:[%s9065_s5 + $0x88] sm:$0xff]  }
 0x2ce   :  { %v2181_v5 = vadd.f32 %v9542_v20, %v7423_v53 }
 0x2d0   :  { %v2264_v61 = vpack.c.bf16 %v2181_v5, %v2178_v18  ;;  %v7424_v45 = vpop.f32.mrb[136].mxu0  ;;  %v8770_v5 = vld [vmem:[#allocation2 + $0x500] ss:$16 sps:$4 sm:$0xff]  }
 0x2d1   :  { %v7425_v25 = vpop.f32.mrb[137].mxu0 }
 0x2d2   :  { %v7426_v52 = vadd.f32 %v7425_v25, %v7424_v45  ;;  %v7427_v55 = vpop.f32.mrb[138].mxu0  ;;  %8011 = vmatmul.mubr.msk.bf16.vlgmr.msra.gmra.mrb[176].mxu0 %vm1442_vm1, %v2264_v61 }
 0x2d3   :  { %v7428_v6 = vpop.f32.mrb[139].mxu0  ;;  %7661 = vmatpush3.bf16.msra.mxu0 %v8981_v57  ;;  %8014 = vmatprep.mubr.msk.bf16.mxu0 %vm9054_vm0, %v9053_v22  ;;  %v8988_v57 = vld [vmem:[%s9065_s5 + $0xe0] sm:$0xff]  }
 0x2d4   :  { %v2186_v13 = vadd.f32 %v9547_v30, %v7426_v52  ;;  %v7429_v20 = vadd.f32 %v7428_v6, %v7427_v55  ;;  %7662 = vmatprep.subr.bf16.mxu0 %v8982_v12  ;;  %v8768_v30 = vld [vmem:[#allocation2 + $0x504] ss:$16 sps:$4 sm:$0xff]   ;;  %v8986_v52 = vld [vmem:[%s9065_s5 + $0xd8] sm:$0xff]  }
 0x2d5   :  { %2813 = vmatprep.mubr.bf16.mxu1 %v8768_v30 }
 0x2d6   :  { %v2189_v3 = vadd.f32 %v9552_v35, %v7429_v20  ;;  %v8985_v35 = vld [vmem:[%s9065_s5 + $0x90] sm:$0xff]   ;;  %2814 = vmatmul.mubr.bf16.gmra.mrb[204].mxu1 %v8770_v5 }
 0x2d7   :  { %7663 = vmatpush3.bf16.msra.mxu0 %v8983_v14  ;;  %v8992_v5 = vld [vmem:[%s9065_s5 + $0xf0] sm:$0xff]  }
 0x2d8   :  { %v2265_v24 = vpack.c.bf16 %v2189_v3, %v2186_v13  ;;  %v7430_v27 = vpop.f32.mrb[140].mxu0  ;;  %7664 = vmatprep.subr.bf16.mxu0 %v8984_v59  ;;  %v8776_v3 = vld [vmem:[#allocation2 + $0x520] ss:$16 sps:$4 sm:$0xff]   ;;  %v8990_v59 = vld [vmem:[%s9065_s5 + $0xe8] sm:$0xff]  }
 0x2d9   :  { %v7431_v38 = vpop.f32.mrb[141].mxu0 }
 0x2da   :  { %v7432_v18 = vadd.f32 %v7431_v38, %v7430_v27  ;;  %v7433_v53 = vpop.f32.mrb[142].mxu0  ;;  %8015 = vmatmul.mubr.msk.bf16.gmra.mrb[180].mxu0 %vm1442_vm1, %v2265_v24 }
 0x2db   :  { %v7434_v61 = vpop.f32.mrb[143].mxu0  ;;  %8018 = vmatprep.mubr.msk.bf16.mxu0 %vm9054_vm0, %v9053_v22  ;;  %7665 = vmatpush3.bf16.msra.mxu0 %v8985_v35 }
 0x2dc   :  { %v2194_v45 = vadd.f32 %v9557_v43, %v7432_v18  ;;  %v7435_v25 = vadd.f32 %v7434_v61, %v7433_v53  ;;  %7666 = vmatprep.subr.bf16.mxu0 %v8986_v52  ;;  %v8774_v43 = vld [vmem:[#allocation2 + $0x524] ss:$16 sps:$4 sm:$0xff]   ;;  %v8991_v18 = vld [vmem:[%s9065_s5 + $0xa8] sm:$0xff]  }
 0x2dd   :  { %2821 = vmatprep.mubr.bf16.mxu1 %v8774_v43 }
 0x2de   :  { %v2197_v55 = vadd.f32 %v9562_v50, %v7435_v25  ;;  %v8989_v50 = vld [vmem:[%s9065_s5 + $0xa0] sm:$0xff]   ;;  %2822 = vmatmul.mubr.bf16.gmra.mrb[208].mxu1 %v8776_v3 }
 0x2df   :  { %7667 = vmatpush3.bf16.msra.mxu0 %v8987_v60  ;;  %v8782_v25 = vld [vmem:[#allocation2 + $0x540] ss:$16 sps:$4 sm:$0xff]  }
 0x2e0   :  { %v2266_v63 = vpack.c.bf16 %v2197_v55, %v2194_v45  ;;  %v7436_v6 = vpop.f32.mrb[144].mxu0  ;;  %7668 = vmatprep.subr.bf16.mxu0 %v8988_v57  ;;  %v8995_v57 = vld [vmem:[%s9065_s5 + $0xb8] sm:$0xff]  }
 0x2e1   :  { %v7437_v13 = vpop.f32.mrb[145].mxu0 }
 0x2e2   :  { %v7438_v20 = vadd.f32 %v7437_v13, %v7436_v6  ;;  %v7439_v12 = vpop.f32.mrb[146].mxu0  ;;  %8019 = vmatmul.mubr.msk.bf16.gmra.mrb[184].mxu0 %vm1442_vm1, %v2266_v63  ;;  %v8994_v63 = vld [vmem:[%s9065_s5 + $0xf8] sm:$0xff]  }
 0x2e3   :  { %v7440_v14 = vpop.f32.mrb[147].mxu0  ;;  %8022 = vmatprep.mubr.msk.bf16.mxu0 %vm9054_vm0, %v9053_v22  ;;  %7669 = vmatpush3.bf16.msra.mxu0 %v8989_v50  ;;  %v8788_v50 = vld [vmem:[#allocation2 + $0x560] ss:$16 sps:$4 sm:$0xff]  }
 0x2e4   :  { %v2202_v24 = vadd.f32 %v9567_v62, %v7438_v20  ;;  %v7441_v27 = vadd.f32 %v7440_v14, %v7439_v12  ;;  %7670 = vmatprep.subr.bf16.mxu0 %v8990_v59  ;;  %v8780_v62 = vld [vmem:[#allocation2 + $0x544] ss:$16 sps:$4 sm:$0xff]  }
 0x2e5   :  { %2829 = vmatprep.mubr.bf16.mxu1 %v8780_v62  ;;  %v8786_v14 = vld [vmem:[#allocation2 + $0x564] ss:$16 sps:$4 sm:$0xff]  }
 0x2e6   :  { %v2205_v38 = vadd.f32 %v9572_v7, %v7441_v27  ;;  %v8993_v7 = vld [vmem:[%s9065_s5 + $0xb0] sm:$0xff]   ;;  %2830 = vmatmul.mubr.bf16.gmra.mrb[212].mxu1 %v8782_v25  ;;  %s10376_s5 = sld [smem:[#allocation6_spill]] }
 0x2e7   :  { %7671 = vmatpush3.bf16.msra.mxu0 %v8991_v18  ;;  %2837 = vmatprep.mubr.bf16.mxu1 %v8786_v14 }
 0x2e8   :  { %v2267_v53 = vpack.c.bf16 %v2205_v38, %v2202_v24  ;;  %v7442_v30 = vpop.f32.mrb[148].mxu0  ;;  %7672 = vmatprep.subr.bf16.mxu0 %v8992_v5 }
 0x2e9   :  { %v7443_v61 = vpop.f32.mrb[149].mxu0 }
 0x2ea   :  { %v7444_v35 = vadd.f32 %v7443_v61, %v7442_v30  ;;  %v7445_v45 = vpop.f32.mrb[150].mxu0  ;;  %8023 = vmatmul.mubr.msk.bf16.gmra.mrb[188].mxu0 %vm1442_vm1, %v2267_v53 }
 0x2eb   :  { %v7446_v52 = vpop.f32.mrb[151].mxu0  ;;  %8026 = vmatprep.mubr.msk.bf16.mxu0 %vm9054_vm0, %v9053_v22  ;;  %7673 = vmatpush3.bf16.msra.mxu0 %v8993_v7 }
 0x2ec   :  { %v2210_v55 = vadd.f32 %v9577_v17, %v7444_v35  ;;  %v7447_v60 = vadd.f32 %v7446_v52, %v7445_v45  ;;  %7674 = vmatprep.subr.bf16.mxu0 %v8994_v63 }
 0x2ee   :  { %v2213_v6 = vadd.f32 %v9582_v15, %v7447_v60  ;;  %2838 = vmatmul.mubr.bf16.gmra.mrb[216].mxu1 %v8788_v50 }
 0x2ef   :  { %7675 = vmatpush3.bf16.msra.mxu0 %v8995_v57  ;;  %8056 = vmatprep.mubr.msk.bf16.mxu1 %vm9054_vm0, %v9053_v22 }
 0x2f0   :  { %v2268_v13 = vpack.c.bf16 %v2213_v6, %v2210_v55  ;;  %v7448_v20 = vpop.f32.mrb[152].mxu0 }
 0x2f1   :  { %v7449_v12 = vpop.f32.mrb[153].mxu0 }
 0x2f2   :  { %v7450_v43 = vadd.f32 %v7449_v12, %v7448_v20  ;;  %v7451_v3 = vpop.f32.mrb[154].mxu0  ;;  %8027 = vmatmul.mubr.msk.bf16.gmra.mrb[192].mxu0 %vm1442_vm1, %v2268_v13 }
 0x2f3   :  { %v7452_v24 = vpop.f32.mrb[155].mxu0  ;;  %8030 = vmatprep.mubr.msk.bf16.mxu0 %vm9054_vm0, %v9053_v22 }
 0x2f4   :  { %v2218_v17 = vadd.f32 %v9587_v37, %v7450_v43  ;;  %v7453_v27 = vadd.f32 %v7452_v24, %v7451_v3 }
 0x2f6   :  { %v2221_v15 = vadd.f32 %v9592_v42, %v7453_v27 }
 0x2f8   :  { %v2269_v59 = vpack.c.bf16 %v2221_v15, %v2218_v17  ;;  %v7454_v38 = vpop.f32.mrb[156].mxu0 }
 0x2f9   :  { %v7455_v18 = vpop.f32.mrb[157].mxu0 }
 0x2fa   :  { %v7456_v53 = vadd.f32 %v7455_v18, %v7454_v38  ;;  %v7457_v30 = vpop.f32.mrb[158].mxu0  ;;  %8031 = vmatmul.mubr.msk.bf16.gmra.mrb[196].mxu0 %vm1442_vm1, %v2269_v59 }
 0x2fb   :  { %v7458_v5 = vpop.f32.mrb[159].mxu0  ;;  %8034 = vmatprep.mubr.msk.bf16.mxu0 %vm9054_vm0, %v9053_v22 }
 0x2fc   :  { %v2226_v37 = vadd.f32 %v9597_v28, %v7456_v53  ;;  %v7459_v61 = vadd.f32 %v7458_v5, %v7457_v30 }
 0x2fe   :  { %v2229_v35 = vadd.f32 %v9602_v8, %v7459_v61  ;;  %v8731_v61 = vld [vmem:[#allocation2 + $0x42c] ss:$16 sps:$4 sm:$0xff]  }
 0x300   :  { %v2270_v42 = vpack.c.bf16 %v2229_v35, %v2226_v37  ;;  %v7460_v45 = vpop.f32.mrb[160].mxu0 }
 0x301   :  { %v7461_v62 = vpop.f32.mrb[161].mxu0 }
 0x302   :  { %v7462_v25 = vadd.f32 %v7461_v62, %v7460_v45  ;;  %v7463_v52 = vpop.f32.mrb[162].mxu0  ;;  %8035 = vmatmul.mubr.msk.bf16.gmra.mrb[200].mxu0 %vm1442_vm1, %v2270_v42  ;;  %v8735_v42 = vld [vmem:[#allocation2 + $0x44c] ss:$16 sps:$4 sm:$0xff]   ;;  %v8737_v45 = vld [vmem:[#allocation2 + $0x448] ss:$16 sps:$4 sm:$0xff]  }
 0x303   :  { %v7464_v7 = vpop.f32.mrb[163].mxu0  ;;  %8038 = vmatprep.mubr.msk.bf16.mxu0 %vm9054_vm0, %v9053_v22  ;;  %v8741_v62 = vld [vmem:[#allocation2 + $0x46c] ss:$16 sps:$4 sm:$0xff]  }
 0x304   :  { %v2234_v55 = vadd.f32 %v9607_v36, %v7462_v25  ;;  %v7465_v60 = vadd.f32 %v7464_v7, %v7463_v52  ;;  %v8792_v25 = vld [vmem:[%s9080_s17 + $0x18] sm:$0xff]   ;;  %s10378_s17 = sld [smem:[#allocation5_spill]] }
 0x305   :  { %8055 = vmatpush3.bf16.msra.mxu1 %v8792_v25  ;;  %v8743_v52 = vld [vmem:[#allocation2 + $0x468] ss:$16 sps:$4 sm:$0xff]   ;;  %v8753_v7 = vld [vmem:[#allocation2 + $0x4ac] ss:$16 sps:$4 sm:$0xff]  }
 0x306   :  { %v2237_v63 = vadd.f32 %v9612_v34, %v7465_v60  ;;  %v8759_v60 = vld [vmem:[#allocation2 + $0x4cc] ss:$16 sps:$4 sm:$0xff]  }
 0x308   :  { %v2271_v28 = vpack.c.bf16 %v2237_v63, %v2234_v55  ;;  %v7466_v6 = vpop.f32.mrb[164].mxu0  ;;  %v8755_v55 = vld [vmem:[#allocation2 + $0x4a8] ss:$16 sps:$4 sm:$0xff]  }
 0x309   :  { %v7467_v57 = vpop.f32.mrb[165].mxu0  ;;  %v8761_v63 = vld [vmem:[#allocation2 + $0x4c8] ss:$16 sps:$4 sm:$0xff]  }
 0x30a   :  { %v7468_v8 = vadd.f32 %v7467_v57, %v7466_v6  ;;  %v7469_v13 = vpop.f32.mrb[166].mxu0  ;;  %8039 = vmatmul.mubr.msk.bf16.gmra.mrb[204].mxu0 %vm1442_vm1, %v2271_v28  ;;  %v8765_v28 = vld [vmem:[#allocation2 + $0x4ec] ss:$16 sps:$4 sm:$0xff]   ;;  %v8767_v6 = vld [vmem:[#allocation2 + $0x4e8] ss:$16 sps:$4 sm:$0xff]  }
 0x30b   :  { %v7470_v20 = vpop.f32.mrb[167].mxu0  ;;  %8042 = vmatprep.mubr.msk.bf16.mxu0 %vm9054_vm0, %v9053_v22  ;;  %v8771_v57 = vld [vmem:[#allocation2 + $0x50c] ss:$16 sps:$4 sm:$0xff]  }
 0x30c   :  { %v2242_v12 = vadd.f32 %v9617_v44, %v7468_v8  ;;  %v7471_v43 = vadd.f32 %v7470_v20, %v7469_v13  ;;  %v8773_v8 = vld [vmem:[#allocation2 + $0x508] ss:$16 sps:$4 sm:$0xff]   ;;  %v8777_v13 = vld [vmem:[#allocation2 + $0x52c] ss:$16 sps:$4 sm:$0xff]  }
 0x30d   :  { %v8779_v20 = vld [vmem:[#allocation2 + $0x528] ss:$16 sps:$4 sm:$0xff]  }
 0x30e   :  { %v2245_v3 = vadd.f32 %v9622_v31, %v7471_v43  ;;  %v8783_v43 = vld [vmem:[#allocation2 + $0x548] ss:$16 sps:$4 sm:$0xff]  }
 0x310   :  { %v2272_v36 = vpack.c.bf16 %v2245_v3, %v2242_v12  ;;  %v7472_v14 = vpop.f32.mrb[168].mxu0  ;;  %v8785_v12 = vld [vmem:[#allocation2 + $0x54c] ss:$16 sps:$4 sm:$0xff]  }
 0x311   :  { %v7473_v50 = vpop.f32.mrb[169].mxu0  ;;  %v8791_v3 = vld [vmem:[#allocation2 + $0x56c] ss:$16 sps:$4 sm:$0xff]  }
 0x312   :  { %v7474_v34 = vadd.f32 %v7473_v50, %v7472_v14  ;;  %v7475_v24 = vpop.f32.mrb[170].mxu0  ;;  %8043 = vmatmul.mubr.msk.bf16.gmra.mrb[208].mxu0 %vm1442_vm1, %v2272_v36  ;;  %v8789_v36 = vld [vmem:[#allocation2 + $0x568] ss:$16 sps:$4 sm:$0xff]  }
 0x313   :  { %v7476_v17 = vpop.f32.mrb[171].mxu0  ;;  %8046 = vmatprep.mubr.msk.bf16.mxu0 %vm9054_vm0, %v9053_v22 }
 0x314   :  { %v2250_v27 = vadd.f32 %v9627_v19, %v7474_v34  ;;  %v7477_v15 = vadd.f32 %v7476_v17, %v7475_v24 }
 0x316   :  { %v2253_v59 = vadd.f32 %v9632_v0, %v7477_v15  ;;  %v8729_v0 = vld [vmem:[#allocation2 + $0x428] ss:$16 sps:$4 sm:$0xff]  }
 0x318   :  { %v2273_v44 = vpack.c.bf16 %v2253_v59, %v2250_v27  ;;  %v7478_v38 = vpop.f32.mrb[172].mxu0 }
 0x319   :  { %v7479_v18 = vpop.f32.mrb[173].mxu0 }
 0x31a   :  { %v7480_v31 = vadd.f32 %v7479_v18, %v7478_v38  ;;  %v7481_v53 = vpop.f32.mrb[174].mxu0  ;;  %8047 = vmatmul.mubr.msk.bf16.gmra.mrb[212].mxu0 %vm1442_vm1, %v2273_v44 }
 0x31b   :  { %v7482_v30 = vpop.f32.mrb[175].mxu0  ;;  %8050 = vmatprep.mubr.msk.bf16.mxu0 %vm9054_vm0, %v9053_v22 }
 0x31c   :  { %v2258_v5 = vadd.f32 %v9637_v54, %v7480_v31  ;;  %v7483_v37 = vadd.f32 %v7482_v30, %v7481_v53  ;;  %v8747_v54 = vld [vmem:[#allocation2 + $0x48c] ss:$16 sps:$4 sm:$0xff]  }
 0x31e   :  { %v2261_v19 = vadd.f32 %v9642_v49, %v7483_v37  ;;  %v8749_v49 = vld [vmem:[#allocation2 + $0x488] ss:$16 sps:$4 sm:$0xff]  }
 0x320   :  { %v2274_v35 = vpack.c.bf16 %v2261_v19, %v2258_v5 }
 0x322   :  { %8051 = vmatmul.mubr.msk.bf16.gmra.mrb[216].mxu0 %vm1442_vm1, %v2274_v35 }
 0x323   :  { %2878 = vmatprep.mubr.bf16.mxu0 %v8731_v61 }
 0x32a   :  { %2879 = vmatmul.mubr.bf16.vlgmr.msra.gmra.mrb[220].mxu0 %v8729_v0 }
 0x32b   :  { %2886 = vmatprep.mubr.bf16.mxu0 %v8735_v42 }
 0x332   :  { %2887 = vmatmul.mubr.bf16.gmra.mrb[224].mxu0 %v8737_v45 }
 0x333   :  { %2894 = vmatprep.mubr.bf16.mxu0 %v8741_v62 }
 0x33a   :  { %2895 = vmatmul.mubr.bf16.gmra.mrb[228].mxu0 %v8743_v52 }
 0x33b   :  { %2902 = vmatprep.mubr.bf16.mxu0 %v8747_v54 }
 0x342   :  { %2903 = vmatmul.mubr.bf16.gmra.mrb[232].mxu0 %v8749_v49 }
 0x343   :  { %2910 = vmatprep.mubr.bf16.mxu0 %v8753_v7 }
 0x34a   :  { %2911 = vmatmul.mubr.bf16.gmra.mrb[236].mxu0 %v8755_v55 }
 0x34b   :  { %2918 = vmatprep.mubr.bf16.mxu0 %v8759_v60 }
 0x352   :  { %2919 = vmatmul.mubr.bf16.gmra.mrb[240].mxu0 %v8761_v63 }
 0x353   :  { %2926 = vmatprep.mubr.bf16.mxu0 %v8765_v28 }
 0x35a   :  { %2927 = vmatmul.mubr.bf16.gmra.mrb[244].mxu0 %v8767_v6 }
 0x35b   :  { %2934 = vmatprep.mubr.bf16.mxu0 %v8771_v57 }
 0x361   :  { %v7594_v14 = vpop.f32.mrb[176].mxu1 }
 0x362   :  { %2935 = vmatmul.mubr.bf16.gmra.mrb[248].mxu0 %v8773_v8  ;;  %v7595_v50 = vpop.f32.mrb[177].mxu1 }
 0x363   :  { %2942 = vmatprep.mubr.bf16.mxu0 %v8777_v13  ;;  %v9715_v34 = vadd.f32 %v7595_v50, %v7594_v14  ;;  %v7597_v24 = vpop.f32.mrb[178].mxu1 }
 0x364   :  { %v7598_v17 = vpop.f32.mrb[179].mxu1 }
 0x365   :  { %v9717_v27 = vadd.f32 %v7598_v17, %v7597_v24 }
 0x36a   :  { %2943 = vmatmul.mubr.bf16.gmra.mrb[252].mxu0 %v8779_v20 }
 0x36b   :  { %2950 = vmatprep.mubr.bf16.mxu0 %v8785_v12 }
 0x372   :  { %2951 = vmatmul.mubr.bf16.gmra.mrb[0].mxu0 %v8783_v43 }
 0x373   :  { %2958 = vmatprep.mubr.bf16.mxu0 %v8791_v3 }
 0x377   :  { %v7600_v15 = vpop.f32.mrb[180].mxu1 }
 0x378   :  { %v7601_v59 = vpop.f32.mrb[181].mxu1 }
 0x379   :  { %v7603_v44 = vpop.f32.mrb[182].mxu1  ;;  %v9719_v38 = vadd.f32 %v7601_v59, %v7600_v15 }
 0x37a   :  { %2959 = vmatmul.mubr.bf16.gmra.mrb[4].mxu0 %v8789_v36  ;;  %v7604_v18 = vpop.f32.mrb[183].mxu1 }
 0x37b   :  { %v9721_v31 = vadd.f32 %v7604_v18, %v7603_v44 }
 0x37f   :  { %v7606_v53 = vpop.f32.mrb[184].mxu1 }
 0x380   :  { %v7607_v30 = vpop.f32.mrb[185].mxu1 }
 0x381   :  { %v7609_v5 = vpop.f32.mrb[186].mxu1  ;;  %v9723_v37 = vadd.f32 %v7607_v30, %v7606_v53 }
 0x382   :  { %v7610_v19 = vpop.f32.mrb[187].mxu1 }
 0x383   :  { %v9725_v61 = vadd.f32 %v7610_v19, %v7609_v5 }
 0x387   :  { %v7612_v35 = vpop.f32.mrb[188].mxu1 }
 0x388   :  { %v7613_v0 = vpop.f32.mrb[189].mxu1 }
 0x389   :  { %v7615_v42 = vpop.f32.mrb[190].mxu1  ;;  %v9727_v45 = vadd.f32 %v7613_v0, %v7612_v35 }
 0x38a   :  { %v7616_v62 = vpop.f32.mrb[191].mxu1 }
 0x38b   :  { %v9729_v25 = vadd.f32 %v7616_v62, %v7615_v42 }
 0x38f   :  { %v7618_v52 = vpop.f32.mrb[192].mxu1 }
 0x390   :  { %v7619_v54 = vpop.f32.mrb[193].mxu1 }
 0x391   :  { %v7621_v49 = vpop.f32.mrb[194].mxu1  ;;  %v9731_v7 = vadd.f32 %v7619_v54, %v7618_v52 }
 0x392   :  { %v7622_v55 = vpop.f32.mrb[195].mxu1 }
 0x393   :  { %v9733_v60 = vadd.f32 %v7622_v55, %v7621_v49 }
 0x397   :  { %v7624_v63 = vpop.f32.mrb[196].mxu1 }
 0x398   :  { %v7625_v28 = vpop.f32.mrb[197].mxu1 }
 0x399   :  { %v7627_v6 = vpop.f32.mrb[198].mxu1  ;;  %v9735_v8 = vadd.f32 %v7625_v28, %v7624_v63 }
 0x39a   :  { %v7628_v13 = vpop.f32.mrb[199].mxu1 }
 0x39b   :  { %v9740_v43 = vadd.f32 %v7628_v13, %v7627_v6 }
 0x39f   :  { %v7630_v50 = vpop.f32.mrb[200].mxu1 }
 0x3a0   :  { %v7631_v24 = vpop.f32.mrb[201].mxu1 }
 0x3a1   :  { %v7633_v17 = vpop.f32.mrb[202].mxu1  ;;  %v9745_v59 = vadd.f32 %v7631_v24, %v7630_v50 }
 0x3a2   :  { %v7634_v44 = vpop.f32.mrb[203].mxu1 }
 0x3a3   :  { %v9750_v53 = vadd.f32 %v7634_v44, %v7633_v17 }
 0x3a5   :  { %v2351_v57 = vpop.f32.mrb[176].mxu0 }
 0x3a6   :  { %v9738_v20 = vadd.f32 %v2351_v57, %v9535_v9  ;;  %v8012_v12 = vpop.f32.mrb[177].mxu0 }
 0x3a7   :  { %v2354_v3 = vpop.f32.mrb[178].mxu0 }
 0x3a8   :  { %v9743_v36 = vadd.f32 %v2354_v3, %v9540_v16  ;;  %v8013_v14 = vpop.f32.mrb[179].mxu0 }
 0x3a9   :  { %v7636_v19 = vpop.f32.mrb[204].mxu1 }
 0x3aa   :  { %v7637_v35 = vpop.f32.mrb[205].mxu1 }
 0x3ab   :  { %v7639_v0 = vpop.f32.mrb[206].mxu1  ;;  %v9755_v62 = vadd.f32 %v7637_v35, %v7636_v19 }
 0x3ac   :  { %v7640_v52 = vpop.f32.mrb[207].mxu1 }
 0x3ad   :  { %v2359_v15 = vpop.f32.mrb[180].mxu0  ;;  %v9760_v49 = vadd.f32 %v7640_v52, %v7639_v0 }
 0x3ae   :  { %v9748_v18 = vadd.f32 %v2359_v15, %v9545_v26  ;;  %v8016_v9 = vpop.f32.mrb[181].mxu0 }
 0x3af   :  { %v2362_v30 = vpop.f32.mrb[182].mxu0 }
 0x3b0   :  { %v9753_v5 = vadd.f32 %v2362_v30, %v9550_v33  ;;  %v8017_v16 = vpop.f32.mrb[183].mxu0 }
 0x3b1   :  { %v7642_v28 = vpop.f32.mrb[208].mxu1 }
 0x3b2   :  { %v7643_v6 = vpop.f32.mrb[209].mxu1 }
 0x3b3   :  { %v7645_v57 = vpop.f32.mrb[210].mxu1  ;;  %v9765_v12 = vadd.f32 %v7643_v6, %v7642_v28 }
 0x3b4   :  { %v7646_v3 = vpop.f32.mrb[211].mxu1 }
 0x3b5   :  { %v2367_v42 = vpop.f32.mrb[184].mxu0  ;;  %v9770_v50 = vadd.f32 %v7646_v3, %v7645_v57 }
 0x3b6   :  { %v9758_v54 = vadd.f32 %v2367_v42, %v9555_v39  ;;  %v8020_v26 = vpop.f32.mrb[185].mxu0 }
 0x3b7   :  { %v2370_v55 = vpop.f32.mrb[186].mxu0 }
 0x3b8   :  { %v9763_v63 = vadd.f32 %v2370_v55, %v9560_v46  ;;  %v8021_v33 = vpop.f32.mrb[187].mxu0 }
 0x3b9   :  { %v7648_v15 = vpop.f32.mrb[212].mxu1 }
 0x3ba   :  { %v7649_v44 = vpop.f32.mrb[213].mxu1 }
 0x3bb   :  { %v7651_v9 = vpop.f32.mrb[214].mxu1  ;;  %v9775_v16 = vadd.f32 %v7649_v44, %v7648_v15 }
 0x3bc   :  { %v7652_v19 = vpop.f32.mrb[215].mxu1 }
 0x3bd   :  { %v2375_v13 = vpop.f32.mrb[188].mxu0  ;;  %v9780_v0 = vadd.f32 %v7652_v19, %v7651_v9 }
 0x3be   :  { %v9768_v14 = vadd.f32 %v2375_v13, %v9565_v56  ;;  %v8024_v39 = vpop.f32.mrb[189].mxu0 }
 0x3bf   :  { %v2378_v24 = vpop.f32.mrb[190].mxu0 }
 0x3c0   :  { %v9773_v17 = vadd.f32 %v2378_v24, %v9570_v4  ;;  %v8025_v46 = vpop.f32.mrb[191].mxu0 }
 0x3c1   :  { %v7654_v26 = vpop.f32.mrb[216].mxu1 }
 0x3c2   :  { %v7655_v55 = vpop.f32.mrb[217].mxu1 }
 0x3c3   :  { %v7657_v33 = vpop.f32.mrb[218].mxu1  ;;  %v9785_v6 = vadd.f32 %v7655_v55, %v7654_v26 }
 0x3c4   :  { %v7658_v57 = vpop.f32.mrb[219].mxu1 }
 0x3c5   :  { %v2383_v30 = vpop.f32.mrb[192].mxu0  ;;  %v9790_v3 = vadd.f32 %v7658_v57, %v7657_v33 }
 0x3c6   :  { %v9778_v35 = vadd.f32 %v2383_v30, %v9575_v11  ;;  %v8028_v56 = vpop.f32.mrb[193].mxu0 }
 0x3c7   :  { %v2386_v42 = vpop.f32.mrb[194].mxu0 }
 0x3c8   :  { %v9783_v52 = vadd.f32 %v2386_v42, %v9580_v23  ;;  %v8029_v4 = vpop.f32.mrb[195].mxu0 }
 0x3cd   :  { %v2391_v28 = vpop.f32.mrb[196].mxu0 }
 0x3ce   :  { %v9788_v13 = vadd.f32 %v2391_v28, %v9585_v32  ;;  %v8032_v11 = vpop.f32.mrb[197].mxu0 }
 0x3cf   :  { %v2394_v39 = vpop.f32.mrb[198].mxu0 }
 0x3d0   :  { %v9793_v24 = vadd.f32 %v2394_v39, %v9590_v21  ;;  %v8033_v23 = vpop.f32.mrb[199].mxu0 }
 0x3d5   :  { %v2399_v46 = vpop.f32.mrb[200].mxu0 }
 0x3d6   :  { %v9796_v15 = vadd.f32 %v2399_v46, %v9595_v48  ;;  %v8036_v44 = vpop.f32.mrb[201].mxu0 }
 0x3d7   :  { %v2402_v9 = vpop.f32.mrb[202].mxu0 }
 0x3d8   :  { %v9799_v30 = vadd.f32 %v2402_v9, %v9600_v47  ;;  %v8037_v19 = vpop.f32.mrb[203].mxu0 }
 0x3dd   :  { %v2407_v32 = vpop.f32.mrb[204].mxu0 }
 0x3de   :  { %v9802_v56 = vadd.f32 %v2407_v32, %v9605_v1  ;;  %v8040_v42 = vpop.f32.mrb[205].mxu0 }
 0x3df   :  { %v2410_v4 = vpop.f32.mrb[206].mxu0 }
 0x3e0   :  { %v9805_v21 = vadd.f32 %v2410_v4, %v9610_v29  ;;  %v8041_v26 = vpop.f32.mrb[207].mxu0 }
 0x3e5   :  { %v2415_v55 = vpop.f32.mrb[208].mxu0 }
 0x3e6   :  { %v9808_v48 = vadd.f32 %v2415_v55, %v9615_v41  ;;  %v8044_v33 = vpop.f32.mrb[209].mxu0 }
 0x3e7   :  { %v2418_v28 = vpop.f32.mrb[210].mxu0 }
 0x3e8   :  { %v9811_v47 = vadd.f32 %v2418_v28, %v9620_v58  ;;  %v8045_v57 = vpop.f32.mrb[211].mxu0 }
 0x3ed   :  { %v2423_v11 = vpop.f32.mrb[212].mxu0 }
 0x3ee   :  { %v9814_v1 = vadd.f32 %v2423_v11, %v9625_v10  ;;  %v8048_v39 = vpop.f32.mrb[213].mxu0 }
 0x3ef   :  { %v2426_v23 = vpop.f32.mrb[214].mxu0 }
 0x3f0   :  { %v9817_v29 = vadd.f32 %v2426_v23, %v9630_v51  ;;  %v8049_v46 = vpop.f32.mrb[215].mxu0 }
 0x3f5   :  { %v2431_v44 = vpop.f32.mrb[216].mxu0 }
 0x3f6   :  { %v9820_v41 = vadd.f32 %v2431_v44, %v9635_v40  ;;  %v8052_v9 = vpop.f32.mrb[217].mxu0 }
 0x3f7   :  { %v2434_v19 = vpop.f32.mrb[218].mxu0 }
 0x3f8   :  { %v9823_v58 = vadd.f32 %v2434_v19, %v9640_v2  ;;  %v8053_v32 = vpop.f32.mrb[219].mxu0 }
 0x3fd   :  { %v7676_v42 = vpop.f32.mrb[220].mxu0 }
 0x3fe   :  { %v7677_v4 = vpop.f32.mrb[221].mxu0 }
 0x3ff   :  { %v7678_v10 = vadd.f32 %v7677_v4, %v7676_v42  ;;  %v7679_v26 = vpop.f32.mrb[222].mxu0 }
 0x400   :  { %v7680_v55 = vpop.f32.mrb[223].mxu0 }
 0x401   :  { %v2881_v33 = vadd.f32 %v7678_v10, %v9715_v34  ;;  %v7681_v51 = vadd.f32 %v7680_v55, %v7679_v26 }
 0x403   :  { %v2884_v28 = vadd.f32 %v7681_v51, %v9717_v27 }
 0x405   :  { %v2967_v57 = vpack.c.bf16 %v2884_v28, %v2881_v33  ;;  %v7682_v11 = vpop.f32.mrb[224].mxu0 }
 0x406   :  { %v7683_v40 = vpop.f32.mrb[225].mxu0 }
 0x407   :  { %v7684_v39 = vadd.f32 %v7683_v40, %v7682_v11  ;;  %v7685_v23 = vpop.f32.mrb[226].mxu0  ;;  %8057 = vmatmul.mubr.msk.bf16.vlgmr.msra.gmra.mrb[220].mxu1 %vm1442_vm1, %v2967_v57 }
 0x408   :  { %v7686_v2 = vpop.f32.mrb[227].mxu0  ;;  %8060 = vmatprep.mubr.msk.bf16.mxu1 %vm9054_vm0, %v9053_v22 }
 0x409   :  { %v2889_v46 = vadd.f32 %v7684_v39, %v9719_v38  ;;  %v7687_v44 = vadd.f32 %v7686_v2, %v7685_v23 }
 0x40b   :  { %v2892_v9 = vadd.f32 %v7687_v44, %v9721_v31 }
 0x40d   :  { %v2968_v34 = vpack.c.bf16 %v2892_v9, %v2889_v46  ;;  %v7688_v19 = vpop.f32.mrb[228].mxu0 }
 0x40e   :  { %v7689_v32 = vpop.f32.mrb[229].mxu0 }
 0x40f   :  { %v7690_v27 = vadd.f32 %v7689_v32, %v7688_v19  ;;  %v7691_v42 = vpop.f32.mrb[230].mxu0  ;;  %8061 = vmatmul.mubr.msk.bf16.gmra.mrb[224].mxu1 %vm1442_vm1, %v2968_v34 }
 0x410   :  { %v7692_v4 = vpop.f32.mrb[231].mxu0  ;;  %8064 = vmatprep.mubr.msk.bf16.mxu1 %vm9054_vm0, %v9053_v22 }
 0x411   :  { %v2897_v10 = vadd.f32 %v7690_v27, %v9723_v37  ;;  %v7693_v26 = vadd.f32 %v7692_v4, %v7691_v42 }
 0x413   :  { %v2900_v55 = vadd.f32 %v7693_v26, %v9725_v61 }
 0x415   :  { %v2969_v38 = vpack.c.bf16 %v2900_v55, %v2897_v10  ;;  %v7694_v33 = vpop.f32.mrb[232].mxu0 }
 0x416   :  { %v7695_v51 = vpop.f32.mrb[233].mxu0 }
 0x417   :  { %v7696_v31 = vadd.f32 %v7695_v51, %v7694_v33  ;;  %v7697_v28 = vpop.f32.mrb[234].mxu0  ;;  %8065 = vmatmul.mubr.msk.bf16.gmra.mrb[228].mxu1 %vm1442_vm1, %v2969_v38 }
 0x418   :  { %v7698_v57 = vpop.f32.mrb[235].mxu0  ;;  %8068 = vmatprep.mubr.msk.bf16.mxu1 %vm9054_vm0, %v9053_v22 }
 0x419   :  { %v2905_v11 = vadd.f32 %v7696_v31, %v9727_v45  ;;  %v7699_v40 = vadd.f32 %v7698_v57, %v7697_v28 }
 0x41b   :  { %v2908_v39 = vadd.f32 %v7699_v40, %v9729_v25 }
 0x41d   :  { %v2970_v37 = vpack.c.bf16 %v2908_v39, %v2905_v11  ;;  %v7700_v23 = vpop.f32.mrb[236].mxu0 }
 0x41e   :  { %v7701_v2 = vpop.f32.mrb[237].mxu0 }
 0x41f   :  { %v7702_v61 = vadd.f32 %v7701_v2, %v7700_v23  ;;  %v7703_v46 = vpop.f32.mrb[238].mxu0  ;;  %8069 = vmatmul.mubr.msk.bf16.gmra.mrb[232].mxu1 %vm1442_vm1, %v2970_v37 }
 0x420   :  { %v7704_v44 = vpop.f32.mrb[239].mxu0  ;;  %8072 = vmatprep.mubr.msk.bf16.mxu1 %vm9054_vm0, %v9053_v22 }
 0x421   :  { %v2913_v9 = vadd.f32 %v7702_v61, %v9731_v7  ;;  %v7705_v34 = vadd.f32 %v7704_v44, %v7703_v46 }
 0x423   :  { %v2916_v19 = vadd.f32 %v7705_v34, %v9733_v60 }
 0x425   :  { %v2971_v45 = vpack.c.bf16 %v2916_v19, %v2913_v9  ;;  %v7706_v32 = vpop.f32.mrb[240].mxu0 }
 0x426   :  { %v7707_v27 = vpop.f32.mrb[241].mxu0 }
 0x427   :  { %v7708_v25 = vadd.f32 %v7707_v27, %v7706_v32  ;;  %v7709_v42 = vpop.f32.mrb[242].mxu0  ;;  %8073 = vmatmul.mubr.msk.bf16.gmra.mrb[236].mxu1 %vm1442_vm1, %v2971_v45 }
 0x428   :  { %v7710_v4 = vpop.f32.mrb[243].mxu0  ;;  %8076 = vmatprep.mubr.msk.bf16.mxu1 %vm9054_vm0, %v9053_v22 }
 0x429   :  { %v2921_v10 = vadd.f32 %v7708_v25, %v9735_v8  ;;  %v7711_v26 = vadd.f32 %v7710_v4, %v7709_v42 }
 0x42b   :  { %v2924_v55 = vadd.f32 %v7711_v26, %v9740_v43 }
 0x42d   :  { %v2972_v7 = vpack.c.bf16 %v2924_v55, %v2921_v10  ;;  %v7712_v38 = vpop.f32.mrb[244].mxu0 }
 0x42e   :  { %v7713_v33 = vpop.f32.mrb[245].mxu0 }
 0x42f   :  { %v7714_v60 = vadd.f32 %v7713_v33, %v7712_v38  ;;  %v7715_v51 = vpop.f32.mrb[246].mxu0  ;;  %8077 = vmatmul.mubr.msk.bf16.gmra.mrb[240].mxu1 %vm1442_vm1, %v2972_v7 }
 0x430   :  { %v7716_v31 = vpop.f32.mrb[247].mxu0  ;;  %8080 = vmatprep.mubr.msk.bf16.mxu1 %vm9054_vm0, %v9053_v22 }
 0x431   :  { %v2929_v28 = vadd.f32 %v7714_v60, %v9745_v59  ;;  %v7717_v57 = vadd.f32 %v7716_v31, %v7715_v51 }
 0x433   :  { %v2932_v11 = vadd.f32 %v7717_v57, %v9750_v53  ;;  %v9055_v57 = vmov 0  }
 0x434   :  { %3282 = vmatprep.subr.bf16.mxu0 %v9055_v57  ;;  %3410 = vmatprep.subr.bf16.mxu1 %v9055_v57 }
 0x435   :  { %v2973_v8 = vpack.c.bf16 %v2932_v11, %v2929_v28  ;;  %v7718_v40 = vpop.f32.mrb[248].mxu0  ;;  %v8795_v11 = vld [vmem:[%s9090_s25 + $0x44] ss:$8 sps:$4 sm:$0xff]  }
 0x436   :  { %v7719_v39 = vpop.f32.mrb[249].mxu0 }
 0x437   :  { %v7720_v43 = vadd.f32 %v7719_v39, %v7718_v40  ;;  %v7721_v37 = vpop.f32.mrb[250].mxu0  ;;  %8081 = vmatmul.mubr.msk.bf16.gmra.mrb[244].mxu1 %vm1442_vm1, %v2973_v8  ;;  %v8801_v8 = vld [vmem:[%s9090_s25 + $0x4] ss:$8 sps:$4 sm:$0xff]  }
 0x438   :  { %v7722_v23 = vpop.f32.mrb[251].mxu0  ;;  %8084 = vmatprep.mubr.msk.bf16.mxu1 %vm9054_vm0, %v9053_v22  ;;  %6748 = vmatprep.mubr.msk.bf16.mxu0 %vm3269_vm2, %v8801_v8 }
 0x439   :  { %v2937_v2 = vadd.f32 %v7720_v43, %v9755_v62  ;;  %v7723_v61 = vadd.f32 %v7722_v23, %v7721_v37 }
 0x43b   :  { %v2940_v46 = vadd.f32 %v7723_v61, %v9760_v49 }
 0x43d   :  { %v2974_v59 = vpack.c.bf16 %v2940_v46, %v2937_v2  ;;  %v7724_v44 = vpop.f32.mrb[252].mxu0 }
 0x43e   :  { %v7725_v9 = vpop.f32.mrb[253].mxu0 }
 0x43f   :  { %v7726_v53 = vadd.f32 %v7725_v9, %v7724_v44  ;;  %v7727_v34 = vpop.f32.mrb[254].mxu0  ;;  %8085 = vmatmul.mubr.msk.bf16.gmra.mrb[248].mxu1 %vm1442_vm1, %v2974_v59 }
 0x440   :  { %v7728_v19 = vpop.f32.mrb[255].mxu0  ;;  %8088 = vmatprep.mubr.msk.bf16.mxu1 %vm9054_vm0, %v9053_v22 }
 0x441   :  { %v2945_v45 = vadd.f32 %v7726_v53, %v9765_v12  ;;  %v7729_v32 = vadd.f32 %v7728_v19, %v7727_v34 }
 0x443   :  { %v2948_v27 = vadd.f32 %v7729_v32, %v9770_v50 }
 0x445   :  { %v2975_v62 = vpack.c.bf16 %v2948_v27, %v2945_v45  ;;  %v7730_v25 = vpop.f32.mrb[0].mxu0 }
 0x446   :  { %v7731_v42 = vpop.f32.mrb[1].mxu0 }
 0x447   :  { %v7732_v49 = vadd.f32 %v7731_v42, %v7730_v25  ;;  %v7733_v4 = vpop.f32.mrb[2].mxu0  ;;  %8089 = vmatmul.mubr.msk.bf16.gmra.mrb[252].mxu1 %vm1442_vm1, %v2975_v62 }
 0x448   :  { %v7734_v10 = vpop.f32.mrb[3].mxu0  ;;  %8092 = vmatprep.mubr.msk.bf16.mxu1 %vm9054_vm0, %v9053_v22 }
 0x449   :  { %v2953_v26 = vadd.f32 %v7732_v49, %v9775_v16  ;;  %v7735_v55 = vadd.f32 %v7734_v10, %v7733_v4 }
 0x44b   :  { %v2956_v7 = vadd.f32 %v7735_v55, %v9780_v0 }
 0x44d   :  { %v2976_v12 = vpack.c.bf16 %v2956_v7, %v2953_v26  ;;  %v7736_v38 = vpop.f32.mrb[4].mxu0 }
 0x44e   :  { %v7737_v50 = vpop.f32.mrb[5].mxu0 }
 0x44f   :  { %v7738_v33 = vadd.f32 %v7737_v50, %v7736_v38  ;;  %v7739_v60 = vpop.f32.mrb[6].mxu0  ;;  %8093 = vmatmul.mubr.msk.bf16.gmra.mrb[0].mxu1 %vm1442_vm1, %v2976_v12 }
 0x450   :  { %v7740_v51 = vpop.f32.mrb[7].mxu0  ;;  %8096 = vmatprep.mubr.msk.bf16.mxu1 %vm9054_vm0, %v9053_v22 }
 0x451   :  { %v2961_v31 = vadd.f32 %v7738_v33, %v9785_v6  ;;  %v7741_v16 = vadd.f32 %v7740_v51, %v7739_v60  ;;  %v9885_v6 = vld [vmem:[%s9085_s21] ss:$0 sm:$0xff]  ;;  %s10379_s21 = sld [smem:[#allocation7_spill]] }
 0x453   :  { %v2964_v28 = vadd.f32 %v7741_v16, %v9790_v3 }
 0x455   :  { %v2977_v0 = vpack.c.bf16 %v2964_v28, %v2961_v31 }
 0x457   :  { %8097 = vmatmul.mubr.msk.bf16.gmra.mrb[4].mxu1 %vm1442_vm1, %v2977_v0 }
 0x458   :  { %6768 = vmatprep.mubr.msk.bf16.mxu1 %vm3269_vm2, %v8795_v11 }
 0x4da   :  { %v3054_v40 = vpop.f32.mrb[220].mxu1 }
 0x4db   :  { %v3141_v3 = vadd.f32 %v3054_v40, %v9738_v20  ;;  %v8058_v39 = vpop.f32.mrb[221].mxu1 }
 0x4dc   :  { %v3057_v43 = vpop.f32.mrb[222].mxu1 }
 0x4dd   :  { %v3170_v37 = vadd.f32 %v9885_v6, %v3141_v3  ;;  %v3142_v23 = vadd.f32 %v3057_v43, %v9743_v36  ;;  %v8059_v2 = vpop.f32.mrb[223].mxu1 }
 0x4df   :  { %v3171_v61 = vadd.f32 %v9885_v6, %v3142_v23  ;;  %v3192_v46 = vmax.f32 %v3170_v37, 0.0 }
 0x4e1   :  { %v3193_v59 = vmax.f32 %v3171_v61, 0.0 }
 0x4e2   :  { %v3062_v44 = vpop.f32.mrb[224].mxu1 }
 0x4e3   :  { %v9891_v9 = vpack.c.bf16 %v3193_v59, %v3192_v46  ;;  %v3143_v53 = vadd.f32 %v3062_v44, %v9748_v18  ;;  %v8062_v34 = vpop.f32.mrb[225].mxu1 }
 0x4e4   :  { %v3065_v19 = vpop.f32.mrb[226].mxu1 }
 0x4e5   :  { %v3172_v20 = vadd.f32 %v9885_v6, %v3143_v53  ;;  %v3144_v45 = vadd.f32 %v3065_v19, %v9753_v5  ;;  %v8063_v32 = vpop.f32.mrb[227].mxu1  ;;  %3283 = vmatpush1.bf16.msra.mxu0 %v9891_v9  ;;  %3411 = vmatpush1.bf16.msra.mxu1 %v9891_v9 }
 0x4e6   :  { %3284 = vmatprep.subr.bf16.mxu0 %v9055_v57  ;;  %3412 = vmatprep.subr.bf16.mxu1 %v9055_v57 }
 0x4e7   :  { %v3173_v36 = vadd.f32 %v9885_v6, %v3144_v45  ;;  %v3194_v27 = vmax.f32 %v3172_v20, 0.0 }
 0x4e9   :  { %v3195_v62 = vmax.f32 %v3173_v36, 0.0 }
 0x4ea   :  { %v3070_v18 = vpop.f32.mrb[228].mxu1 }
 0x4eb   :  { %v9901_v25 = vpack.c.bf16 %v3195_v62, %v3194_v27  ;;  %v3145_v42 = vadd.f32 %v3070_v18, %v9758_v54  ;;  %v8066_v49 = vpop.f32.mrb[229].mxu1 }
 0x4ec   :  { %v3073_v5 = vpop.f32.mrb[230].mxu1 }
 0x4ed   :  { %v3174_v4 = vadd.f32 %v9885_v6, %v3145_v42  ;;  %v3146_v10 = vadd.f32 %v3073_v5, %v9763_v63  ;;  %v8067_v26 = vpop.f32.mrb[231].mxu1  ;;  %3285 = vmatpush1.bf16.msra.mxu0 %v9901_v25  ;;  %3413 = vmatpush1.bf16.msra.mxu1 %v9901_v25 }
 0x4ee   :  { %3286 = vmatprep.subr.bf16.mxu0 %v9055_v57  ;;  %3414 = vmatprep.subr.bf16.mxu1 %v9055_v57 }
 0x4ef   :  { %v3175_v55 = vadd.f32 %v9885_v6, %v3146_v10  ;;  %v3196_v7 = vmax.f32 %v3174_v4, 0.0 }
 0x4f1   :  { %v3197_v12 = vmax.f32 %v3175_v55, 0.0 }
 0x4f2   :  { %v3078_v54 = vpop.f32.mrb[232].mxu1 }
 0x4f3   :  { %v9911_v38 = vpack.c.bf16 %v3197_v12, %v3196_v7  ;;  %v3147_v50 = vadd.f32 %v3078_v54, %v9768_v14  ;;  %v8070_v33 = vpop.f32.mrb[233].mxu1 }
 0x4f4   :  { %v3081_v63 = vpop.f32.mrb[234].mxu1 }
 0x4f5   :  { %v3176_v60 = vadd.f32 %v9885_v6, %v3147_v50  ;;  %v3148_v51 = vadd.f32 %v3081_v63, %v9773_v17  ;;  %v8071_v31 = vpop.f32.mrb[235].mxu1  ;;  %3287 = vmatpush1.bf16.msra.mxu0 %v9911_v38  ;;  %3415 = vmatpush1.bf16.msra.mxu1 %v9911_v38 }
 0x4f6   :  { %3288 = vmatprep.subr.bf16.mxu0 %v9055_v57  ;;  %3416 = vmatprep.subr.bf16.mxu1 %v9055_v57 }
 0x4f7   :  { %v3177_v16 = vadd.f32 %v9885_v6, %v3148_v51  ;;  %v3198_v28 = vmax.f32 %v3176_v60, 0.0 }
 0x4f9   :  { %v3199_v0 = vmax.f32 %v3177_v16, 0.0 }
 0x4fa   :  { %v3086_v14 = vpop.f32.mrb[236].mxu1 }
 0x4fb   :  { %v9921_v11 = vpack.c.bf16 %v3199_v0, %v3198_v28  ;;  %v3149_v8 = vadd.f32 %v3086_v14, %v9778_v35  ;;  %v8074_v40 = vpop.f32.mrb[237].mxu1 }
 0x4fc   :  { %v3089_v17 = vpop.f32.mrb[238].mxu1 }
 0x4fd   :  { %v3178_v3 = vadd.f32 %v9885_v6, %v3149_v8  ;;  %v3150_v39 = vadd.f32 %v3089_v17, %v9783_v52  ;;  %v8075_v43 = vpop.f32.mrb[239].mxu1  ;;  %3289 = vmatpush1.bf16.msra.mxu0 %v9921_v11  ;;  %3417 = vmatpush1.bf16.msra.mxu1 %v9921_v11 }
 0x4fe   :  { %3290 = vmatprep.subr.bf16.mxu0 %v9055_v57  ;;  %3418 = vmatprep.subr.bf16.mxu1 %v9055_v57 }
 0x4ff   :  { %v3179_v37 = vadd.f32 %v9885_v6, %v3150_v39  ;;  %v3200_v23 = vmax.f32 %v3178_v3, 0.0 }
 0x501   :  { %v3201_v2 = vmax.f32 %v3179_v37, 0.0 }
 0x502   :  { %v3094_v35 = vpop.f32.mrb[240].mxu1 }
 0x503   :  { %v9931_v61 = vpack.c.bf16 %v3201_v2, %v3200_v23  ;;  %v3151_v46 = vadd.f32 %v3094_v35, %v9788_v13  ;;  %v8078_v59 = vpop.f32.mrb[241].mxu1 }
 0x504   :  { %v3097_v52 = vpop.f32.mrb[242].mxu1 }
 0x505   :  { %v3180_v44 = vadd.f32 %v9885_v6, %v3151_v46  ;;  %v3152_v53 = vadd.f32 %v3097_v52, %v9793_v24  ;;  %v8079_v34 = vpop.f32.mrb[243].mxu1  ;;  %3291 = vmatpush1.bf16.msra.mxu0 %v9931_v61  ;;  %3419 = vmatpush1.bf16.msra.mxu1 %v9931_v61 }
 0x506   :  { %3292 = vmatprep.subr.bf16.mxu0 %v9055_v57  ;;  %3420 = vmatprep.subr.bf16.mxu1 %v9055_v57 }
 0x507   :  { %v3181_v19 = vadd.f32 %v9885_v6, %v3152_v53  ;;  %v3202_v20 = vmax.f32 %v3180_v44, 0.0 }
 0x509   :  { %v3203_v45 = vmax.f32 %v3181_v19, 0.0 }
 0x50a   :  { %v3102_v13 = vpop.f32.mrb[244].mxu1 }
 0x50b   :  { %v9941_v32 = vpack.c.bf16 %v3203_v45, %v3202_v20  ;;  %v3153_v36 = vadd.f32 %v3102_v13, %v9796_v15  ;;  %v8082_v27 = vpop.f32.mrb[245].mxu1 }
 0x50c   :  { %v3105_v24 = vpop.f32.mrb[246].mxu1  ;;  %v8798_v27 = vld [vmem:[%s9090_s25 + $0x54] ss:$8 sps:$4 sm:$0xff]  }
 0x50d   :  { %v3182_v62 = vadd.f32 %v9885_v6, %v3153_v36  ;;  %v3154_v18 = vadd.f32 %v3105_v24, %v9799_v30  ;;  %v8083_v42 = vpop.f32.mrb[247].mxu1  ;;  %3293 = vmatpush1.bf16.msra.mxu0 %v9941_v32  ;;  %3421 = vmatpush1.bf16.msra.mxu1 %v9941_v32  ;;  %v8793_v36 = vld [vmem:[%s9090_s25 + $0x40] ss:$8 sps:$4 sm:$0xff]   ;;  %v8807_v24 = vld [vmem:[%s9090_s25 + $0x14] ss:$8 sps:$4 sm:$0xff]  }
 0x50e   :  { %3294 = vmatprep.subr.bf16.mxu0 %v9055_v57  ;;  %3422 = vmatprep.subr.bf16.mxu1 %v9055_v57  ;;  %v8813_v42 = vld [vmem:[%s9090_s25 + $0x24] ss:$8 sps:$4 sm:$0xff]  }
 0x50f   :  { %v3183_v49 = vadd.f32 %v9885_v6, %v3154_v18  ;;  %v3204_v5 = vmax.f32 %v3182_v62, 0.0  ;;  %v8805_v62 = vld [vmem:[%s9090_s25 + $0x10] ss:$8 sps:$4 sm:$0xff]   ;;  %v8804_v18 = vld [vmem:[%s9090_s25 + $0x64] ss:$8 sps:$4 sm:$0xff]  }
 0x511   :  { %v3205_v4 = vmax.f32 %v3183_v49, 0.0  ;;  %v8802_v49 = vld [vmem:[%s9090_s25 + $0x60] ss:$8 sps:$4 sm:$0xff]  }
 0x512   :  { %v3110_v15 = vpop.f32.mrb[248].mxu1 }
 0x513   :  { %v9951_v10 = vpack.c.bf16 %v3205_v4, %v3204_v5  ;;  %v3155_v26 = vadd.f32 %v3110_v15, %v9802_v56  ;;  %v8086_v55 = vpop.f32.mrb[249].mxu1  ;;  %v8811_v5 = vld [vmem:[%s9090_s25 + $0x20] ss:$8 sps:$4 sm:$0xff]   ;;  %v8810_v4 = vld [vmem:[%s9090_s25 + $0x74] ss:$8 sps:$4 sm:$0xff]  }
 0x514   :  { %v3113_v30 = vpop.f32.mrb[250].mxu1  ;;  %v8816_v15 = vld [vmem:[%s9090_s25 + $0x34] ss:$8 sps:$4 sm:$0xff]   ;;  %v8814_v55 = vld [vmem:[%s9090_s25 + $0x30] ss:$8 sps:$4 sm:$0xff]  }
 0x515   :  { %v3184_v7 = vadd.f32 %v9885_v6, %v3155_v26  ;;  %v3156_v12 = vadd.f32 %v3113_v30, %v9805_v21  ;;  %v8087_v54 = vpop.f32.mrb[251].mxu1  ;;  %3295 = vmatpush1.bf16.msra.mxu0 %v9951_v10  ;;  %3423 = vmatpush1.bf16.msra.mxu1 %v9951_v10  ;;  %v8808_v26 = vld [vmem:[%s9090_s25 + $0x70] ss:$8 sps:$4 sm:$0xff]   ;;  %v8819_v30 = vld [vmem:[%s9090_s25 + $0x84] ss:$8 sps:$4 sm:$0xff]  }
 0x516   :  { %3296 = vmatprep.subr.bf16.mxu0 %v9055_v57  ;;  %3424 = vmatprep.subr.bf16.mxu1 %v9055_v57  ;;  %v8820_v54 = vld [vmem:[%s9090_s25 + $0x90] ss:$8 sps:$4 sm:$0xff]  }
 0x517   :  { %v3185_v50 = vadd.f32 %v9885_v6, %v3156_v12  ;;  %v3206_v33 = vmax.f32 %v3184_v7, 0.0  ;;  %v8817_v7 = vld [vmem:[%s9090_s25 + $0x80] ss:$8 sps:$4 sm:$0xff]   ;;  %v8822_v12 = vld [vmem:[%s9090_s25 + $0x94] ss:$8 sps:$4 sm:$0xff]  }
 0x519   :  { %v3207_v63 = vmax.f32 %v3185_v50, 0.0  ;;  %v8825_v50 = vld [vmem:[%s9090_s25 + $0xa4] ss:$8 sps:$4 sm:$0xff]  }
 0x51a   :  { %v3118_v56 = vpop.f32.mrb[252].mxu1 }
 0x51b   :  { %v9961_v60 = vpack.c.bf16 %v3207_v63, %v3206_v33  ;;  %v3157_v51 = vadd.f32 %v3118_v56, %v9808_v48  ;;  %v8090_v31 = vpop.f32.mrb[253].mxu1  ;;  %v8828_v33 = vld [vmem:[%s9090_s25 + $0xb4] ss:$8 sps:$4 sm:$0xff]   ;;  %v8841_v63 = vld [vmem:[%s9095_s29 + $0x8] sm:$0xff]  }
 0x51c   :  { %v3121_v21 = vpop.f32.mrb[254].mxu1  ;;  %v8835_v56 = vld [vmem:[%s9090_s25 + $0xe0] ss:$8 sps:$4 sm:$0xff]  }
 0x51d   :  { %v3186_v16 = vadd.f32 %v9885_v6, %v3157_v51  ;;  %v3158_v28 = vadd.f32 %v3121_v21, %v9811_v47  ;;  %v8091_v0 = vpop.f32.mrb[255].mxu1  ;;  %3297 = vmatpush1.bf16.msra.mxu0 %v9961_v60  ;;  %3425 = vmatpush1.bf16.msra.mxu1 %v9961_v60  ;;  %v8838_v51 = vld [vmem:[%s9090_s25 + $0xf0] ss:$8 sps:$4 sm:$0xff]   ;;  %v8842_v31 = vld [vmem:[%s9095_s29] sm:$0xff]  }
 0x51e   :  { %3298 = vmatprep.subr.bf16.mxu0 %v9055_v57  ;;  %3426 = vmatprep.subr.bf16.mxu1 %v9055_v57 }
 0x51f   :  { %v3187_v14 = vadd.f32 %v9885_v6, %v3158_v28  ;;  %v3208_v8 = vmax.f32 %v3186_v16, 0.0 }
 0x521   :  { %v3209_v40 = vmax.f32 %v3187_v14, 0.0 }
 0x522   :  { %v3126_v48 = vpop.f32.mrb[0].mxu1 }
 0x523   :  { %v9971_v17 = vpack.c.bf16 %v3209_v40, %v3208_v8  ;;  %v3159_v3 = vadd.f32 %v3126_v48, %v9814_v1  ;;  %v8094_v39 = vpop.f32.mrb[1].mxu1 }
 0x524   :  { %v3129_v47 = vpop.f32.mrb[2].mxu1 }
 0x525   :  { %v3188_v43 = vadd.f32 %v9885_v6, %v3159_v3  ;;  %v3160_v37 = vadd.f32 %v3129_v47, %v9817_v29  ;;  %v8095_v23 = vpop.f32.mrb[3].mxu1  ;;  %3299 = vmatpush1.bf16.msra.mxu0 %v9971_v17  ;;  %3427 = vmatpush1.bf16.msra.mxu1 %v9971_v17 }
 0x526   :  { %3300 = vmatprep.subr.bf16.mxu0 %v9055_v57  ;;  %3428 = vmatprep.subr.bf16.mxu1 %v9055_v57 }
 0x527   :  { %v3189_v2 = vadd.f32 %v9885_v6, %v3160_v37  ;;  %v3210_v35 = vmax.f32 %v3188_v43, 0.0 }
 0x529   :  { %v3211_v46 = vmax.f32 %v3189_v2, 0.0 }
 0x52a   :  { %v3134_v1 = vpop.f32.mrb[4].mxu1 }
 0x52b   :  { %v9981_v59 = vpack.c.bf16 %v3211_v46, %v3210_v35  ;;  %v3161_v29 = vadd.f32 %v3134_v1, %v9820_v41  ;;  %v8098_v52 = vpop.f32.mrb[5].mxu1 }
 0x52c   :  { %v3137_v44 = vpop.f32.mrb[6].mxu1 }
 0x52d   :  { %v3190_v53 = vadd.f32 %v9885_v6, %v3161_v29  ;;  %v3162_v34 = vadd.f32 %v3137_v44, %v9823_v58  ;;  %v8099_v19 = vpop.f32.mrb[7].mxu1  ;;  %3301 = vmatpush1.bf16.msra.mxu0 %v9981_v59  ;;  %3429 = vmatpush1.bf16.msra.mxu1 %v9981_v59  ;;  %v8799_v58 = vld [vmem:[%s9090_s25] ss:$8 sps:$4 sm:$0xff]   ;;  %v8843_v29 = vld [vmem:[%s9095_s29 + $0x10] sm:$0xff]  }
 0x52e   :  { %3302 = vmatprep.subr.bf16.mxu0 %v9055_v57  ;;  %3430 = vmatprep.subr.bf16.mxu1 %v9055_v57 }
 0x52f   :  { %v3191_v20 = vadd.f32 %v9885_v6, %v3162_v34  ;;  %v3212_v41 = vmax.f32 %v3190_v53, 0.0  ;;  %v8796_v6 = vld [vmem:[%s9090_s25 + $0x50] ss:$8 sps:$4 sm:$0xff]  }
 0x531   :  { %v3213_v45 = vmax.f32 %v3191_v20, 0.0 }
 0x533   :  { %v9991_v13 = vpack.c.bf16 %v3213_v45, %v3212_v41 }
 0x535   :  { %3303 = vmatpush1.bf16.msra.mxu0 %v9991_v13  ;;  %3431 = vmatpush1.bf16.msra.mxu1 %v9991_v13 }
 0x536   :  { %3705 = vmatprep.subr.bf16.mxu1 %v9055_v57  ;;  %8100 = vmatprep.subr.bf16.mxu0 %v8841_v63 }
 0x538   :  { %3443 = vmatmul.mubr.bf16.vlgmr.msra.gmra.mrb[8].mxu1 %v8793_v36  ;;  %3315 = vmatmul.mubr.bf16.vlgmr.msra.gmra.mrb[8].mxu0 %v8799_v58 }
 0x539   :  { %3706 = vmatpush1.bf16.msra.mxu1 %v9891_v9  ;;  %6769 = vmatprep.mubr.msk.bf16.mxu1 %vm3269_vm2, %v8798_v27 }
 0x53a   :  { %3707 = vmatprep.subr.bf16.mxu1 %v9055_v57  ;;  %6749 = vmatprep.mubr.msk.bf16.mxu0 %vm3269_vm2, %v8807_v24 }
 0x53b   :  { %8101 = vmatpush3.bf16.msra.mxu0 %v8841_v63 }
 0x53c   :  { %8110 = vmatprep.subr.bf16.mxu0 %v8842_v31 }
 0x53d   :  { %3708 = vmatpush1.bf16.msra.mxu1 %v9901_v25 }
 0x53e   :  { %3709 = vmatprep.subr.bf16.mxu1 %v9055_v57 }
 0x540   :  { %3451 = vmatmul.mubr.bf16.gmra.mrb[12].mxu1 %v8796_v6  ;;  %3323 = vmatmul.mubr.bf16.gmra.mrb[12].mxu0 %v8805_v62 }
 0x541   :  { %3710 = vmatpush1.bf16.msra.mxu1 %v9911_v38  ;;  %6770 = vmatprep.mubr.msk.bf16.mxu1 %vm3269_vm2, %v8804_v18 }
 0x542   :  { %3711 = vmatprep.subr.bf16.mxu1 %v9055_v57  ;;  %6750 = vmatprep.mubr.msk.bf16.mxu0 %vm3269_vm2, %v8813_v42 }
 0x545   :  { %3712 = vmatpush1.bf16.msra.mxu1 %v9921_v11 }
 0x546   :  { %3713 = vmatprep.subr.bf16.mxu1 %v9055_v57 }
 0x548   :  { %3459 = vmatmul.mubr.bf16.gmra.mrb[16].mxu1 %v8802_v49  ;;  %3331 = vmatmul.mubr.bf16.gmra.mrb[16].mxu0 %v8811_v5 }
 0x549   :  { %3714 = vmatpush1.bf16.msra.mxu1 %v9931_v61  ;;  %6771 = vmatprep.mubr.msk.bf16.mxu1 %vm3269_vm2, %v8810_v4 }
 0x54a   :  { %3715 = vmatprep.subr.bf16.mxu1 %v9055_v57  ;;  %6751 = vmatprep.mubr.msk.bf16.mxu0 %vm3269_vm2, %v8816_v15  ;;  %v8844_v15 = vld [vmem:[%s9095_s29 + $0x18] sm:$0xff]   ;;  %s10380_s29 = sld [smem:[#allocation10_spill]] }
 0x54d   :  { %3716 = vmatpush1.bf16.msra.mxu1 %v9941_v32 }
 0x54e   :  { %3717 = vmatprep.subr.bf16.mxu1 %v9055_v57 }
 0x550   :  { %3467 = vmatmul.mubr.bf16.gmra.mrb[20].mxu1 %v8808_v26  ;;  %3339 = vmatmul.mubr.bf16.gmra.mrb[20].mxu0 %v8814_v55 }
 0x551   :  { %3718 = vmatpush1.bf16.msra.mxu1 %v9951_v10  ;;  %6800 = vmatprep.mubr.msk.bf16.mxu1 %vm3269_vm2, %v8819_v30 }
 0x552   :  { %3719 = vmatprep.subr.bf16.mxu1 %v9055_v57 }
 0x555   :  { %3720 = vmatpush1.bf16.msra.mxu1 %v9961_v60 }
 0x556   :  { %3721 = vmatprep.subr.bf16.mxu1 %v9055_v57 }
 0x559   :  { %3722 = vmatpush1.bf16.msra.mxu1 %v9971_v17 }
 0x55a   :  { %3723 = vmatprep.subr.bf16.mxu1 %v9055_v57 }
 0x55d   :  { %3724 = vmatpush1.bf16.msra.mxu1 %v9981_v59 }
 0x55e   :  { %3725 = vmatprep.subr.bf16.mxu1 %v9055_v57 }
 0x561   :  { %3726 = vmatpush1.bf16.msra.mxu1 %v9991_v13 }
 0x562   :  { %3925 = vmatprep.subr.bf16.mxu1 %v9055_v57 }
 0x564   :  { %3738 = vmatmul.mubr.bf16.vlgmr.msra.gmra.mrb[24].mxu1 %v8817_v7 }
 0x565   :  { %3926 = vmatpush1.bf16.msra.mxu1 %v9891_v9  ;;  %6801 = vmatprep.mubr.msk.bf16.mxu1 %vm3269_vm2, %v8822_v12  ;;  %v8823_v9 = vld [vmem:[%s9090_s25 + $0xa0] ss:$8 sps:$4 sm:$0xff]  }
 0x566   :  { %3927 = vmatprep.subr.bf16.mxu1 %v9055_v57 }
 0x569   :  { %3928 = vmatpush1.bf16.msra.mxu1 %v9901_v25  ;;  %v8826_v25 = vld [vmem:[%s9090_s25 + $0xb0] ss:$8 sps:$4 sm:$0xff]  }
 0x56a   :  { %3929 = vmatprep.subr.bf16.mxu1 %v9055_v57 }
 0x56c   :  { %3746 = vmatmul.mubr.bf16.gmra.mrb[28].mxu1 %v8820_v54 }
 0x56d   :  { %3930 = vmatpush1.bf16.msra.mxu1 %v9911_v38  ;;  %6802 = vmatprep.mubr.msk.bf16.mxu1 %vm3269_vm2, %v8825_v50  ;;  %v8831_v38 = vld [vmem:[%s9090_s25 + $0xc4] ss:$8 sps:$4 sm:$0xff]  }
 0x56e   :  { %3931 = vmatprep.subr.bf16.mxu1 %v9055_v57 }
 0x571   :  { %3932 = vmatpush1.bf16.msra.mxu1 %v9921_v11  ;;  %v8829_v11 = vld [vmem:[%s9090_s25 + $0xc0] ss:$8 sps:$4 sm:$0xff]  }
 0x572   :  { %3933 = vmatprep.subr.bf16.mxu1 %v9055_v57 }
 0x574   :  { %3754 = vmatmul.mubr.bf16.gmra.mrb[32].mxu1 %v8823_v9 }
 0x575   :  { %3934 = vmatpush1.bf16.msra.mxu1 %v9931_v61  ;;  %6803 = vmatprep.mubr.msk.bf16.mxu1 %vm3269_vm2, %v8828_v33  ;;  %v8834_v61 = vld [vmem:[%s9090_s25 + $0xd4] ss:$8 sps:$4 sm:$0xff]  }
 0x576   :  { %3935 = vmatprep.subr.bf16.mxu1 %v9055_v57 }
 0x579   :  { %3936 = vmatpush1.bf16.msra.mxu1 %v9941_v32  ;;  %v8832_v32 = vld [vmem:[%s9090_s25 + $0xd0] ss:$8 sps:$4 sm:$0xff]  }
 0x57a   :  { %3937 = vmatprep.subr.bf16.mxu1 %v9055_v57 }
 0x57c   :  { %3762 = vmatmul.mubr.bf16.gmra.mrb[36].mxu1 %v8826_v25 }
 0x57d   :  { %3938 = vmatpush1.bf16.msra.mxu1 %v9951_v10  ;;  %6827 = vmatprep.mubr.msk.bf16.mxu1 %vm3269_vm2, %v8831_v38  ;;  %v8837_v10 = vld [vmem:[%s9090_s25 + $0xe4] ss:$8 sps:$4 sm:$0xff]  }
 0x57e   :  { %3939 = vmatprep.subr.bf16.mxu1 %v9055_v57 }
 0x581   :  { %3940 = vmatpush1.bf16.msra.mxu1 %v9961_v60  ;;  %v8840_v60 = vld [vmem:[%s9090_s25 + $0xf4] ss:$8 sps:$4 sm:$0xff]   ;;  %s9056_s25 = smov 64  }
 0x582   :  { %3941 = vmatprep.subr.bf16.mxu1 %v9055_v57 }
 0x585   :  { %3942 = vmatpush1.bf16.msra.mxu1 %v9971_v17 }
 0x586   :  { %3943 = vmatprep.subr.bf16.mxu1 %v9055_v57 }
 0x589   :  { %3944 = vmatpush1.bf16.msra.mxu1 %v9981_v59 }
 0x58a   :  { %3945 = vmatprep.subr.bf16.mxu1 %v9055_v57 }
 0x58d   :  { %3946 = vmatpush1.bf16.msra.mxu1 %v9991_v13 }
 0x590   :  { %3958 = vmatmul.mubr.bf16.vlgmr.msra.gmra.mrb[40].mxu1 %v8829_v11 }
 0x591   :  { %6828 = vmatprep.mubr.msk.bf16.mxu1 %vm3269_vm2, %v8834_v61 }
 0x598   :  { %3966 = vmatmul.mubr.bf16.gmra.mrb[44].mxu1 %v8832_v32 }
 0x599   :  { %6829 = vmatprep.mubr.msk.bf16.mxu1 %vm3269_vm2, %v8837_v10 }
 0x5a0   :  { %3974 = vmatmul.mubr.bf16.gmra.mrb[48].mxu1 %v8835_v56 }
 0x5a1   :  { %6830 = vmatprep.mubr.msk.bf16.mxu1 %vm3269_vm2, %v8840_v60 }
 0x5a8   :  { %3982 = vmatmul.mubr.bf16.gmra.mrb[52].mxu1 %v8838_v51 }
 0x60b   :  { %v3444_v21 = vpop.f32.mrb[8].mxu1  ;;  %v3316_v16 = vpop.f32.mrb[8].mxu0 }
 0x60c   :  { %v3446_v28 = vpop.f32.mrb[9].mxu1  ;;  %v3318_v0 = vpop.f32.mrb[9].mxu0 }
 0x60d   :  { %v3447_v14 = vpop.f32.mrb[10].mxu1  ;;  %v3319_v8 = vpop.f32.mrb[10].mxu0 }
 0x60e   :  { %v3475_v40 = vpack.c.bf16 %v3447_v14, %v3444_v21  ;;  %v3449_v48 = vpop.f32.mrb[11].mxu1  ;;  %v3347_v17 = vpack.c.bf16 %v3319_v8, %v3316_v16  ;;  %v3321_v3 = vpop.f32.mrb[11].mxu0 }
 0x610   :  { %8102 = vmatprep.mubr.msk.bf16.mxu0 %vm1442_vm1, %v3475_v40 }
 0x613   :  { %v3452_v39 = vpop.f32.mrb[12].mxu1  ;;  %v3324_v47 = vpop.f32.mrb[12].mxu0 }
 0x614   :  { %v3454_v43 = vpop.f32.mrb[13].mxu1  ;;  %v3326_v37 = vpop.f32.mrb[13].mxu0 }
 0x615   :  { %v3455_v23 = vpop.f32.mrb[14].mxu1  ;;  %v3327_v2 = vpop.f32.mrb[14].mxu0 }
 0x616   :  { %v3476_v35 = vpack.c.bf16 %v3455_v23, %v3452_v39  ;;  %v3457_v46 = vpop.f32.mrb[15].mxu1  ;;  %v3348_v1 = vpack.c.bf16 %v3327_v2, %v3324_v47  ;;  %v3329_v59 = vpop.f32.mrb[15].mxu0 }
 0x618   :  { %8103 = vmatmul.mubr.msk.bf16.vlgmr.msra.gmra.mrb[24].mxu0 %vm1442_vm1, %v3476_v35 }
 0x619   :  { %8111 = vmatpush3.bf16.msra.mxu0 %v8842_v31 }
 0x61a   :  { %8120 = vmatprep.subr.bf16.mxu0 %v8843_v29 }
 0x61b   :  { %v3460_v52 = vpop.f32.mrb[16].mxu1  ;;  %v3332_v44 = vpop.f32.mrb[16].mxu0 }
 0x61c   :  { %v3462_v53 = vpop.f32.mrb[17].mxu1  ;;  %v3334_v34 = vpop.f32.mrb[17].mxu0 }
 0x61d   :  { %v3463_v19 = vpop.f32.mrb[18].mxu1  ;;  %v3335_v20 = vpop.f32.mrb[18].mxu0 }
 0x61e   :  { %v3477_v41 = vpack.c.bf16 %v3463_v19, %v3460_v52  ;;  %v3465_v45 = vpop.f32.mrb[19].mxu1  ;;  %v3349_v13 = vpack.c.bf16 %v3335_v20, %v3332_v44  ;;  %v3337_v36 = vpop.f32.mrb[19].mxu0  ;;  %v8847_v52 = vld [vmem:[%s9105_s8 + $0x20] sm:$0xff]  }
 0x61f   :  { %8188 = vmatprep.mubr.msk.bf16.mxu1 %vm4129_vm3, %v8847_v52  ;;  %v6838_v44 = vld [vmem:[%s9100_s3] ss:$0 sm:$0xff]  ;;  %s10381_s3 = sld [smem:[#allocation9_spill]] }
 0x620   :  { %8106 = vmatprep.mubr.msk.bf16.mxu0 %vm1442_vm1, %v3477_v41 }
 0x623   :  { %v3468_v58 = vpop.f32.mrb[20].mxu1  ;;  %v3340_v27 = vpop.f32.mrb[20].mxu0 }
 0x624   :  { %v3470_v24 = vpop.f32.mrb[21].mxu1  ;;  %v3342_v6 = vpop.f32.mrb[21].mxu0 }
 0x625   :  { %v3471_v62 = vpop.f32.mrb[22].mxu1  ;;  %v3343_v18 = vpop.f32.mrb[22].mxu0 }
 0x626   :  { %v3478_v42 = vpack.c.bf16 %v3471_v62, %v3468_v58  ;;  %v3473_v49 = vpop.f32.mrb[23].mxu1  ;;  %v3350_v5 = vpack.c.bf16 %v3343_v18, %v3340_v27  ;;  %v3345_v4 = vpop.f32.mrb[23].mxu0 }
 0x628   :  { %8107 = vmatmul.mubr.msk.bf16.gmra.mrb[28].mxu0 %vm1442_vm1, %v3478_v42 }
 0x629   :  { %8112 = vmatprep.mubr.msk.bf16.mxu0 %vm1442_vm1, %v3347_v17 }
 0x630   :  { %8113 = vmatmul.mubr.msk.bf16.vlgmr.msra.gmra.mrb[24].mxu0 %vm1442_vm1, %v3348_v1 }
 0x631   :  { %8116 = vmatprep.mubr.msk.bf16.mxu0 %vm1442_vm1, %v3349_v13  ;;  %8121 = vmatpush3.bf16.msra.mxu0 %v8843_v29  ;;  %v8845_v29 = vld [vmem:[%s9105_s8] sm:$0xff]  }
 0x632   :  { %8130 = vmatprep.subr.bf16.mxu0 %v8844_v15 }
 0x637   :  { %v3739_v26 = vpop.f32.mrb[24].mxu1 }
 0x638   :  { %v3741_v55 = vpop.f32.mrb[25].mxu1  ;;  %8117 = vmatmul.mubr.msk.bf16.gmra.mrb[28].mxu0 %vm1442_vm1, %v3350_v5 }
 0x639   :  { %v3742_v30 = vpop.f32.mrb[26].mxu1 }
 0x63a   :  { %v3770_v7 = vpack.c.bf16 %v3742_v30, %v3739_v26  ;;  %v3744_v12 = vpop.f32.mrb[27].mxu1 }
 0x63c   :  { %8122 = vmatprep.mubr.msk.bf16.mxu0 %vm1442_vm1, %v3770_v7 }
 0x63f   :  { %v3747_v54 = vpop.f32.mrb[28].mxu1 }
 0x640   :  { %v3749_v50 = vpop.f32.mrb[29].mxu1 }
 0x641   :  { %v3750_v9 = vpop.f32.mrb[30].mxu1 }
 0x642   :  { %v3771_v33 = vpack.c.bf16 %v3750_v9, %v3747_v54  ;;  %v3752_v25 = vpop.f32.mrb[31].mxu1 }
 0x643   :  { %v8846_v25 = vld [vmem:[%s9105_s8 + $0x8] sm:$0xff]  }
 0x644   :  { %8123 = vmatmul.mubr.msk.bf16.vlgmr.msra.gmra.mrb[24].mxu0 %vm1442_vm1, %v3771_v33 }
 0x645   :  { %8131 = vmatpush3.bf16.msra.mxu0 %v8844_v15 }
 0x647   :  { %v3755_v38 = vpop.f32.mrb[32].mxu1 }
 0x648   :  { %v3757_v11 = vpop.f32.mrb[33].mxu1 }
 0x649   :  { %v3758_v61 = vpop.f32.mrb[34].mxu1  ;;  %v8849_v11 = vld [vmem:[%s9105_s8 + $0x10] sm:$0xff]  }
 0x64a   :  { %v3772_v32 = vpack.c.bf16 %v3758_v61, %v3755_v38  ;;  %v3760_v10 = vpop.f32.mrb[35].mxu1  ;;  %v8848_v38 = vld [vmem:[%s9105_s8 + $0x28] sm:$0xff]   ;;  %v8851_v61 = vld [vmem:[%s9105_s8 + $0x30] sm:$0xff]  }
 0x64b   :  { %v8852_v10 = vld [vmem:[%s9105_s8 + $0x38] sm:$0xff]  }
 0x64c   :  { %8126 = vmatprep.mubr.msk.bf16.mxu0 %vm1442_vm1, %v3772_v32  ;;  %v8850_v32 = vld [vmem:[%s9105_s8 + $0x18] sm:$0xff]   ;;  %s10382_s8 = sld [smem:[#allocation12_spill]] }
 0x64f   :  { %v3763_v63 = vpop.f32.mrb[36].mxu1 }
 0x650   :  { %v3765_v56 = vpop.f32.mrb[37].mxu1 }
 0x651   :  { %v3766_v60 = vpop.f32.mrb[38].mxu1  ;;  %v8854_v56 = vld [vmem:[%s9110_s14 + $0x18] sm:$0xff]  }
 0x652   :  { %v3773_v51 = vpack.c.bf16 %v3766_v60, %v3763_v63  ;;  %v3768_v31 = vpop.f32.mrb[39].mxu1  ;;  %v8853_v63 = vld [vmem:[%s9110_s14 + $0x10] sm:$0xff]   ;;  %v8855_v60 = vld [vmem:[%s9110_s14] sm:$0xff]  }
 0x654   :  { %8127 = vmatmul.mubr.msk.bf16.gmra.mrb[28].mxu0 %vm1442_vm1, %v3773_v51 }
 0x663   :  { %v3959_v21 = vpop.f32.mrb[40].mxu1 }
 0x664   :  { %v3961_v16 = vpop.f32.mrb[41].mxu1 }
 0x665   :  { %v3962_v28 = vpop.f32.mrb[42].mxu1 }
 0x666   :  { %v3990_v0 = vpack.c.bf16 %v3962_v28, %v3959_v21  ;;  %v3964_v14 = vpop.f32.mrb[43].mxu1 }
 0x668   :  { %8132 = vmatprep.mubr.msk.bf16.mxu0 %vm1442_vm1, %v3990_v0 }
 0x66b   :  { %v3967_v8 = vpop.f32.mrb[44].mxu1 }
 0x66c   :  { %v3969_v40 = vpop.f32.mrb[45].mxu1 }
 0x66d   :  { %v3970_v48 = vpop.f32.mrb[46].mxu1 }
 0x66e   :  { %v3991_v17 = vpack.c.bf16 %v3970_v48, %v3967_v8  ;;  %v3972_v3 = vpop.f32.mrb[47].mxu1 }
 0x670   :  { %8133 = vmatmul.mubr.msk.bf16.vlgmr.msra.gmra.mrb[24].mxu0 %vm1442_vm1, %v3991_v17 }
 0x673   :  { %v3975_v39 = vpop.f32.mrb[48].mxu1 }
 0x674   :  { %v3977_v47 = vpop.f32.mrb[49].mxu1 }
 0x675   :  { %v3978_v43 = vpop.f32.mrb[50].mxu1 }
 0x676   :  { %v3992_v37 = vpack.c.bf16 %v3978_v43, %v3975_v39  ;;  %v3980_v23 = vpop.f32.mrb[51].mxu1 }
 0x678   :  { %8136 = vmatprep.mubr.msk.bf16.mxu0 %vm1442_vm1, %v3992_v37 }
 0x67b   :  { %v3983_v2 = vpop.f32.mrb[52].mxu1 }
 0x67c   :  { %v3985_v35 = vpop.f32.mrb[53].mxu1 }
 0x67d   :  { %v3986_v46 = vpop.f32.mrb[54].mxu1 }
 0x67e   :  { %v3993_v1 = vpack.c.bf16 %v3986_v46, %v3983_v2  ;;  %v3988_v59 = vpop.f32.mrb[55].mxu1 }
 0x680   :  { %8137 = vmatmul.mubr.msk.bf16.gmra.mrb[28].mxu0 %vm1442_vm1, %v3993_v1 }
 0x681   :  { %8148 = vmatprep.mubr.msk.bf16.mxu0 %vm4129_vm3, %v8845_v29 }
 0x743   :  { %v8134_v53 = vpop.f32.mrb[24].mxu0 }
 0x744   :  { %v4097_v34 = vadd.f32 %v8134_v53, %v6838_v44  ;;  %v4049_v19 = vpop.f32.mrb[25].mxu0  ;;  %v8857_v53 = vld [vmem:[%s9110_s14 + $0x20] sm:$0xff]  }
 0x745   :  { %v4095_v20 = vadd.f32 %v6838_v44, %v4049_v19  ;;  %v8135_v41 = vpop.f32.mrb[26].mxu0  ;;  %v8859_v19 = vld [vmem:[%s9110_s14 + $0x30] sm:$0xff]  }
 0x746   :  { %v4098_v45 = vadd.f32 %v8135_v41, %v6838_v44  ;;  %v4052_v13 = vpop.f32.mrb[27].mxu0  ;;  %v4105_v58 = vmax.f32 %v4097_v34, 0.0  ;;  %v8858_v34 = vld [vmem:[%s9110_s14 + $0x28] sm:$0xff]   ;;  %v6895_v41 = vld [vmem:[%s9115_s19] ss:$0 sm:$0xff]  ;;  %s10384_s19 = sld [smem:[#allocation11_spill]] }
 0x747   :  { %v4096_v36 = vadd.f32 %v6838_v44, %v4052_v13  ;;  %v4103_v24 = vmax.f32 %v4095_v20, 0.0  ;;  %v8860_v20 = vld [vmem:[%s9110_s14 + $0x38] sm:$0xff]  }
 0x748   :  { %v4106_v27 = vmax.f32 %v4098_v45, 0.0 }
 0x749   :  { %v4104_v6 = vmax.f32 %v4096_v36, 0.0 }
 0x74a   :  { %v4112_v62 = vpack.c.bf16 %v4106_v27, %v4105_v58 }
 0x74b   :  { %v4111_v18 = vpack.c.bf16 %v4104_v6, %v4103_v24 }
 0x74d   :  { %8140 = vmatprep.subr.bf16.mxu0 %v4111_v18  ;;  %8180 = vmatprep.subr.bf16.mxu1 %v4111_v18 }
 0x74e   :  { %8141 = vmatpush3.bf16.msra.mxu0 %v4111_v18  ;;  %8181 = vmatpush3.bf16.msra.mxu1 %v4111_v18 }
 0x74f   :  { %8142 = vmatprep.subr.bf16.mxu0 %v4112_v62  ;;  %8182 = vmatprep.subr.bf16.mxu1 %v4112_v62 }
 0x752   :  { %8143 = vmatpush3.bf16.msra.mxu0 %v4112_v62  ;;  %8183 = vmatpush3.bf16.msra.mxu1 %v4112_v62 }
 0x753   :  { %v8138_v42 = vpop.f32.mrb[28].mxu0 }
 0x754   :  { %v4101_v49 = vadd.f32 %v8138_v42, %v6838_v44  ;;  %v4065_v5 = vpop.f32.mrb[29].mxu0 }
 0x755   :  { %v4099_v4 = vadd.f32 %v6838_v44, %v4065_v5  ;;  %v8139_v15 = vpop.f32.mrb[30].mxu0 }
 0x756   :  { %v4102_v26 = vadd.f32 %v8139_v15, %v6838_v44  ;;  %v4068_v55 = vpop.f32.mrb[31].mxu0  ;;  %v4109_v7 = vmax.f32 %v4101_v49, 0.0 }
 0x757   :  { %v4100_v30 = vadd.f32 %v6838_v44, %v4068_v55  ;;  %v4107_v54 = vmax.f32 %v4099_v4, 0.0  ;;  %v8856_v44 = vld [vmem:[%s9110_s14 + $0x8] sm:$0xff]   ;;  %s10383_s14 = sld [smem:[#allocation14_spill]] }
 0x758   :  { %v4110_v12 = vmax.f32 %v4102_v26, 0.0  ;;  %v8861_v26 = vld [vmem:[%s9120_s24] sm:$0xff]   ;;  %v8862_v55 = vld [vmem:[%s9120_s24 + $0x8] sm:$0xff]  }
 0x759   :  { %v4108_v50 = vmax.f32 %v4100_v30, 0.0  ;;  %v8863_v30 = vld [vmem:[%s9125_s30 + $0x10] sm:$0xff]  }
 0x75a   :  { %v4114_v9 = vpack.c.bf16 %v4110_v12, %v4109_v7  ;;  %v8864_v7 = vld [vmem:[%s9125_s30] sm:$0xff]   ;;  %v8865_v12 = vld [vmem:[%s9125_s30 + $0x18] sm:$0xff]  }
 0x75b   :  { %v4113_v33 = vpack.c.bf16 %v4108_v50, %v4107_v54  ;;  %v8866_v54 = vld [vmem:[%s9125_s30 + $0x8] sm:$0xff]  }
 0x75d   :  { %8144 = vmatprep.subr.bf16.mxu0 %v4113_v33  ;;  %8184 = vmatprep.subr.bf16.mxu1 %v4113_v33 }
 0x75e   :  { %8145 = vmatpush3.bf16.msra.mxu0 %v4113_v33  ;;  %8185 = vmatpush3.bf16.msra.mxu1 %v4113_v33 }
 0x75f   :  { %8146 = vmatprep.subr.bf16.mxu0 %v4114_v9  ;;  %8186 = vmatprep.subr.bf16.mxu1 %v4114_v9 }
 0x762   :  { %8147 = vmatpush3.bf16.msra.mxu0 %v4114_v9  ;;  %8187 = vmatpush3.bf16.msra.mxu1 %v4114_v9 }
 0x763   :  { %8152 = vmatprep.subr.bf16.mxu0 %v4111_v18  ;;  %8200 = vmatprep.subr.bf16.mxu1 %v4111_v18 }
 0x765   :  { %8149 = vmatmul.mubr.msk.bf16.vlgmr.msra.gmra.mrb[32].mxu0 %vm4129_vm3, %v8846_v25  ;;  %8189 = vmatmul.mubr.msk.bf16.vlgmr.msra.gmra.mrb[56].mxu1 %vm4129_vm3, %v8848_v38 }
 0x766   :  { %8153 = vmatpush3.bf16.msra.mxu0 %v4111_v18  ;;  %8201 = vmatpush3.bf16.msra.mxu1 %v4111_v18 }
 0x767   :  { %8154 = vmatprep.subr.bf16.mxu0 %v4112_v62  ;;  %8202 = vmatprep.subr.bf16.mxu1 %v4112_v62 }
 0x768   :  { %8160 = vmatprep.mubr.msk.bf16.mxu0 %vm4129_vm3, %v8849_v11  ;;  %8208 = vmatprep.mubr.msk.bf16.mxu1 %vm4129_vm3, %v8851_v61 }
 0x76a   :  { %8155 = vmatpush3.bf16.msra.mxu0 %v4112_v62  ;;  %8203 = vmatpush3.bf16.msra.mxu1 %v4112_v62 }
 0x76b   :  { %8156 = vmatprep.subr.bf16.mxu0 %v4113_v33  ;;  %8204 = vmatprep.subr.bf16.mxu1 %v4113_v33 }
 0x76e   :  { %8157 = vmatpush3.bf16.msra.mxu0 %v4113_v33  ;;  %8205 = vmatpush3.bf16.msra.mxu1 %v4113_v33 }
 0x76f   :  { %8158 = vmatprep.subr.bf16.mxu0 %v4114_v9  ;;  %8206 = vmatprep.subr.bf16.mxu1 %v4114_v9 }
 0x772   :  { %8159 = vmatpush3.bf16.msra.mxu0 %v4114_v9  ;;  %8207 = vmatpush3.bf16.msra.mxu1 %v4114_v9 }
 0x773   :  { %8220 = vmatprep.subr.bf16.mxu1 %v9053_v22  ;;  %8164 = vmatprep.subr.bf16.mxu0 %v8853_v63 }
 0x775   :  { %8161 = vmatmul.mubr.msk.bf16.vlgmr.msra.gmra.mrb[36].mxu0 %vm4129_vm3, %v8850_v32  ;;  %8209 = vmatmul.mubr.msk.bf16.vlgmr.msra.gmra.mrb[60].mxu1 %vm4129_vm3, %v8852_v10 }
 0x776   :  { %8224 = vmatprep.mubr.msk.bf16.mxu1 %vm9054_vm0, %v9053_v22  ;;  %8165 = vmatpush3.bf16.msra.mxu0 %v8853_v63 }
 0x777   :  { %8166 = vmatprep.subr.bf16.mxu0 %v8854_v56 }
 0x77a   :  { %8167 = vmatpush3.bf16.msra.mxu0 %v8854_v56  ;;  %v8867_v56 = vld [vmem:[%s9120_s24 + $0x10] sm:$0xff]  }
 0x77b   :  { %8172 = vmatprep.subr.bf16.mxu0 %v8855_v60 }
 0x838   :  { %v8150_v51 = vpop.f32.mrb[32].mxu0  ;;  %v8190_v31 = vpop.f32.mrb[56].mxu1 }
 0x839   :  { %v4170_v21 = vpop.f32.mrb[33].mxu0  ;;  %v4458_v16 = vpop.f32.mrb[57].mxu1 }
 0x83a   :  { %v8151_v28 = vpop.f32.mrb[34].mxu0  ;;  %v8191_v0 = vpop.f32.mrb[58].mxu1 }
 0x83b   :  { %v4186_v14 = vpack.c.bf16 %v8151_v28, %v8150_v51  ;;  %v4173_v8 = vpop.f32.mrb[35].mxu0  ;;  %v4474_v40 = vpack.c.bf16 %v8191_v0, %v8190_v31  ;;  %v4461_v48 = vpop.f32.mrb[59].mxu1  ;;  %v8869_v51 = vld [vmem:[%s9125_s30 + $0x20] sm:$0xff]   ;;  %v8870_v31 = vld [vmem:[%s9125_s30 + $0x28] sm:$0xff]  }
 0x83c   :  { %v4185_v17 = vpack.c.bf16 %v4173_v8, %v4170_v21  ;;  %v4473_v3 = vpack.c.bf16 %v4461_v48, %v4458_v16 }
 0x848   :  { %v8162_v39 = vpop.f32.mrb[36].mxu0  ;;  %v8210_v47 = vpop.f32.mrb[60].mxu1 }
 0x849   :  { %v4246_v43 = vpop.f32.mrb[37].mxu0  ;;  %v4606_v37 = vpop.f32.mrb[61].mxu1 }
 0x84a   :  { %v8163_v23 = vpop.f32.mrb[38].mxu0  ;;  %v8211_v2 = vpop.f32.mrb[62].mxu1 }
 0x84b   :  { %v4262_v35 = vpack.c.bf16 %v8163_v23, %v8162_v39  ;;  %v4249_v46 = vpop.f32.mrb[39].mxu0  ;;  %v4622_v1 = vpack.c.bf16 %v8211_v2, %v8210_v47  ;;  %v4609_v59 = vpop.f32.mrb[63].mxu1 }
 0x84c   :  { %v4261_v29 = vpack.c.bf16 %v4249_v46, %v4246_v43  ;;  %v4621_v52 = vpack.c.bf16 %v4609_v59, %v4606_v37  ;;  %v8871_v37 = vld [vmem:[%s9125_s30 + $0x30] sm:$0xff]  }
 0x84e   :  { %8168 = vmatprep.mubr.msk.bf16.mxu0 %vm4280_vm4, %v4261_v29 }
 0x84f   :  { %8169 = vmatmul.mubr.msk.bf16.vlgmr.msra.gmra.mrb[40].mxu0 %vm4280_vm4, %v4262_v35  ;;  %v8872_v35 = vld [vmem:[%s9125_s30 + $0x38] sm:$0xff]   ;;  %s10386_s30 = sld [smem:[#allocation13_spill]] }
 0x850   :  { %8176 = vmatprep.mubr.msk.bf16.mxu0 %vm4280_vm4, %v4185_v17  ;;  %8173 = vmatpush3.bf16.msra.mxu0 %v8855_v60  ;;  %v8868_v60 = vld [vmem:[%s9120_s24 + $0x18] sm:$0xff]   ;;  %s10385_s24 = sld [smem:[#allocation16_spill]] }
 0x851   :  { %8174 = vmatprep.subr.bf16.mxu0 %v8856_v44 }
 0x854   :  { %8175 = vmatpush3.bf16.msra.mxu0 %v8856_v44 }
 0x855   :  { %8192 = vmatprep.subr.bf16.mxu0 %v8857_v53 }
 0x85b   :  { %8177 = vmatmul.mubr.msk.bf16.vlgmr.msra.gmra.mrb[40].mxu0 %vm4280_vm4, %v4186_v14 }
 0x85c   :  { %8193 = vmatpush3.bf16.msra.mxu0 %v8857_v53  ;;  %8196 = vmatprep.mubr.msk.bf16.mxu0 %vm4280_vm4, %v4473_v3 }
 0x85d   :  { %8194 = vmatprep.subr.bf16.mxu0 %v8858_v34 }
 0x860   :  { %8195 = vmatpush3.bf16.msra.mxu0 %v8858_v34 }
 0x861   :  { %8212 = vmatprep.subr.bf16.mxu0 %v8859_v19 }
 0x867   :  { %8197 = vmatmul.mubr.msk.bf16.vlgmr.msra.gmra.mrb[40].mxu0 %vm4280_vm4, %v4474_v40 }
 0x868   :  { %8213 = vmatpush3.bf16.msra.mxu0 %v8859_v19  ;;  %8216 = vmatprep.mubr.msk.bf16.mxu0 %vm4280_vm4, %v4621_v52 }
 0x869   :  { %8214 = vmatprep.subr.bf16.mxu0 %v8860_v20 }
 0x86c   :  { %8215 = vmatpush3.bf16.msra.mxu0 %v8860_v20 }
 0x86d   :  { %8228 = vmatprep.subr.bf16.mxu0 %v9053_v22 }
 0x873   :  { %8217 = vmatmul.mubr.msk.bf16.vlgmr.msra.gmra.mrb[40].mxu0 %vm4280_vm4, %v4622_v1 }
 0x874   :  { %8232 = vmatprep.mubr.msk.bf16.mxu0 %vm9054_vm0, %v9053_v22 }
 0x946   :  { %v8218_v45 = vpop.f32.mrb[40].mxu0 }
 0x947   :  { %v4708_v13 = vadd.f32 %v8218_v45, %v6895_v41  ;;  %v4680_v36 = vpop.f32.mrb[41].mxu0 }
 0x948   :  { %v4706_v58 = vadd.f32 %v6895_v41, %v4680_v36  ;;  %v8219_v27 = vpop.f32.mrb[42].mxu0 }
 0x949   :  { %v4709_v24 = vadd.f32 %v8219_v27, %v6895_v41  ;;  %v4683_v6 = vpop.f32.mrb[43].mxu0  ;;  %v4712_v18 = vmax.f32 %v4708_v13, 0.0  ;;  %v6934_v13 = vld [vmem:[%s9130_s6] ss:$0 sm:$0xff]  ;;  %s10387_s6 = sld [smem:[#allocation15_spill]] }
 0x94a   :  { %v4707_v62 = vadd.f32 %v6895_v41, %v4683_v6  ;;  %v4710_v49 = vmax.f32 %v4706_v58, 0.0 }
 0x94b   :  { %v4713_v42 = vmax.f32 %v4709_v24, 0.0 }
 0x94c   :  { %v4711_v5 = vmax.f32 %v4707_v62, 0.0 }
 0x94d   :  { %v4715_v4 = vpack.c.bf16 %v4713_v42, %v4712_v18 }
 0x94e   :  { %v4714_v15 = vpack.c.bf16 %v4711_v5, %v4710_v49 }
 0x950   :  { %8221 = vmatpush3.bf16.msra.mxu1 %v4714_v15  ;;  %8229 = vmatpush3.bf16.msra.mxu0 %v4714_v15 }
 0x951   :  { %8222 = vmatprep.subr.bf16.mxu1 %v9053_v22  ;;  %8230 = vmatprep.subr.bf16.mxu0 %v9053_v22 }
 0x954   :  { %8223 = vmatpush3.bf16.msra.mxu1 %v4715_v4  ;;  %8231 = vmatpush3.bf16.msra.mxu0 %v4715_v4 }
 0x955   :  { %8236 = vmatprep.subr.bf16.mxu1 %v9053_v22  ;;  %8244 = vmatprep.subr.bf16.mxu0 %v9053_v22 }
 0x957   :  { %8225 = vmatmul.mubr.msk.bf16.vlgmr.msra.gmra.mrb[64].mxu1 %vm4280_vm4, %v8861_v26  ;;  %8233 = vmatmul.mubr.msk.bf16.vlgmr.msra.gmra.mrb[44].mxu0 %vm4280_vm4, %v8862_v55  ;;  %v8875_v26 = vld [vmem:[%s10376_s5 + $0x20] sm:$0xff]  }
 0x958   :  { %8237 = vmatpush3.bf16.msra.mxu1 %v8863_v30  ;;  %8245 = vmatpush3.bf16.msra.mxu0 %v8864_v7  ;;  %v8876_v55 = vld [vmem:[%s10376_s5] sm:$0xff]   ;;  %v8877_v30 = vld [vmem:[%s10376_s5 + $0x28] sm:$0xff]  }
 0x959   :  { %8238 = vmatprep.subr.bf16.mxu1 %v9053_v22  ;;  %8246 = vmatprep.subr.bf16.mxu0 %v9053_v22  ;;  %v8878_v7 = vld [vmem:[%s10376_s5 + $0x8] sm:$0xff]  }
 0x95a   :  { %8240 = vmatprep.mubr.msk.bf16.mxu1 %vm9054_vm0, %v9053_v22  ;;  %8248 = vmatprep.mubr.msk.bf16.mxu0 %vm9054_vm0, %v9053_v22 }
 0x95c   :  { %8239 = vmatpush3.bf16.msra.mxu1 %v8865_v12  ;;  %8247 = vmatpush3.bf16.msra.mxu0 %v8866_v54  ;;  %v8879_v12 = vld [vmem:[%s10376_s5 + $0x30] sm:$0xff]  }
 0x95d   :  { %8252 = vmatprep.subr.bf16.mxu1 %v9053_v22  ;;  %8260 = vmatprep.subr.bf16.mxu0 %v9053_v22  ;;  %v8880_v54 = vld [vmem:[%s10376_s5 + $0x10] sm:$0xff]  }
 0xa2a   :  { %v4760_v50 = vpop.f32.mrb[64].mxu1  ;;  %v4817_v9 = vpop.f32.mrb[44].mxu0 }
 0xa2b   :  { %v8226_v33 = vpop.f32.mrb[65].mxu1  ;;  %v8234_v25 = vpop.f32.mrb[45].mxu0 }
 0xa2c   :  { %v4763_v38 = vpop.f32.mrb[66].mxu1  ;;  %v4820_v11 = vpop.f32.mrb[46].mxu0 }
 0xa2d   :  { %v4767_v61 = vpack.c.bf16 %v4763_v38, %v4760_v50  ;;  %v4824_v32 = vpack.c.bf16 %v4820_v11, %v4817_v9  ;;  %v8235_v10 = vpop.f32.mrb[47].mxu0  ;;  %v8227_v63 = vpop.f32.mrb[67].mxu1  ;;  %v8881_v50 = vld [vmem:[%s10376_s5 + $0x38] sm:$0xff]  }
 0xa2e   :  { %v8882_v9 = vld [vmem:[%s10376_s5 + $0x18] sm:$0xff]  }
 0xa2f   :  { %8241 = vmatmul.mubr.msk.bf16.vlgmr.msra.gmra.mrb[68].mxu1 %vm4280_vm4, %v4824_v32  ;;  %8249 = vmatmul.mubr.msk.bf16.vlgmr.msra.gmra.mrb[48].mxu0 %vm4280_vm4, %v4767_v61 }
 0xa30   :  { %8253 = vmatpush3.bf16.msra.mxu1 %v4714_v15  ;;  %8256 = vmatprep.mubr.msk.bf16.mxu1 %vm9054_vm0, %v9053_v22 }
 0xa31   :  { %8254 = vmatprep.subr.bf16.mxu1 %v9053_v22  ;;  %8264 = vmatprep.mubr.msk.bf16.mxu0 %vm9054_vm0, %v9053_v22 }
 0xa32   :  { %8261 = vmatpush3.bf16.msra.mxu0 %v8869_v51  ;;  %v8885_v51 = vld [vmem:[%s10376_s5 + $0x40] sm:$0xff]  }
 0xa33   :  { %8262 = vmatprep.subr.bf16.mxu0 %v9053_v22 }
 0xa34   :  { %8255 = vmatpush3.bf16.msra.mxu1 %v4715_v4 }
 0xa35   :  { %8268 = vmatprep.subr.bf16.mxu1 %v9053_v22 }
 0xa36   :  { %8263 = vmatpush3.bf16.msra.mxu0 %v8870_v31  ;;  %v8883_v31 = vld [vmem:[%s9135_s12 + $0x10] sm:$0xff]  }
 0xa37   :  { %8257 = vmatmul.mubr.msk.bf16.vlgmr.msra.gmra.mrb[72].mxu1 %vm4280_vm4, %v8867_v56  ;;  %8276 = vmatprep.subr.bf16.mxu0 %v9053_v22 }
 0xa38   :  { %8269 = vmatpush3.bf16.msra.mxu1 %v4714_v15  ;;  %8272 = vmatprep.mubr.msk.bf16.mxu1 %vm9054_vm0, %v9053_v22  ;;  %v8874_v15 = vld [vmem:[%s9135_s12] sm:$0xff]  }
 0xa39   :  { %8270 = vmatprep.subr.bf16.mxu1 %v9053_v22 }
 0xa3c   :  { %8271 = vmatpush3.bf16.msra.mxu1 %v4715_v4  ;;  %v8873_v4 = vld [vmem:[%s9135_s12 + $0x8] sm:$0xff]  }
 0xa3d   :  { %8284 = vmatprep.subr.bf16.mxu1 %v9053_v22 }
 0xa3f   :  { %8273 = vmatmul.mubr.msk.bf16.vlgmr.msra.gmra.mrb[76].mxu1 %vm4280_vm4, %v8868_v60 }
 0xa40   :  { %8286 = vmatprep.mubr.msk.bf16.mxu1 %vm9054_vm0, %v9053_v22 }
 0xb02   :  { %v4879_v21 = vpop.f32.mrb[68].mxu1  ;;  %v4935_v16 = vpop.f32.mrb[48].mxu0 }
 0xb03   :  { %v4936_v28 = vadd.f32 %v4935_v16, %v4879_v21  ;;  %v8242_v0 = vpop.f32.mrb[69].mxu1  ;;  %v8250_v14 = vpop.f32.mrb[49].mxu0  ;;  %v8884_v21 = vld [vmem:[%s9135_s12 + $0x18] sm:$0xff]   ;;  %v8886_v16 = vld [vmem:[%s10376_s5 + $0x48] sm:$0xff]   ;;  %s10388_s12 = sld [smem:[#allocation17_spill]] }
 0xb04   :  { %v4882_v8 = vpop.f32.mrb[70].mxu1  ;;  %v4938_v40 = vpop.f32.mrb[50].mxu0  ;;  %v8888_v0 = vld [vmem:[%s10376_s5 + $0x60] sm:$0xff]   ;;  %v8889_v14 = vld [vmem:[%s10376_s5 + $0x58] sm:$0xff]  }
 0xb05   :  { %v4939_v48 = vadd.f32 %v4938_v40, %v4882_v8  ;;  %v8243_v17 = vpop.f32.mrb[71].mxu1  ;;  %v8251_v3 = vpop.f32.mrb[51].mxu0  ;;  %v8890_v8 = vld [vmem:[%s10376_s5 + $0x68] sm:$0xff]   ;;  %v8891_v40 = vld [vmem:[%s10376_s5 + $0x70] sm:$0xff]  }
 0xb0a   :  { %v4987_v39 = vpop.f32.mrb[72].mxu1 }
 0xb0b   :  { %v8258_v47 = vpop.f32.mrb[73].mxu1 }
 0xb0c   :  { %v4990_v43 = vpop.f32.mrb[74].mxu1 }
 0xb0d   :  { %v4994_v23 = vpack.c.bf16 %v4990_v43, %v4987_v39  ;;  %v8259_v2 = vpop.f32.mrb[75].mxu1 }
 0xb0f   :  { %8265 = vmatmul.mubr.msk.bf16.vlgmr.msra.gmra.mrb[52].mxu0 %vm4280_vm4, %v4994_v23 }
 0xb10   :  { %8277 = vmatpush3.bf16.msra.mxu0 %v8871_v37  ;;  %8280 = vmatprep.mubr.msk.bf16.mxu0 %vm9054_vm0, %v9053_v22 }
 0xb11   :  { %8278 = vmatprep.subr.bf16.mxu0 %v9053_v22 }
 0xb12   :  { %v5103_v46 = vpop.f32.mrb[76].mxu1 }
 0xb13   :  { %v8274_v1 = vpop.f32.mrb[77].mxu1 }
 0xb14   :  { %v5106_v59 = vpop.f32.mrb[78].mxu1  ;;  %8279 = vmatpush3.bf16.msra.mxu0 %v8872_v35 }
 0xb15   :  { %v5110_v29 = vpack.c.bf16 %v5106_v59, %v5103_v46  ;;  %v8275_v52 = vpop.f32.mrb[79].mxu1  ;;  %8290 = vmatprep.subr.bf16.mxu0 %v9053_v22 }
 0xb17   :  { %8281 = vmatmul.mubr.msk.bf16.vlgmr.msra.gmra.mrb[56].mxu0 %vm4280_vm4, %v5110_v29 }
 0xb18   :  { %8292 = vmatprep.mubr.msk.bf16.mxu0 %vm9054_vm0, %v9053_v22 }
 0xbe2   :  { %v5049_v44 = vpop.f32.mrb[52].mxu0 }
 0xbe3   :  { %v5056_v53 = vadd.f32 %v5049_v44, %v4936_v28  ;;  %v8266_v34 = vpop.f32.mrb[53].mxu0  ;;  %v8887_v28 = vld [vmem:[%s10376_s5 + $0x50] sm:$0xff]  }
 0xbe4   :  { %v5052_v19 = vpop.f32.mrb[54].mxu0 }
 0xbe5   :  { %v5057_v20 = vadd.f32 %v5052_v19, %v4939_v48  ;;  %v8267_v41 = vpop.f32.mrb[55].mxu0  ;;  %v8892_v48 = vld [vmem:[%s10376_s5 + $0x78] sm:$0xff]  }
 0xbea   :  { %v5165_v45 = vpop.f32.mrb[56].mxu0 }
 0xbeb   :  { %v5172_v36 = vadd.f32 %v5165_v45, %v5056_v53  ;;  %v8282_v58 = vpop.f32.mrb[57].mxu0  ;;  %v8893_v45 = vld [vmem:[%s10377_s13] sm:$0xff]  }
 0xbec   :  { %v5168_v27 = vpop.f32.mrb[58].mxu0  ;;  %v8896_v58 = vld [vmem:[%s10377_s13 + $0x18] sm:$0xff]  }
 0xbed   :  { %v5181_v24 = vadd.f32 %v6934_v13, %v5172_v36  ;;  %v5173_v6 = vadd.f32 %v5168_v27, %v5057_v20  ;;  %v8283_v62 = vpop.f32.mrb[59].mxu0  ;;  %v8895_v36 = vld [vmem:[%s10377_s13 + $0x10] sm:$0xff]   ;;  %v5809_v27 = vld [vmem:[%s10378_s17] sm:$0xff] }
 0xbee   :  { %5813 = vrot.lane.b32.xlu0 %v5809_v27, %s9056_s25  ;;  %v8924_v27 = vld [vmem:[%s10382_s8 + $0x38] sm:$0xff]  }
 0xbef   :  { %v5182_v18 = vadd.f32 %v6934_v13, %v5173_v6  ;;  %v5183_v42 = vmax.f32 %v5181_v24, 0.0  ;;  %v8894_v13 = vld [vmem:[%s10377_s13 + $0x8] sm:$0xff]  }
 0xbf1   :  { %v5184_v49 = vmax.f32 %v5182_v18, 0.0 }
 0xbf3   :  { %v5185_v5 = vpack.c.bf16 %v5184_v49, %v5183_v42 }
 0xbf5   :  { %8285 = vmatpush3.bf16.msra.mxu1 %v5185_v5  ;;  %8291 = vmatpush3.bf16.msra.mxu0 %v5185_v5 }
 0xbf6   :  { %8296 = vmatprep.subr.bf16.mxu1 %v9053_v22  ;;  %8308 = vmatprep.subr.bf16.mxu0 %v9053_v22 }
 0xbf8   :  { %8293 = vmatmul.mubr.msk.bf16.vlgmr.msra.gmra.mrb[60].mxu0 %vm1442_vm1, %v8873_v4  ;;  %8287 = vmatmul.mubr.msk.bf16.vlgmr.msra.gmra.mrb[80].mxu1 %vm1442_vm1, %v8874_v15 }
 0xbf9   :  { %8297 = vmatpush3.bf16.msra.mxu1 %v8875_v26  ;;  %8309 = vmatpush3.bf16.msra.mxu0 %v8876_v55  ;;  %v6993_v26 = vld [vmem:[%s10379_s21] ss:$0 sm:$0xff] }
 0xbfa   :  { %8298 = vmatprep.subr.bf16.mxu1 %v9053_v22  ;;  %8310 = vmatprep.subr.bf16.mxu0 %v9053_v22 }
 0xbfb   :  { %8304 = vmatprep.mubr.msk.bf16.mxu1 %vm9054_vm0, %v9053_v22  ;;  %8316 = vmatprep.mubr.msk.bf16.mxu0 %vm9054_vm0, %v9053_v22 }
 0xbfd   :  { %8299 = vmatpush3.bf16.msra.mxu1 %v8877_v30  ;;  %8311 = vmatpush3.bf16.msra.mxu0 %v8878_v7 }
 0xbfe   :  { %8300 = vmatprep.subr.bf16.mxu1 %v9053_v22  ;;  %8312 = vmatprep.subr.bf16.mxu0 %v9053_v22 }
 0xc01   :  { %8301 = vmatpush3.bf16.msra.mxu1 %v8879_v12  ;;  %8313 = vmatpush3.bf16.msra.mxu0 %v8880_v54 }
 0xc02   :  { %8302 = vmatprep.subr.bf16.mxu1 %v9053_v22  ;;  %8314 = vmatprep.subr.bf16.mxu0 %v9053_v22 }
 0xc05   :  { %8303 = vmatpush3.bf16.msra.mxu1 %v8881_v50  ;;  %8315 = vmatpush3.bf16.msra.mxu0 %v8882_v9  ;;  %v8897_v9 = vld [vmem:[%s10380_s29] ss:$8 sps:$4 sm:$0xff]  }
 0xc06   :  { %8320 = vmatprep.subr.bf16.mxu1 %v9053_v22  ;;  %8326 = vmatprep.subr.bf16.mxu0 %v9053_v22 }
 0xccb   :  { %v5291_v33 = vpop.f32.mrb[60].mxu0  ;;  %v5230_v25 = vpop.f32.mrb[80].mxu1 }
 0xccc   :  { %v8294_v38 = vpop.f32.mrb[61].mxu0  ;;  %v8288_v11 = vpop.f32.mrb[81].mxu1 }
 0xccd   :  { %v5294_v61 = vpop.f32.mrb[62].mxu0  ;;  %v5233_v32 = vpop.f32.mrb[82].mxu1  ;;  %v8900_v38 = vld [vmem:[%s10380_s29 + $0x10] ss:$8 sps:$4 sm:$0xff]   ;;  %v6994_v11 = vld [vmem:[%s10381_s3] ss:$0 sm:$0xff] }
 0xcce   :  { %v5298_v10 = vpack.c.bf16 %v5294_v61, %v5291_v33  ;;  %v5237_v63 = vpack.c.bf16 %v5233_v32, %v5230_v25  ;;  %v8295_v56 = vpop.f32.mrb[63].mxu0  ;;  %v8289_v60 = vpop.f32.mrb[83].mxu1  ;;  %v8899_v33 = vld [vmem:[%s10380_s29 + $0x4] ss:$8 sps:$4 sm:$0xff]   ;;  %v8902_v25 = vld [vmem:[%s10380_s29 + $0x14] ss:$8 sps:$4 sm:$0xff]  }
 0xcd0   :  { %8305 = vmatmul.mubr.msk.bf16.vlgmr.msra.gmra.mrb[84].mxu1 %vm4129_vm3, %v5298_v10  ;;  %8317 = vmatmul.mubr.msk.bf16.vlgmr.msra.gmra.mrb[64].mxu0 %vm4129_vm3, %v5237_v63 }
 0xcd1   :  { %8321 = vmatpush3.bf16.msra.mxu1 %v5185_v5  ;;  %8322 = vmatprep.mubr.msk.bf16.mxu1 %vm9054_vm0, %v9053_v22 }
 0xcd2   :  { %8338 = vmatprep.subr.bf16.mxu1 %v9053_v22  ;;  %8327 = vmatpush3.bf16.msra.mxu0 %v8885_v51 }
 0xcd3   :  { %8328 = vmatprep.subr.bf16.mxu0 %v9053_v22  ;;  %8334 = vmatprep.mubr.msk.bf16.mxu0 %vm9054_vm0, %v9053_v22 }
 0xcd6   :  { %8329 = vmatpush3.bf16.msra.mxu0 %v8886_v16  ;;  %v8905_v16 = vld [vmem:[%s10380_s29 + $0x24] ss:$8 sps:$4 sm:$0xff]  }
 0xcd7   :  { %8330 = vmatprep.subr.bf16.mxu0 %v9053_v22 }
 0xcd8   :  { %8323 = vmatmul.mubr.msk.bf16.vlgmr.msra.gmra.mrb[88].mxu1 %vm1442_vm1, %v8883_v31 }
 0xcd9   :  { %8339 = vmatpush3.bf16.msra.mxu1 %v5185_v5  ;;  %8340 = vmatprep.mubr.msk.bf16.mxu1 %vm9054_vm0, %v9053_v22 }
 0xcda   :  { %8344 = vmatprep.subr.bf16.mxu1 %v9053_v22  ;;  %8331 = vmatpush3.bf16.msra.mxu0 %v8887_v28 }
 0xcdb   :  { %8332 = vmatprep.subr.bf16.mxu0 %v9053_v22 }
 0xcde   :  { %8333 = vmatpush3.bf16.msra.mxu0 %v8889_v14  ;;  %v8908_v14 = vld [vmem:[%s10380_s29 + $0x34] ss:$8 sps:$4 sm:$0xff]  }
 0xcdf   :  { %8356 = vmatprep.subr.bf16.mxu0 %v9053_v22 }
 0xce0   :  { %8341 = vmatmul.mubr.msk.bf16.vlgmr.msra.gmra.mrb[92].mxu1 %vm1442_vm1, %v8884_v21 }
 0xce1   :  { %8352 = vmatprep.mubr.msk.bf16.mxu1 %vm9054_vm0, %v9053_v22  ;;  %8345 = vmatpush3.bf16.msra.mxu1 %v8888_v0  ;;  %v8903_v0 = vld [vmem:[%s10380_s29 + $0x20] ss:$8 sps:$4 sm:$0xff]  }
 0xce2   :  { %8346 = vmatprep.subr.bf16.mxu1 %v9053_v22 }
 0xce5   :  { %8347 = vmatpush3.bf16.msra.mxu1 %v8890_v8  ;;  %v8906_v8 = vld [vmem:[%s10380_s29 + $0x30] ss:$8 sps:$4 sm:$0xff]  }
 0xce6   :  { %8348 = vmatprep.subr.bf16.mxu1 %v9053_v22 }
 0xce9   :  { %8349 = vmatpush3.bf16.msra.mxu1 %v8891_v40  ;;  %v5814_v40 = vpop.permute.xlu0 %5813 }
 0xcea   :  { %8350 = vmatprep.subr.bf16.mxu1 %v9053_v22 }
 0xced   :  { %8351 = vmatpush3.bf16.msra.mxu1 %v8892_v48  ;;  %v8909_v48 = vld [vmem:[%s10382_s8 + $0x40] sm:$0xff]  }
 0xcee   :  { %5895 = vmatprep.subr.bf16.mxu1 %v8899_v33 }
 0xda3   :  { %v5369_v17 = vpop.f32.mrb[84].mxu1  ;;  %v5437_v3 = vpop.f32.mrb[64].mxu0 }
 0xda4   :  { %v8306_v39 = vpop.f32.mrb[85].mxu1  ;;  %v5438_v47 = vadd.f32 %v5437_v3, %v5369_v17  ;;  %v8318_v43 = vpop.f32.mrb[65].mxu0  ;;  %v8910_v17 = vld [vmem:[%s10382_s8] sm:$0xff]   ;;  %v8911_v3 = vld [vmem:[%s10382_s8 + $0x48] sm:$0xff]  }
 0xda5   :  { %v5372_v37 = vpop.f32.mrb[86].mxu1  ;;  %v5440_v23 = vpop.f32.mrb[66].mxu0  ;;  %v8912_v43 = vld [vmem:[%s10382_s8 + $0x8] sm:$0xff]  }
 0xda6   :  { %v8307_v2 = vpop.f32.mrb[87].mxu1  ;;  %v5441_v35 = vadd.f32 %v5440_v23, %v5372_v37  ;;  %v8319_v46 = vpop.f32.mrb[67].mxu0 }
 0xda7   :  { %v8913_v2 = vld [vmem:[%s10382_s8 + $0x50] sm:$0xff]  }
 0xda8   :  { %v8914_v46 = vld [vmem:[%s10382_s8 + $0x10] sm:$0xff]  }
 0xdab   :  { %v5489_v1 = vpop.f32.mrb[88].mxu1 }
 0xdac   :  { %v8324_v59 = vpop.f32.mrb[89].mxu1 }
 0xdad   :  { %v5492_v29 = vpop.f32.mrb[90].mxu1  ;;  %v8916_v59 = vld [vmem:[%s10382_s8 + $0x18] sm:$0xff]  }
 0xdae   :  { %v5496_v52 = vpack.c.bf16 %v5492_v29, %v5489_v1  ;;  %v8325_v44 = vpop.f32.mrb[91].mxu1  ;;  %v8915_v1 = vld [vmem:[%s10382_s8 + $0x58] sm:$0xff]   ;;  %v8917_v29 = vld [vmem:[%s10382_s8 + $0x60] sm:$0xff]  }
 0xdaf   :  { %v8919_v44 = vld [vmem:[%s10382_s8 + $0x68] sm:$0xff]  }
 0xdb0   :  { %8335 = vmatmul.mubr.msk.bf16.vlgmr.msra.gmra.mrb[68].mxu0 %vm4129_vm3, %v5496_v52  ;;  %v8918_v52 = vld [vmem:[%s10382_s8 + $0x20] sm:$0xff]  }
 0xdb1   :  { %8364 = vmatprep.mubr.msk.bf16.mxu0 %vm9054_vm0, %v9053_v22  ;;  %8357 = vmatpush3.bf16.msra.mxu0 %v8893_v45  ;;  %v8920_v45 = vld [vmem:[%s10382_s8 + $0x28] sm:$0xff]  }
 0xdb2   :  { %8358 = vmatprep.subr.bf16.mxu0 %v9053_v22 }
 0xdb3   :  { %v5621_v53 = vpop.f32.mrb[92].mxu1 }
 0xdb4   :  { %v8342_v34 = vpop.f32.mrb[93].mxu1 }
 0xdb5   :  { %v5624_v19 = vpop.f32.mrb[94].mxu1  ;;  %8359 = vmatpush3.bf16.msra.mxu0 %v8894_v13  ;;  %v8921_v13 = vld [vmem:[%s10382_s8 + $0x70] sm:$0xff]  }
 0xdb6   :  { %v5628_v20 = vpack.c.bf16 %v5624_v19, %v5621_v53  ;;  %v8343_v41 = vpop.f32.mrb[95].mxu1  ;;  %8360 = vmatprep.subr.bf16.mxu0 %v9053_v22 }
 0xdb8   :  { %8353 = vmatmul.mubr.msk.bf16.vlgmr.msra.gmra.mrb[96].mxu1 %vm4129_vm3, %v5628_v20 }
 0xdb9   :  { %5927 = vmatprep.mubr.bf16.mxu1 %v9055_v57  ;;  %8361 = vmatpush3.bf16.msra.mxu0 %v8895_v36  ;;  %v5810_v57 = vld [vmem:[%s10378_s17 + $0x8] sm:$0xff]  ;;  %v8922_v36 = vld [vmem:[%s10382_s8 + $0x30] sm:$0xff]  }
 0xdba   :  { %8362 = vmatprep.subr.bf16.mxu0 %v9053_v22  ;;  %5815 = vrot.lane.b32.xlu0 %v5810_v57, %s9056_s25  ;;  %v8925_v57 = vld [vmem:[%s10383_s14] sm:$0xff]  }
 0xdbb   :  { %5896 = vmatpush1.bf16.msra.mxu1 %v8897_v9 }
 0xdbc   :  { %5897 = vmatprep.subr.bf16.mxu1 %v8902_v25 }
 0xdbd   :  { %8363 = vmatpush3.bf16.msra.mxu0 %v8896_v58  ;;  %v8923_v58 = vld [vmem:[%s10382_s8 + $0x78] sm:$0xff]  }
 0xdbe   :  { %7871 = vmatprep.subr.bf16.mxu0 %v8909_v48 }
 0xdbf   :  { %5898 = vmatpush1.bf16.msra.mxu1 %v8900_v38 }
 0xdc0   :  { %5899 = vmatprep.subr.bf16.mxu1 %v8905_v16  ;;  %v8935_v16 = vld [vmem:[%s10385_s24 + $0x10] sm:$0xff]  }
 0xdc3   :  { %5900 = vmatpush1.bf16.msra.mxu1 %v8903_v0  ;;  %v8937_v0 = vld [vmem:[%s10385_s24 + $0x20] sm:$0xff]  }
 0xdc4   :  { %5901 = vmatprep.subr.bf16.mxu1 %v8908_v14  ;;  %v8938_v14 = vld [vmem:[%s10385_s24 + $0x28] sm:$0xff]  }
 0xdc7   :  { %5902 = vmatpush1.bf16.msra.mxu1 %v8906_v8 }
 0xdc8   :  { %8368 = vmatprep.subr.bf16.mxu1 %v9053_v22 }
 0xe2c   :  { %v5816_v23 = vpop.permute.xlu0 %5815 }
 0xe83   :  { %v5567_v24 = vpop.f32.mrb[68].mxu0 }
 0xe84   :  { %v5574_v6 = vadd.f32 %v5567_v24, %v5438_v47  ;;  %v8336_v62 = vpop.f32.mrb[69].mxu0  ;;  %v8926_v24 = vld [vmem:[%s10383_s14 + $0x8] sm:$0xff]  }
 0xe85   :  { %v5570_v18 = vpop.f32.mrb[70].mxu0  ;;  %v8928_v62 = vld [vmem:[%s10383_s14 + $0x18] sm:$0xff]  }
 0xe86   :  { %v5575_v42 = vadd.f32 %v5570_v18, %v5441_v35  ;;  %v8337_v49 = vpop.f32.mrb[71].mxu0  ;;  %v8929_v18 = vld [vmem:[%s10383_s14 + $0x20] sm:$0xff]  }
 0xe8b   :  { %v5699_v5 = vpop.f32.mrb[96].mxu1 }
 0xe8c   :  { %v5706_v4 = vadd.f32 %v5699_v5, %v5574_v6  ;;  %v8354_v15 = vpop.f32.mrb[97].mxu1  ;;  %v8927_v6 = vld [vmem:[%s10383_s14 + $0x10] sm:$0xff]  }
 0xe8d   :  { %v5702_v55 = vpop.f32.mrb[98].mxu1 }
 0xe8e   :  { %v5707_v30 = vadd.f32 %v5702_v55, %v5575_v42  ;;  %v8355_v7 = vpop.f32.mrb[99].mxu1  ;;  %v5715_v12 = vadd.f32 %v6993_v26, %v5706_v4  ;;  %v5842_v42 = vlaneseq  ;;  %v5840_v4 = vld [vmem:[%s10384_s19] sm:$0x3] }
 0xe90   :  { %v5716_v54 = vadd.f32 %v6993_v26, %v5707_v30  ;;  %v5843_v49 = vshrl.u32 %v5842_v42, 7 }
 0xe92   :  { %v5717_v50 = vpack.c.bf16 %v5716_v54, %v5715_v12  ;;  %v5844_v5 = vsub.s32 0, %v5843_v49  ;;  %v5848_v15 = vsub.s32 1, %v5843_v49 }
 0xe94   :  { %8365 = vmatmul.mubr.msk.bf16.vlgmr.msra.gmra.mrb[72].mxu0 %vm4129_vm3, %v5717_v50  ;;  %v5845_v26 = vrot.slane %v5840_v4, %v5844_v5  ;;  %v5849_v55 = vrot.slane %v5840_v4, %v5848_v15 }
 0xe95   :  { %7872 = vmatpush3.bf16.msra.mxu0 %v8910_v17 }
 0xe96   :  { %7873 = vmatprep.subr.bf16.mxu0 %v8911_v3 }
 0xe99   :  { %7874 = vmatpush3.bf16.msra.mxu0 %v8912_v43 }
 0xe9a   :  { %7875 = vmatprep.subr.bf16.mxu0 %v8913_v2 }
 0xe9d   :  { %7876 = vmatpush3.bf16.msra.mxu0 %v8914_v46  ;;  %v8939_v46 = vld [vmem:[%s10385_s24 + $0x30] sm:$0xff]  }
 0xe9e   :  { %7877 = vmatprep.subr.bf16.mxu0 %v8915_v1  ;;  %v8940_v1 = vld [vmem:[%s10385_s24 + $0x38] sm:$0xff]  }
 0xea1   :  { %7878 = vmatpush3.bf16.msra.mxu0 %v8916_v59  ;;  %v8941_v59 = vld [vmem:[%s9200_s20] sm:$0xff]  }
 0xea2   :  { %7879 = vmatprep.subr.bf16.mxu0 %v8917_v29  ;;  %v8942_v29 = vld [vmem:[%s9200_s20 + $0x8] sm:$0xff]  }
 0xea5   :  { %7880 = vmatpush3.bf16.msra.mxu0 %v8918_v52  ;;  %v7026_v52 = vld [vmem:[%s10387_s6] ss:$0 sm:$0xff] }
 0xea6   :  { %7881 = vmatprep.subr.bf16.mxu0 %v8919_v44 }
 0xea9   :  { %7882 = vmatpush3.bf16.msra.mxu0 %v8920_v45 }
 0xeaa   :  { %7883 = vmatprep.subr.bf16.mxu0 %v8921_v13 }
 0xead   :  { %7884 = vmatpush3.bf16.msra.mxu0 %v8922_v36 }
 0xeae   :  { %7885 = vmatprep.subr.bf16.mxu0 %v8923_v58  ;;  %v8943_v58 = vld [vmem:[%s9200_s20 + $0x10] sm:$0xff]  }
 0xeb1   :  { %7886 = vmatpush3.bf16.msra.mxu0 %v8924_v27  ;;  %v8944_v27 = vld [vmem:[%s9200_s20 + $0x18] sm:$0xff]  }
 0xeb2   :  { %8388 = vmatprep.subr.bf16.mxu0 %v9053_v22 }
 0xf67   :  { %v5794_v61 = vpop.f32.mrb[72].mxu0 }
 0xf68   :  { %v5795_v32 = vadd.f32 %v6994_v11, %v5794_v61  ;;  %v8366_v10 = vpop.f32.mrb[73].mxu0 }
 0xf69   :  { %v5797_v63 = vpop.f32.mrb[74].mxu0 }
 0xf6a   :  { %5801 = vst [vmem:[%s9210_s4] sm:$0xff] %v5795_v32  ;;  %v5803_v56 = vmul.f32 0.5, %v5795_v32  ;;  %v5798_v60 = vadd.f32 %v6994_v11, %v5797_v63  ;;  %v8367_v51 = vpop.f32.mrb[75].mxu0 }
 0xf6b   :  { %v8932_v51 = vld [vmem:[%s10383_s14 + $0x38] sm:$0xff]  }
 0xf6c   :  { %v5805_v31 = vmul.f32 1.442695, %v5803_v56  ;;  %5802 = vst [vmem:[%s9210_s4 + $0x8] sm:$0xff] %v5798_v60  ;;  %v5804_v21 = vmul.f32 0.5, %v5798_v60  ;;  %v8930_v56 = vld [vmem:[%s10383_s14 + $0x28] sm:$0xff]  }
 0xf6e   :  { %8945 = vpow2.f32 %v5805_v31  ;;  %v5807_v28 = vmul.f32 1.442695, %v5804_v21  ;;  %v8933_v31 = vld [vmem:[%s10385_s24] sm:$0xff]   ;;  %v8934_v21 = vld [vmem:[%s10385_s24 + $0x8] sm:$0xff]  }
 0xf70   :  { %8947 = vpow2.f32 %v5807_v28  ;;  %v8936_v28 = vld [vmem:[%s10385_s24 + $0x18] sm:$0xff]  }
 0xf78   :  { %v8946_v39 = vpop.eup %8945 }
 0xf79   :  { %v5819_v47 = vmul.f32 %v8946_v39, %v5814_v40  ;;  %v7009_v40 = vld [vmem:[%s10386_s30] ss:$0 sm:$0xff] }
 0xf7a   :  { %v8948_v37 = vpop.eup %8947 }
 0xf7b   :  { %5823 = vrot.lane.b32.xlu1 %v5819_v47, %s9056_s25  ;;  %v5820_v35 = vmul.f32 %v8948_v37, %v5816_v23 }
 0xf7f   :  { %5825 = vrot.lane.b32.xlu1 %v5820_v35, %s9056_s25 }
 0xfed   :  { %v5824_v53 = vpop.permute.xlu1 %5823 }
 0xfee   :  { %v5829_v19 = vadd.f32 %v5824_v53, %v5795_v32 }
 0xff1   :  { %v5826_v34 = vpop.permute.xlu1 %5825 }
 0xff2   :  { %v5830_v20 = vadd.f32 %v5826_v34, %v5798_v60  ;;  %v8931_v60 = vld [vmem:[%s10383_s14 + $0x30] sm:$0xff]  }
 0xff4   :  { %v5831_v41 = vpack.c.bf16 %v5830_v20, %v5829_v19 }
 0xff6   :  { %7008 = vmatmul.mubr.msk.bf16.vlgmr.msra.gmra.mrb[100].mxu1 %vm4129_vm3, %v5831_v41 }
 0xff7   :  { %8384 = vmatprep.mubr.msk.bf16.mxu1 %vm9054_vm0, %v9053_v22  ;;  %8369 = vmatpush3.bf16.msra.mxu1 %v8925_v57  ;;  %v7035_v57 = vld [vmem:[%s10388_s12] ss:$0 sm:$0xff] }
 0xff8   :  { %8370 = vmatprep.subr.bf16.mxu1 %v9053_v22 }
 0xffb   :  { %8371 = vmatpush3.bf16.msra.mxu1 %v8926_v24 }
 0xffc   :  { %8372 = vmatprep.subr.bf16.mxu1 %v9053_v22 }
 0xfff   :  { %8373 = vmatpush3.bf16.msra.mxu1 %v8927_v6 }
0x1000   :  { %8374 = vmatprep.subr.bf16.mxu1 %v9053_v22 }
0x1003   :  { %8375 = vmatpush3.bf16.msra.mxu1 %v8928_v62 }
0x1004   :  { %8376 = vmatprep.subr.bf16.mxu1 %v9053_v22 }
0x1007   :  { %8377 = vmatpush3.bf16.msra.mxu1 %v8929_v18 }
0x1008   :  { %8378 = vmatprep.subr.bf16.mxu1 %v9053_v22 }
0x100b   :  { %8379 = vmatpush3.bf16.msra.mxu1 %v8930_v56 }
0x100c   :  { %8380 = vmatprep.subr.bf16.mxu1 %v9053_v22 }
0x100f   :  { %8381 = vmatpush3.bf16.msra.mxu1 %v8931_v60 }
0x1010   :  { %8382 = vmatprep.subr.bf16.mxu1 %v9053_v22 }
0x1013   :  { %8383 = vmatpush3.bf16.msra.mxu1 %v8932_v51 }
0x1014   :  { %8408 = vmatprep.subr.bf16.mxu1 %v9053_v22 }
0x10c9   :  { %v5929_v30 = vpop.f32.mrb[100].mxu1 }
0x10ca   :  { %v5930_v7 = vadd.f32 %v5929_v30, %v5845_v26  ;;  %v5931_v12 = vpop.f32.mrb[101].mxu1 }
0x10cb   :  { %v5932_v54 = vadd.f32 %v5931_v12, %v5849_v55  ;;  %v5933_v50 = vpop.f32.mrb[102].mxu1 }
0x10cc   :  { %v5934_v9 = vadd.f32 %v5933_v50, %v5845_v26  ;;  %v5935_v33 = vpop.f32.mrb[103].mxu1  ;;  %v5938_v38 = vmax.f32 %v5930_v7, 0.0  ;;  %v7044_v26 = vld [vmem:[%s9205_s27] ss:$0 sm:$0xff] }
0x10cd   :  { %v5936_v25 = vadd.f32 %v5935_v33, %v5849_v55  ;;  %v5939_v61 = vmax.f32 %v5932_v54, 0.0 }
0x10ce   :  { %v5940_v11 = vmax.f32 %v5934_v9, 0.0 }
0x10cf   :  { %v5941_v32 = vmax.f32 %v5936_v25, 0.0 }
0x10d0   :  { %v5942_v10 = vpack.c.bf16 %v5940_v11, %v5938_v38 }
0x10d1   :  { %v5943_v63 = vpack.c.bf16 %v5941_v32, %v5939_v61 }
0x10d3   :  { %6111 = vmatprep.mubr.bf16.mxu0 %v5943_v63 }
0x10d4   :  { %6112 = vmatmul.mubr.bf16.vlgmr.msra.gmra.mrb[76].mxu0 %v5942_v10 }
0x10d5   :  { %8404 = vmatprep.mubr.msk.bf16.mxu0 %vm9054_vm0, %v9053_v22  ;;  %8389 = vmatpush3.bf16.msra.mxu0 %v8933_v31 }
0x10d6   :  { %8390 = vmatprep.subr.bf16.mxu0 %v9053_v22 }
0x10d9   :  { %8391 = vmatpush3.bf16.msra.mxu0 %v8934_v21 }
0x10da   :  { %8392 = vmatprep.subr.bf16.mxu0 %v9053_v22 }
0x10dd   :  { %8393 = vmatpush3.bf16.msra.mxu0 %v8935_v16 }
0x10de   :  { %8394 = vmatprep.subr.bf16.mxu0 %v9053_v22 }
0x10e1   :  { %8395 = vmatpush3.bf16.msra.mxu0 %v8936_v28 }
0x10e2   :  { %8396 = vmatprep.subr.bf16.mxu0 %v9053_v22 }
0x10e5   :  { %8397 = vmatpush3.bf16.msra.mxu0 %v8937_v0 }
0x10e6   :  { %8398 = vmatprep.subr.bf16.mxu0 %v9053_v22 }
0x10e9   :  { %8399 = vmatpush3.bf16.msra.mxu0 %v8938_v14 }
0x10ea   :  { %8400 = vmatprep.subr.bf16.mxu0 %v9053_v22 }
0x10ed   :  { %8401 = vmatpush3.bf16.msra.mxu0 %v8939_v46 }
0x10ee   :  { %8402 = vmatprep.subr.bf16.mxu0 %v9053_v22 }
0x10f1   :  { %8403 = vmatpush3.bf16.msra.mxu0 %v8940_v1 }
0x11a7   :  { %v7887_v8 = vpop.f32.mrb[76].mxu0 }
0x11a8   :  { %v7888_v48 = vpop.f32.mrb[77].mxu0 }
0x11a9   :  { %v7889_v17 = vadd.f32 %v7888_v48, %v7887_v8  ;;  %v7890_v3 = vpop.f32.mrb[78].mxu0 }
0x11aa   :  { %v7891_v39 = vpop.f32.mrb[79].mxu0 }
0x11ab   :  { %v6114_v47 = vadd.f32 %v7889_v17, %v7009_v40  ;;  %v7892_v43 = vadd.f32 %v7891_v39, %v7890_v3 }
0x11ad   :  { %v6117_v37 = vadd.f32 %v7892_v43, %v7009_v40  ;;  %v6120_v23 = vmax.f32 %v6114_v47, 0.0 }
0x11af   :  { %v6121_v2 = vmax.f32 %v6117_v37, 0.0 }
0x11b1   :  { %v6122_v35 = vpack.c.bf16 %v6121_v2, %v6120_v23 }
0x11b3   :  { %8385 = vmatmul.mubr.bf16.vlgmr.msra.gmra.mrb[104].mxu1 %v6122_v35 }
0x11b4   :  { %8416 = vmatprep.mubr.msk.bf16.mxu1 %vm9054_vm0, %v9053_v22  ;;  %8409 = vmatpush3.bf16.msra.mxu1 %v8941_v59 }
0x11b5   :  { %8410 = vmatprep.subr.bf16.mxu1 %v9053_v22 }
0x11b8   :  { %8411 = vmatpush3.bf16.msra.mxu1 %v8942_v29 }
0x11b9   :  { %8412 = vmatprep.subr.bf16.mxu1 %v9053_v22 }
0x11bc   :  { %8413 = vmatpush3.bf16.msra.mxu1 %v8943_v58 }
0x11bd   :  { %8414 = vmatprep.subr.bf16.mxu1 %v9053_v22 }
0x11c0   :  { %8415 = vmatpush3.bf16.msra.mxu1 %v8944_v27 }
0x1286   :  { %v6228_v44 = vpop.f32.mrb[104].mxu1 }
0x1287   :  { %v6229_v53 = vadd.f32 %v7026_v52, %v6228_v44  ;;  %v8386_v34 = vpop.f32.mrb[105].mxu1 }
0x1288   :  { %v6231_v19 = vpop.f32.mrb[106].mxu1 }
0x1289   :  { %v6232_v20 = vadd.f32 %v7026_v52, %v6231_v19  ;;  %v8387_v41 = vpop.f32.mrb[107].mxu1  ;;  %v6235_v45 = vmax.f32 %v6229_v53, 0.0 }
0x128b   :  { %v6236_v13 = vmax.f32 %v6232_v20, 0.0 }
0x128d   :  { %v6237_v36 = vpack.c.bf16 %v6236_v13, %v6235_v45 }
0x128f   :  { %8405 = vmatmul.mubr.bf16.vlgmr.msra.gmra.mrb[80].mxu0 %v6237_v36 }
0x1362   :  { %v6343_v24 = vpop.f32.mrb[80].mxu0 }
0x1363   :  { %v6344_v6 = vadd.f32 %v7035_v57, %v6343_v24  ;;  %v8406_v62 = vpop.f32.mrb[81].mxu0 }
0x1364   :  { %v6346_v18 = vpop.f32.mrb[82].mxu0 }
0x1365   :  { %v6347_v42 = vadd.f32 %v7035_v57, %v6346_v18  ;;  %v8407_v49 = vpop.f32.mrb[83].mxu0  ;;  %v6350_v5 = vmax.f32 %v6344_v6, 0.0 }
0x1367   :  { %v6351_v4 = vmax.f32 %v6347_v42, 0.0 }
0x1369   :  { %v6352_v15 = vpack.c.bf16 %v6351_v4, %v6350_v5 }
0x136b   :  { %8417 = vmatmul.mubr.msk.bf16.vlgmr.msra.gmra.mrb[108].mxu1 %vm4129_vm3, %v6352_v15 }
0x143e   :  { %v6429_v55 = vpop.f32.mrb[108].mxu1 }
0x143f   :  { %v6430_v30 = vadd.f32 %v7044_v26, %v6429_v55  ;;  %v8418_v22 = vpop.f32.mrb[109].mxu1 }
0x1440   :  { %v6432_v7 = vpop.f32.mrb[110].mxu1 }
0x1441   :  { %6436 = vst [vmem:[%s9215_s9] sm:$0xff] %v6430_v30  ;;  %v6433_v12 = vadd.f32 %v7044_v26, %v6432_v7  ;;  %v8419_v54 = vpop.f32.mrb[111].mxu1 }
0x1443   :  { %6437 = vst [vmem:[%s9215_s9 + $0x8] sm:$0xff] %v6433_v12 }
0x1444   :  { %6446 = vsyncpa [#allocation3], 1 }

</bundles_post_ra>
